<compile_context>
chip_gen: v7x
topology: tpu7x:2x2x1
jax: 0.10.0
libtpu: 0.0.40
codegen_flags: <defaults>
</compile_context>

<pallas_src>
import functools
from typing import NamedTuple

import numpy as np
import jax
import jax.numpy as jnp
from jax import lax
from jax.experimental import pallas as pl
from jax.experimental.pallas import tpu as pltpu


def _round_up(x, m):
    return (x + m - 1) // m * m


def _vmem_capacity_bytes():
    """Physical VMEM of the current chip (conservative v7x fallback)."""
    try:
        info = pltpu.get_tpu_info()
        cap = int(getattr(info, "vmem_capacity_bytes", 0) or 0)
        if cap > 0:
            return cap
    except Exception:
        pass
    return 64 << 20


class EKPlan(NamedTuple):
    batch: int
    mem_len: int
    embed_dim: int
    max_hop: int
    B_pad: int
    M_pad: int
    E_pad: int
    bt: int
    nb: int
    m_chunk: int
    vmem_limit: int


# -----------------------------------------------------------------------------
# Pallas kernel: grid = (batch_tiles, max_hop); one inner step == one hop.
# Carried state (u, previous-hop softmax) lives in VMEM scratch.
# All contractions are VPU broadcast-multiply + reductions (no MXU GEMVs).
# -----------------------------------------------------------------------------
def _ek_forward_kernel(q_ref, gp_ref, mask_ref, m_ref,
                       soft_out_ref, logit_out_ref,
                       u_ref, soft_ref, raw_ref, *, m_chunk):
    t = pl.program_id(1)                                   # hop index
    bt, Mp, Ep = m_ref.shape                               # [bt, M_pad, E_pad]

    @pl.when(t == 0)
    def _():
        u_ref[...] = q_ref[...]                            # u_0 = query_vector

    gp = gp_ref[...]                                       # [bt, M_pad] f32

    # --- "m_C" half of hop t-1:  o_{t-1} = (gp * soft_{t-1}) @ m[t];  u += o
    @pl.when(t > 0)
    def _():
        w = gp * soft_ref[...]                             # [bt, M_pad] f32
        o = jnp.zeros((bt, Ep), jnp.float32)
        # chunked over M: bf16 slab is cast to f32 per consumed chunk only.
        for j0 in range(0, Mp, m_chunk):
            j1 = min(j0 + m_chunk, Mp)
            mc = m_ref[:, j0:j1, :].astype(jnp.float32)    # [bt, jc, E]
            o = o + jnp.sum(mc * w[:, j0:j1, None], axis=1)
        u_ref[...] = u_ref[...] + o

    # --- "m_A" half of hop t:  logits_t = gp * (m[t] @ u_t);  soft_t = softmax
    u = u_ref[...]                                         # [bt, E_pad] f32
    for j0 in range(0, Mp, m_chunk):
        j1 = min(j0 + m_chunk, Mp)
        mc = m_ref[:, j0:j1, :].astype(jnp.float32)        # [bt, jc, E]
        raw_ref[:, j0:j1] = jnp.sum(mc * u[:, None, :], axis=2)
    logits = gp * raw_ref[...]                             # [bt, M_pad]

    # precomputed additive pad mask (0 / -1e30) -> single vadd per hop
    masked = logits + mask_ref[...]
    mmax = jnp.max(masked, axis=1, keepdims=True)
    ex = jnp.exp(masked - mmax)
    soft = ex * pl.reciprocal(jnp.sum(ex, axis=1, keepdims=True), approx=True)
    soft_ref[...] = soft                                   # carry to next hop

    # only the last hop's soft/logits are returned by forward()
    @pl.when(t == pl.num_programs(1) - 1)
    def _():
        soft_out_ref[...] = soft
        logit_out_ref[...] = logits


# -----------------------------------------------------------------------------
# One-time preparation (hoisted out of the per-decoder-step forward call):
# pads / casts m_story, drops the unused m_story[max_hop] slab, builds the
# additive softmax mask, and plans the batch tiling + VMEM budget.
# -----------------------------------------------------------------------------
def prepare_memory(m_story, *, memory_dtype=jnp.bfloat16, batch_tile=None):
    m_story = jnp.asarray(m_story)
    Hp1, B, M, E = m_story.shape
    max_hop = Hp1 - 1
    assert max_hop >= 1, "ExternalKnowledge needs at least one hop"

    M_pad = _round_up(M, 128)
    E_pad = _round_up(E, 128)
    B_pad = _round_up(B, 8)
    itemsize = np.dtype(memory_dtype).itemsize
    cap = _vmem_capacity_bytes()

    # --- batch tile: keep the double-buffered m slab well inside VMEM and,
    #     when the batch allows, give the leading "parallel" axis >= 2 tiles
    #     so both v7x TensorCores get work.
    if batch_tile is None:
        slab_budget = max(4 << 20, (cap * 3) // 8)         # ~24 MiB v7x, ~48 MiB v5e/v6e
        bt_cap = max(8, (slab_budget // (2 * M_pad * E_pad * itemsize)) // 8 * 8)
        upper = min(bt_cap, max(8, B_pad // 2) if B_pad >= 16 else B_pad)
        upper = max(8, (upper // 8) * 8)
        bt = 8
        for cand in range(upper, 7, -8):                   # largest tile dividing B_pad
            if B_pad % cand == 0:
                bt = cand
                break
    else:
        bt = max(8, _round_up(batch_tile, 8))
        bt = min(bt, B_pad)
        B_pad = _round_up(B_pad, bt)
    nb = B_pad // bt
    # TODO(synk): if 2*bt*M_pad*E_pad still exceeds the slab budget at bt=8
    # (huge M*E), tile the M axis in the grid with a flash-style online softmax.

    # --- per-chunk f32 working set ~128 KiB so the bf16->f32 cast never
    #     materializes a slab-sized temporary (reviewed: "cast per chunk").
    m_chunk = max(8, min(M_pad, ((32 * 1024) // (bt * E_pad)) // 8 * 8))

    # --- VMEM limit from the actual chip capacity (leave compiler headroom).
    est = (2 * bt * M_pad * E_pad * itemsize               # m slab double buffer
           + 2 * bt * E_pad * 4 + 2 * bt * M_pad * 4       # q, gp
           + 2 * M_pad * 4                                 # mask
           + 2 * 2 * bt * M_pad * 4                        # two outputs
           + bt * E_pad * 4 + 2 * bt * M_pad * 4           # u / soft / raw scratch
           + 4 * bt * m_chunk * E_pad * 4)                 # in-flight f32 chunks
    vmem_limit = int(max(16 << 20, min((cap * 3) // 4, 2 * est + (2 << 20))))
    # TODO(synk): on v5e/v6e (128 MiB VMEM) pipeline_mode=pl.Buffered(3) on the
    # m_story BlockSpec hides the prologue DMA of short-hop configs; kept at
    # the default depth-2 here.

    # Padded, lane-dense memory (pad regions zero; padded M slots are masked
    # out of the softmax by `mask`).  m_story[max_hop] only feeds the unused
    # final u update, so it is dropped here.
    mem = jnp.zeros((max_hop, B_pad, M_pad, E_pad), memory_dtype)
    mem = mem.at[:, :B, :M, :E].set(m_story[:max_hop].astype(memory_dtype))
    mask = jnp.where(jnp.arange(M_pad)[None, :] < M,
                     jnp.float32(0.0), jnp.float32(-1e30))

    plan = EKPlan(B, M, E, max_hop, B_pad, M_pad, E_pad, bt, nb, m_chunk,
                  vmem_limit)
    return mem, mask, plan


def external_knowledge_forward(query_vector, global_pointer, mem, mask, plan):
    """Pallas implementation of ExternalKnowledge.forward(use_pointer=True).

    Args:
      query_vector:   [B, E] f32 decoder query.
      global_pointer: [B, M] f32 sigmoid gate from load_memory.
      mem, mask, plan: outputs of prepare_memory() (padded memory, additive
                       softmax mask, tiling plan) -- built once per dialogue.
    Returns:
      (prob_soft, prob_logits): each [B, M] f32, from the last hop.
    """
    B, M, E = plan.batch, plan.mem_len, plan.embed_dim
    q = jnp.zeros((plan.B_pad, plan.E_pad), jnp.float32)
    q = q.at[:B, :E].set(jnp.asarray(query_vector, jnp.float32))
    gp = jnp.zeros((plan.B_pad, plan.M_pad), jnp.float32)
    gp = gp.at[:B, :M].set(jnp.asarray(global_pointer, jnp.float32))

    grid_spec = pltpu.PrefetchScalarGridSpec(
        num_scalar_prefetch=0,
        grid=(plan.nb, plan.max_hop),
        in_specs=[
            pl.BlockSpec((plan.bt, plan.E_pad), lambda i, t: (i, 0)),      # query
            pl.BlockSpec((plan.bt, plan.M_pad), lambda i, t: (i, 0)),      # gp
            pl.BlockSpec((1, plan.M_pad), lambda i, t: (0, 0)),            # mask
            pl.BlockSpec((pl.Squeezed(), plan.bt, plan.M_pad, plan.E_pad),
                         lambda i, t: (t, i, 0, 0)),                       # m_story[t]
        ],
        out_specs=[
            pl.BlockSpec((plan.bt, plan.M_pad), lambda i, t: (i, 0)),      # prob_soft
            pl.BlockSpec((plan.bt, plan.M_pad), lambda i, t: (i, 0)),      # prob_logits
        ],
        scratch_shapes=[pltpu.VMEM((plan.bt, plan.E_pad), jnp.float32),    # u carry
                        pltpu.VMEM((plan.bt, plan.M_pad), jnp.float32),    # soft carry
                        pltpu.VMEM((plan.bt, plan.M_pad), jnp.float32)],   # raw logits
    )

    soft_p, logit_p = pl.pallas_call(
        functools.partial(_ek_forward_kernel, m_chunk=plan.m_chunk),
        out_shape=(jax.ShapeDtypeStruct((plan.B_pad, plan.M_pad), jnp.float32),
                   jax.ShapeDtypeStruct((plan.B_pad, plan.M_pad), jnp.float32)),
        grid_spec=grid_spec,
        compiler_params=pltpu.CompilerParams(
            dimension_semantics=("parallel", "arbitrary"),
            vmem_limit_bytes=plan.vmem_limit),
    )(q, gp, mask, mem)

    return soft_p[:B, :M], logit_p[:B, :M]


# -----------------------------------------------------------------------------
# Plain-JAX glue: parameter init + load_memory() to build m_story/global_pointer
# -----------------------------------------------------------------------------
PAD_token = 0


def init_embeddings(key, max_hop, vocab_size, embedding_dim):
    """C_0..C_{max_hop}: Embedding(vocab, E), weight ~ N(0, 0.1), pad row zeroed."""
    tables = []
    for _ in range(max_hop + 1):
        key, sub = jax.random.split(key)
        w = 0.1 * jax.random.normal(sub, (vocab_size, embedding_dim), jnp.float32)
        w = w.at[PAD_token].set(0.0)
        tables.append(w)
    return tables


def _add_lm_embedding(full_memory, kb_len, conv_len, hiddens):
    # kb_len / conv_len are concrete Python ints here.
    B = full_memory.shape[0]
    for bi in range(B):
        s, e = kb_len[bi], kb_len[bi] + conv_len[bi]
        full_memory = full_memory.at[bi, s:e, :].add(hiddens[bi, :conv_len[bi], :])
    return full_memory


def load_memory_jax(C, story, kb_len, conv_len, dh_hidden, dh_outputs, max_hop):
    """Replicates ExternalKnowledge.load_memory (dropout in eval mode = identity)."""
    u = dh_hidden[0]                                    # [B, E]
    m_story = []
    embed_C = None
    prob_logit = None
    for hop in range(max_hop):
        embed_A = jnp.sum(C[hop][story], axis=2)        # [B, M, E]
        embed_A = _add_lm_embedding(embed_A, kb_len, conv_len, dh_outputs)
        prob_logit = jnp.sum(embed_A * u[:, None, :], axis=2)   # [B, M]
        prob_ = jax.nn.softmax(prob_logit, axis=1)
        embed_C = jnp.sum(C[hop + 1][story], axis=2)    # [B, M, E]
        embed_C = _add_lm_embedding(embed_C, kb_len, conv_len, dh_outputs)
        o_k = jnp.sum(embed_C * prob_[:, :, None], axis=1)
        u = u + o_k
        m_story.append(embed_A)
    m_story.append(embed_C)
    global_pointer = jax.nn.sigmoid(prob_logit)
    return jnp.stack(m_story, axis=0), global_pointer, u


def forward_reference(query_vector, global_pointer, m_story):
    """Pure-JAX reference of forward() for validation."""
    u = query_vector
    prob_soft = prob_logits = None
    max_hop = m_story.shape[0] - 1
    for hop in range(max_hop):
        m_A = m_story[hop] * global_pointer[:, :, None]
        prob_logits = jnp.sum(m_A * u[:, None, :], axis=2)
        prob_soft = jax.nn.softmax(prob_logits, axis=1)
        m_C = m_story[hop + 1] * global_pointer[:, :, None]
        o_k = jnp.sum(m_C * prob_soft[:, :, None], axis=1)
        u = u + o_k
    return prob_soft, prob_logits


# TODO(synk): conv_layer (Conv1d) and dropout_layer are declared in __init__ but
# never used in forward()/load_memory(), so they are intentionally not lowered.

if __name__ == "__main__":
    key = jax.random.PRNGKey(0)

    # Small shapes consistent with the module.
    vocab_size = 24
    embedding_dim = 32       # E
    max_hop = 3              # H
    B = 2                    # batch
    M = 16                   # memory length (kb + conv, padded)
    MEM_TOKEN = 4            # tokens per memory cell

    kb_len = [5, 4]
    conv_len = [3, 4]
    max_conv = max(conv_len)

    key, k_story, k_hid, k_out = jax.random.split(key, 4)
    story = jax.random.randint(k_story, (B, M, MEM_TOKEN), 1, vocab_size,
                               dtype=jnp.int32)
    dh_hidden = 0.1 * jax.random.normal(k_hid, (1, B, embedding_dim), jnp.float32)
    dh_outputs = 0.1 * jax.random.normal(k_out, (B, max_conv, embedding_dim),
                                         jnp.float32)

    # Parameters (deterministic, in-script).
    C = init_embeddings(jax.random.PRNGKey(42), max_hop, vocab_size, embedding_dim)

    # Build memory state (glue, plain JAX).
    m_story, global_pointer, kb_readout = load_memory_jax(
        C, story, kb_len, conv_len, dh_hidden, dh_outputs, max_hop)

    query_vector = dh_hidden[0]          # [B, E] — decoder query for forward()

    # --- f32-memory path vs f32 reference ----------------------------------
    mem_f32, mask_f32, plan_f32 = prepare_memory(m_story, memory_dtype=jnp.float32)
    soft_f32, logits_f32 = external_knowledge_forward(
        query_vector, global_pointer, mem_f32, mask_f32, plan_f32)
    jax.block_until_ready((soft_f32, logits_f32))
    ref_soft, ref_logits = forward_reference(query_vector, global_pointer, m_story)
    # Tolerances account for summation-order differences + approx reciprocal.
    assert jnp.allclose(logits_f32, ref_logits, atol=5e-3, rtol=5e-3)
    assert jnp.allclose(soft_f32, ref_soft, atol=5e-3, rtol=5e-3)

    # --- bf16-memory path (default / bandwidth-optimized) vs bf16-rounded ref
    mem_bf, mask_bf, plan_bf = prepare_memory(m_story)      # memory_dtype=bf16
    soft_bf, logits_bf = external_knowledge_forward(
        query_vector, global_pointer, mem_bf, mask_bf, plan_bf)
    jax.block_until_ready((soft_bf, logits_bf))
    m_rounded = m_story.astype(jnp.bfloat16).astype(jnp.float32)
    ref_soft_bf, ref_logits_bf = forward_reference(query_vector, global_pointer,
                                                   m_rounded)
    assert jnp.allclose(logits_bf, ref_logits_bf, atol=5e-3, rtol=5e-3)
    assert jnp.allclose(soft_bf, ref_soft_bf, atol=5e-3, rtol=5e-3)

    print("KERNEL_OK")
</pallas_src>

<mosaic_0001>
module attributes {stable_mosaic.version = 11 : i64} {
  func.func @_ek_forward_kernel(%arg0: i32, %arg1: i32, %arg2: memref<8x128xf32, #tpu.memory_space<vmem>>, %arg3: memref<8x128xf32, #tpu.memory_space<vmem>>, %arg4: memref<1x128xf32, #tpu.memory_space<vmem>>, %arg5: memref<1x8x128x128xf32, #tpu.memory_space<vmem>>, %arg6: memref<8x128xf32, #tpu.memory_space<vmem>>, %arg7: memref<8x128xf32, #tpu.memory_space<vmem>>, %arg8: memref<8x128xf32, #tpu.memory_space<vmem>>, %arg9: memref<8x128xf32, #tpu.memory_space<vmem>>, %arg10: memref<8x128xf32, #tpu.memory_space<vmem>>) attributes {dimension_semantics = [#tpu.dimension_semantics<parallel>, #tpu.dimension_semantics<arbitrary>], iteration_bounds = array<i64: 1, 3>, scalar_prefetch = 0 : i64, scratch_operands = 3 : i64, tpu.core_type = #tpu.core_type<tc>, window_params = [{transform_indices = @transform_0, window_bounds = array<i64: 8, 128>}, {transform_indices = @transform_1, window_bounds = array<i64: 8, 128>}, {pipeline_mode = #tpu.pipeline_mode<synchronous>, transform_indices = @transform_2, window_bounds = array<i64: 1, 128>}, {transform_indices = @transform_3, window_bounds = array<i64: 1, 8, 128, 128>}, {transform_indices = @transform_4, window_bounds = array<i64: 8, 128>}, {transform_indices = @transform_5, window_bounds = array<i64: 8, 128>}]} {
    %c0_i32 = arith.constant 0 : i32
    %0 = arith.cmpi eq, %arg1, %c0_i32 : i32
    %1 = arith.extui %0 : i1 to i32
    %c0_i32_0 = arith.constant 0 : i32
    %2 = arith.cmpi ne, %1, %c0_i32_0 : i32
    scf.if %2 {
      %c0_39 = arith.constant 0 : index
      %c0_40 = arith.constant 0 : index
      %55 = vector.load %arg2[%c0_39, %c0_40] : memref<8x128xf32, #tpu.memory_space<vmem>>, vector<8x128xf32>
      %c0_41 = arith.constant 0 : index
      %c0_42 = arith.constant 0 : index
      %56 = vector.load %arg8[%c0_41, %c0_42] : memref<8x128xf32, #tpu.memory_space<vmem>>, vector<8x128xf32>
      tpu.vector_store %arg8[%c0_41, %c0_42], %55 {strides = array<i32>} : memref<8x128xf32, #tpu.memory_space<vmem>>, vector<8x128xf32>,
    } else {
    }
    %c0 = arith.constant 0 : index
    %c0_1 = arith.constant 0 : index
    %3 = vector.load %arg3[%c0, %c0_1] : memref<8x128xf32, #tpu.memory_space<vmem>>, vector<8x128xf32>
    %c0_i32_2 = arith.constant 0 : i32
    %4 = arith.cmpi sgt, %arg1, %c0_i32_2 : i32
    %5 = arith.extui %4 : i1 to i32
    %c0_i32_3 = arith.constant 0 : i32
    %6 = arith.cmpi ne, %5, %c0_i32_3 : i32
    scf.if %6 {
      %c0_39 = arith.constant 0 : index
      %c0_40 = arith.constant 0 : index
      %55 = vector.load %arg9[%c0_39, %c0_40] : memref<8x128xf32, #tpu.memory_space<vmem>>, vector<8x128xf32>
      %56 = arith.mulf %3, %55 : vector<8x128xf32>
      %cst_41 = arith.constant 0.000000e+00 : f32
      %57 = vector.broadcast %cst_41 : f32 to vector<8x128xf32>
      %c0_42 = arith.constant 0 : index
      %c0_43 = arith.constant 0 : index
      %c0_44 = arith.constant 0 : index
      %c0_45 = arith.constant 0 : index
      %58 = vector.load %arg5[%c0_42, %c0_43, %c0_44, %c0_45] : memref<1x8x128x128xf32, #tpu.memory_space<vmem>>, vector<1x8x32x128xf32>
      %59 = vector.shape_cast %58 : vector<1x8x32x128xf32> to vector<8x32x128xf32>
      %60 = vector.extract_strided_slice %56 {offsets = [0, 0], sizes = [8, 32], strides = [1, 1]} : vector<8x128xf32> to vector<8x32xf32>
      %61 = vector.shape_cast %60 : vector<8x32xf32> to vector<8x32x1xf32>
      %62 = vector.broadcast %61 : vector<8x32x1xf32> to vector<8x32x128xf32>
      %63 = arith.mulf %59, %62 : vector<8x32x128xf32>
      %cst_46 = arith.constant dense<0.000000e+00> : vector<8x128xf32>
      %64 = vector.multi_reduction <add>, %63, %cst_46 [1] : vector<8x32x128xf32> to vector<8x128xf32>
      %65 = arith.addf %57, %64 : vector<8x128xf32>
      %c0_47 = arith.constant 0 : index
      %c0_48 = arith.constant 0 : index
      %c32_49 = arith.constant 32 : index
      %c0_50 = arith.constant 0 : index
      %66 = vector.load %arg5[%c0_47, %c0_48, %c32_49, %c0_50] : memref<1x8x128x128xf32, #tpu.memory_space<vmem>>, vector<1x8x32x128xf32>
      %67 = vector.shape_cast %66 : vector<1x8x32x128xf32> to vector<8x32x128xf32>
      %68 = vector.extract_strided_slice %56 {offsets = [0, 32], sizes = [8, 32], strides = [1, 1]} : vector<8x128xf32> to vector<8x32xf32>
      %69 = vector.shape_cast %68 : vector<8x32xf32> to vector<8x32x1xf32>
      %70 = vector.broadcast %69 : vector<8x32x1xf32> to vector<8x32x128xf32>
      %71 = arith.mulf %67, %70 : vector<8x32x128xf32>
      %cst_51 = arith.constant dense<0.000000e+00> : vector<8x128xf32>
      %72 = vector.multi_reduction <add>, %71, %cst_51 [1] : vector<8x32x128xf32> to vector<8x128xf32>
      %73 = arith.addf %65, %72 : vector<8x128xf32>
      %c0_52 = arith.constant 0 : index
      %c0_53 = arith.constant 0 : index
      %c64_54 = arith.constant 64 : index
      %c0_55 = arith.constant 0 : index
      %74 = vector.load %arg5[%c0_52, %c0_53, %c64_54, %c0_55] : memref<1x8x128x128xf32, #tpu.memory_space<vmem>>, vector<1x8x32x128xf32>
      %75 = vector.shape_cast %74 : vector<1x8x32x128xf32> to vector<8x32x128xf32>
      %76 = vector.extract_strided_slice %56 {offsets = [0, 64], sizes = [8, 32], strides = [1, 1]} : vector<8x128xf32> to vector<8x32xf32>
      %77 = vector.shape_cast %76 : vector<8x32xf32> to vector<8x32x1xf32>
      %78 = vector.broadcast %77 : vector<8x32x1xf32> to vector<8x32x128xf32>
      %79 = arith.mulf %75, %78 : vector<8x32x128xf32>
      %cst_56 = arith.constant dense<0.000000e+00> : vector<8x128xf32>
      %80 = vector.multi_reduction <add>, %79, %cst_56 [1] : vector<8x32x128xf32> to vector<8x128xf32>
      %81 = arith.addf %73, %80 : vector<8x128xf32>
      %c0_57 = arith.constant 0 : index
      %c0_58 = arith.constant 0 : index
      %c96_59 = arith.constant 96 : index
      %c0_60 = arith.constant 0 : index
      %82 = vector.load %arg5[%c0_57, %c0_58, %c96_59, %c0_60] : memref<1x8x128x128xf32, #tpu.memory_space<vmem>>, vector<1x8x32x128xf32>
      %83 = vector.shape_cast %82 : vector<1x8x32x128xf32> to vector<8x32x128xf32>
      %84 = vector.extract_strided_slice %56 {offsets = [0, 96], sizes = [8, 32], strides = [1, 1]} : vector<8x128xf32> to vector<8x32xf32>
      %85 = vector.shape_cast %84 : vector<8x32xf32> to vector<8x32x1xf32>
      %86 = vector.broadcast %85 : vector<8x32x1xf32> to vector<8x32x128xf32>
      %87 = arith.mulf %83, %86 : vector<8x32x128xf32>
      %cst_61 = arith.constant dense<0.000000e+00> : vector<8x128xf32>
      %88 = vector.multi_reduction <add>, %87, %cst_61 [1] : vector<8x32x128xf32> to vector<8x128xf32>
      %89 = arith.addf %81, %88 : vector<8x128xf32>
      %c0_62 = arith.constant 0 : index
      %c0_63 = arith.constant 0 : index
      %90 = vector.load %arg8[%c0_62, %c0_63] : memref<8x128xf32, #tpu.memory_space<vmem>>, vector<8x128xf32>
      %91 = arith.addf %90, %89 : vector<8x128xf32>
      %c0_64 = arith.constant 0 : index
      %c0_65 = arith.constant 0 : index
      %92 = vector.load %arg8[%c0_64, %c0_65] : memref<8x128xf32, #tpu.memory_space<vmem>>, vector<8x128xf32>
      tpu.vector_store %arg8[%c0_64, %c0_65], %91 {strides = array<i32>} : memref<8x128xf32, #tpu.memory_space<vmem>>, vector<8x128xf32>,
    } else {
    }
    %c0_4 = arith.constant 0 : index
    %c0_5 = arith.constant 0 : index
    %7 = vector.load %arg8[%c0_4, %c0_5] : memref<8x128xf32, #tpu.memory_space<vmem>>, vector<8x128xf32>
    %c0_6 = arith.constant 0 : index
    %c0_7 = arith.constant 0 : index
    %c0_8 = arith.constant 0 : index
    %c0_9 = arith.constant 0 : index
    %8 = vector.load %arg5[%c0_6, %c0_7, %c0_8, %c0_9] : memref<1x8x128x128xf32, #tpu.memory_space<vmem>>, vector<1x8x32x128xf32>
    %9 = vector.shape_cast %8 : vector<1x8x32x128xf32> to vector<8x32x128xf32>
    %10 = vector.shape_cast %7 : vector<8x128xf32> to vector<8x1x128xf32>
    %11 = vector.broadcast %10 : vector<8x1x128xf32> to vector<8x32x128xf32>
    %12 = arith.mulf %9, %11 : vector<8x32x128xf32>
    %cst = arith.constant dense<0.000000e+00> : vector<8x32xf32>
    %13 = vector.multi_reduction <add>, %12, %cst [2] : vector<8x32x128xf32> to vector<8x32xf32>
    %c0_10 = arith.constant 0 : index
    %c0_11 = arith.constant 0 : index
    %14 = vector.load %arg10[%c0_10, %c0_11] : memref<8x128xf32, #tpu.memory_space<vmem>>, vector<8x32xf32>
    tpu.vector_store %arg10[%c0_10, %c0_11], %13 {strides = array<i32>} : memref<8x128xf32, #tpu.memory_space<vmem>>, vector<8x32xf32>,
    %c0_12 = arith.constant 0 : index
    %c0_13 = arith.constant 0 : index
    %c32 = arith.constant 32 : index
    %c0_14 = arith.constant 0 : index
    %15 = vector.load %arg5[%c0_12, %c0_13, %c32, %c0_14] : memref<1x8x128x128xf32, #tpu.memory_space<vmem>>, vector<1x8x32x128xf32>
    %16 = vector.shape_cast %15 : vector<1x8x32x128xf32> to vector<8x32x128xf32>
    %17 = vector.shape_cast %7 : vector<8x128xf32> to vector<8x1x128xf32>
    %18 = vector.broadcast %17 : vector<8x1x128xf32> to vector<8x32x128xf32>
    %19 = arith.mulf %16, %18 : vector<8x32x128xf32>
    %cst_15 = arith.constant dense<0.000000e+00> : vector<8x32xf32>
    %20 = vector.multi_reduction <add>, %19, %cst_15 [2] : vector<8x32x128xf32> to vector<8x32xf32>
    %c0_16 = arith.constant 0 : index
    %c32_17 = arith.constant 32 : index
    %21 = vector.load %arg10[%c0_16, %c32_17] : memref<8x128xf32, #tpu.memory_space<vmem>>, vector<8x32xf32>
    tpu.vector_store %arg10[%c0_16, %c32_17], %20 {strides = array<i32>} : memref<8x128xf32, #tpu.memory_space<vmem>>, vector<8x32xf32>,
    %c0_18 = arith.constant 0 : index
    %c0_19 = arith.constant 0 : index
    %c64 = arith.constant 64 : index
    %c0_20 = arith.constant 0 : index
    %22 = vector.load %arg5[%c0_18, %c0_19, %c64, %c0_20] : memref<1x8x128x128xf32, #tpu.memory_space<vmem>>, vector<1x8x32x128xf32>
    %23 = vector.shape_cast %22 : vector<1x8x32x128xf32> to vector<8x32x128xf32>
    %24 = vector.shape_cast %7 : vector<8x128xf32> to vector<8x1x128xf32>
    %25 = vector.broadcast %24 : vector<8x1x128xf32> to vector<8x32x128xf32>
    %26 = arith.mulf %23, %25 : vector<8x32x128xf32>
    %cst_21 = arith.constant dense<0.000000e+00> : vector<8x32xf32>
    %27 = vector.multi_reduction <add>, %26, %cst_21 [2] : vector<8x32x128xf32> to vector<8x32xf32>
    %c0_22 = arith.constant 0 : index
    %c64_23 = arith.constant 64 : index
    %28 = vector.load %arg10[%c0_22, %c64_23] : memref<8x128xf32, #tpu.memory_space<vmem>>, vector<8x32xf32>
    tpu.vector_store %arg10[%c0_22, %c64_23], %27 {strides = array<i32>} : memref<8x128xf32, #tpu.memory_space<vmem>>, vector<8x32xf32>,
    %c0_24 = arith.constant 0 : index
    %c0_25 = arith.constant 0 : index
    %c96 = arith.constant 96 : index
    %c0_26 = arith.constant 0 : index
    %29 = vector.load %arg5[%c0_24, %c0_25, %c96, %c0_26] : memref<1x8x128x128xf32, #tpu.memory_space<vmem>>, vector<1x8x32x128xf32>
    %30 = vector.shape_cast %29 : vector<1x8x32x128xf32> to vector<8x32x128xf32>
    %31 = vector.shape_cast %7 : vector<8x128xf32> to vector<8x1x128xf32>
    %32 = vector.broadcast %31 : vector<8x1x128xf32> to vector<8x32x128xf32>
    %33 = arith.mulf %30, %32 : vector<8x32x128xf32>
    %cst_27 = arith.constant dense<0.000000e+00> : vector<8x32xf32>
    %34 = vector.multi_reduction <add>, %33, %cst_27 [2] : vector<8x32x128xf32> to vector<8x32xf32>
    %c0_28 = arith.constant 0 : index
    %c96_29 = arith.constant 96 : index
    %35 = vector.load %arg10[%c0_28, %c96_29] : memref<8x128xf32, #tpu.memory_space<vmem>>, vector<8x32xf32>
    tpu.vector_store %arg10[%c0_28, %c96_29], %34 {strides = array<i32>} : memref<8x128xf32, #tpu.memory_space<vmem>>, vector<8x32xf32>,
    %c0_30 = arith.constant 0 : index
    %c0_31 = arith.constant 0 : index
    %36 = vector.load %arg10[%c0_30, %c0_31] : memref<8x128xf32, #tpu.memory_space<vmem>>, vector<8x128xf32>
    %37 = arith.mulf %3, %36 : vector<8x128xf32>
    %c0_32 = arith.constant 0 : index
    %c0_33 = arith.constant 0 : index
    %38 = vector.load %arg4[%c0_32, %c0_33] : memref<1x128xf32, #tpu.memory_space<vmem>>, vector<1x128xf32>
    %39 = vector.broadcast %38 : vector<1x128xf32> to vector<8x128xf32>
    %40 = arith.addf %37, %39 : vector<8x128xf32>
    %cst_34 = arith.constant dense<0xFF800000> : vector<8xf32>
    %41 = vector.multi_reduction <maximumf>, %40, %cst_34 [1] : vector<8x128xf32> to vector<8xf32>
    %42 = vector.shape_cast %41 : vector<8xf32> to vector<8x1xf32>
    %43 = vector.broadcast %42 : vector<8x1xf32> to vector<8x128xf32>
    %44 = arith.subf %40, %43 : vector<8x128xf32>
    %45 = math.exp %44 : vector<8x128xf32>
    %cst_35 = arith.constant dense<0.000000e+00> : vector<8xf32>
    %46 = vector.multi_reduction <add>, %45, %cst_35 [1] : vector<8x128xf32> to vector<8xf32>
    %47 = vector.shape_cast %46 : vector<8xf32> to vector<8x1xf32>
    %48 = tpu.reciprocal %47 {approx = true} : vector<8x1xf32> -> vector<8x1xf32>
    %49 = vector.broadcast %48 : vector<8x1xf32> to vector<8x128xf32>
    %50 = arith.mulf %45, %49 : vector<8x128xf32>
    %c0_36 = arith.constant 0 : index
    %c0_37 = arith.constant 0 : index
    %51 = vector.load %arg9[%c0_36, %c0_37] : memref<8x128xf32, #tpu.memory_space<vmem>>, vector<8x128xf32>
    tpu.vector_store %arg9[%c0_36, %c0_37], %50 {strides = array<i32>} : memref<8x128xf32, #tpu.memory_space<vmem>>, vector<8x128xf32>,
    %c2_i32 = arith.constant 2 : i32
    %52 = arith.cmpi eq, %arg1, %c2_i32 : i32
    %53 = arith.extui %52 : i1 to i32
    %c0_i32_38 = arith.constant 0 : i32
    %54 = arith.cmpi ne, %53, %c0_i32_38 : i32
    scf.if %54 {
      %c0_39 = arith.constant 0 : index
      %c0_40 = arith.constant 0 : index
      %55 = vector.load %arg6[%c0_39, %c0_40] : memref<8x128xf32, #tpu.memory_space<vmem>>, vector<8x128xf32>
      tpu.vector_store %arg6[%c0_39, %c0_40], %50 {strides = array<i32>} : memref<8x128xf32, #tpu.memory_space<vmem>>, vector<8x128xf32>,
      %c0_41 = arith.constant 0 : index
      %c0_42 = arith.constant 0 : index
      %56 = vector.load %arg7[%c0_41, %c0_42] : memref<8x128xf32, #tpu.memory_space<vmem>>, vector<8x128xf32>
      tpu.vector_store %arg7[%c0_41, %c0_42], %37 {strides = array<i32>} : memref<8x128xf32, #tpu.memory_space<vmem>>, vector<8x128xf32>,
    } else {
    }
    return
  }
  func.func @transform_0(%arg0: i32, %arg1: i32) -> (i32, i32) {
    %c0_i32 = arith.constant 0 : i32
    %c0_i32_0 = arith.constant 0 : i32
    return %arg0, %c0_i32 : i32, i32
  }
  func.func @transform_1(%arg0: i32, %arg1: i32) -> (i32, i32) {
    %c0_i32 = arith.constant 0 : i32
    %c0_i32_0 = arith.constant 0 : i32
    return %arg0, %c0_i32 : i32, i32
  }
  func.func @transform_2(%arg0: i32, %arg1: i32) -> (i32, i32) {
    %c0_i32 = arith.constant 0 : i32
    %c0_i32_0 = arith.constant 0 : i32
    %c0_i32_1 = arith.constant 0 : i32
    return %c0_i32, %c0_i32_0 : i32, i32
  }
  func.func @transform_3(%arg0: i32, %arg1: i32) -> (i32, i32, i32, i32) {
    %c0_i32 = arith.constant 0 : i32
    %c0_i32_0 = arith.constant 0 : i32
    %c0_i32_1 = arith.constant 0 : i32
    return %arg1, %arg0, %c0_i32, %c0_i32_0 : i32, i32, i32, i32
  }
  func.func @transform_4(%arg0: i32, %arg1: i32) -> (i32, i32) {
    %c0_i32 = arith.constant 0 : i32
    %c0_i32_0 = arith.constant 0 : i32
    return %arg0, %c0_i32 : i32, i32
  }
  func.func @transform_5(%arg0: i32, %arg1: i32) -> (i32, i32) {
    %c0_i32 = arith.constant 0 : i32
    %c0_i32_0 = arith.constant 0 : i32
    return %arg0, %c0_i32 : i32, i32
  }
}

</mosaic_0001>

<bundles_post_ra>
// kernel: tpu_custom_call.1
= control target key start
LH: loop header
LB: loop body
LE: loop exit
PB: predicated region body
PF: predicated region fallthrough
CT: control target
= control target key end

     0   :  { %11 = vsyncpa [#allocation6], 0  ;;  %s4902_s0 = inlined_call_operand.hbm [shape: f32[8,128], index: 0, kind: input, shape index: {}]   ;;  %s4903_s1 = inlined_call_operand.hbm [shape: f32[8,128], index: 1, kind: input, shape index: {}]   ;;  %s4904_s2 = inlined_call_operand.hbm [shape: f32[1,128], index: 2, kind: input, shape index: {}]   ;;  %s4905_s3 = inlined_call_operand.hbm [shape: f32[3,8,128,128], index: 3, kind: input, shape index: {}]   ;;  %s4906_s4 = inlined_call_operand.hbm [shape: f32[8,128], index: 4, kind: output, shape index: {0}]   ;;  %s4907_s5 = inlined_call_operand.hbm [shape: f32[8,128], index: 5, kind: output, shape index: {1}]  }
   0x1   :  { %12 = vsyncpa [#allocation9], 0 }
   0x2   :  { %13 = vsyncpa [#allocation12], 0 }
   0x3   :  { %15 = vsyncpa [#allocation12 + $0x1], 0 }
   0x4   :  { %16 = vsyncpa [#allocation7], 0 }
   0x5   :  { %17 = vsyncpa [#allocation15], 0  ;;  %s3442_s18 = smov 0   ;;  %s3444_s19 = smov 0  }
   0x6   :  { %s3446_s20 = smov 0   ;;  %s3448_s21 = smov 0  }
   0x7   :  { %s3450_s22 = smov 0   ;;  %s3452_s23 = smov 0  }
   0x8 LB: > { %s3036_s24 = sadd.s32 4294967295, %s3401_s23   ;;  %p130_p0 = scmp.ne.s32.totalorder %s3385_s19, %s3381_s18  ;;  %s3401_s23 = sphi %s3452_s23, %s23_s23   ;;  %s3397_s22 = sphi %s3450_s22, %s4932_s22   ;;  %s3393_s21 = sphi %s3448_s21, %s4931_s21   ;;  %s3389_s20 = sphi %s3446_s20, %s4930_s20   ;;  %s3385_s19 = sphi %s3444_s19, %s4929_s19   ;;  %s3381_s18 = sphi %s3442_s18, %s4928_s18  }
   0x9   : > { %p3474_p1 = scmp.eq.s32.totalorder %s3036_s24, 0  ;;  %p3037_p2 = scmp.ge.s32.totalorder %s3401_s23, 1 }
   0xa   : > { %p193_p3 = scmp.lt.s32.totalorder %s3401_s23, 4  ;;  %s3403_s28 = smov [#allocation8]  }
   0xb   : > { %s4914_s25 = scalar_select %p3474_p1, 1, 0 }
   0xc   : > { %p3482_p4 = por %p3474_p1, %p130_p0  ;;  %p3486_p5 = pnand %p3037_p2, %p193_p3 }
   0xd   : > { %s221_s29 = sshll.u32 %s3403_s28, 4  ;;  %s3404_s6 = smov [#allocation5]   ;;  %s222_s29 = int_to_ptr.vmem [resolvable:$true] %s221_s29 }
   0xe   : > { %s4915_s26 = scalar_select %p3482_p4, 1, 0 }
   0xf   : > { %s4916_s27 = scalar_select %p3486_p5, 1, 0 }
  0x10   : > { %p3083_p6 = pneg %p3486_p5  ;;  %s208_s7 = sshll.u32 %s3404_s6, 4  ;;  %s3498_s7 = int_to_ptr.vmem [resolvable:$true] %s208_s7 }
  0x11   : > { %s3405_s8 = smov [#allocation10]   ;;  %s3169_s12 = scalar_lea.hbm %s4903_s1, 128 }
  0x12   : > { %p3494_p7 = pnand %p3083_p6, %p3474_p1  ;;  %s3500_s9 = sshll.u32 %s3405_s8, 4  ;;  %s233_s9 = int_to_ptr.vmem [resolvable:$true] %s3500_s9 }
  0x13   : > { %p3170_p8 = scmp.ne.s32.totalorder %s4903_s1, %s3169_s12  ;;  %p3176_p12 = scmp.lt.u32.totalorder %s3169_s12, %s4903_s1 }
  0x14   : > { %p3510_p9 = pneg %p3494_p7 }
  0x16   : > { %p3172_p10 = pnand %p3510_p9, %p3170_p8 }
  0x18   : > { %p3173_p11 = pneg %p3172_p10 }
  0x1a   : > { %p3178_p13 = pnand %p3176_p12, %p3173_p11 }
  0x1c   : > { %3181 = shalt.err (!%p3178_p13)
}
  0x1d   : > { %s3182_s18 = scalar_lea.vmem %s222_s29, 128  ;;  %p3190_p6 = scmp.lt.s32.totalorder %s222_s29, %s222_s29 }
  0x1e   : > { %p3183_p0 = scmp.ne.s32.totalorder %s222_s29, %s3182_s18  ;;  %p3191_p4 = scmp.lt.s32.totalorder %s3182_s18, %s3182_s18 }
  0x20   : > { %p3185_p2 = pnand %p3183_p0, %p3510_p9  ;;  %p3192_p1 = por %p3191_p4, %p3190_p6 }
  0x22   : > { %p3186_p3 = pneg %p3185_p2 }
  0x24   : > { %p3193_p5 = pnand %p3192_p1, %p3186_p3 }
  0x26   : > { %3196 = shalt.err (!%p3193_p5)
}
  0x27   : > { %3089 = dma.hbm_to_vmem [thread:$0]  (!%p3494_p7), %s4903_s1, 128, %s222_s29, [#allocation9]  }
  0x28   : > { %s3197_s11 = scalar_lea.hbm %s4902_s0, 128 }
  0x29   : > { %p3198_p8 = scmp.ne.s32.totalorder %s4902_s0, %s3197_s11  ;;  %p3204_p1 = scmp.lt.u32.totalorder %s3197_s11, %s4902_s0 }
  0x2b   : > { %p3200_p10 = pnand %p3198_p8, %p3510_p9 }
  0x2d   : > { %p3201_p4 = pneg %p3200_p10 }
  0x2f   : > { %p3206_p5 = pnand %p3204_p1, %p3201_p4 }
  0x31   : > { %3209 = shalt.err (!%p3206_p5)
}
  0x32   : > { %s3210_s29 = scalar_lea.vmem %s3498_s7, 128  ;;  %p3218_p0 = scmp.lt.s32.totalorder %s3498_s7, %s3498_s7 }
  0x33   : > { %p3211_p11 = scmp.ne.s32.totalorder %s3498_s7, %s3210_s29  ;;  %p3219_p2 = scmp.lt.s32.totalorder %s3210_s29, %s3210_s29 }
  0x35   : > { %p3213_p12 = pnand %p3211_p11, %p3510_p9  ;;  %p3220_p3 = por %p3219_p2, %p3218_p0 }
  0x37   : > { %p3214_p13 = pneg %p3213_p12 }
  0x39   : > { %p3221_p6 = pnand %p3220_p3, %p3214_p13 }
  0x3b   : > { %3224 = shalt.err (!%p3221_p6)
}
  0x3c   : > { %3086 = dma.hbm_to_vmem [thread:$0]  (!%p3494_p7), %s4902_s0, 128, %s3498_s7, [#allocation6]  }
  0x3d   : > { %s3225_s8 = scalar_lea.hbm %s4904_s2, 16 }
  0x3e   : > { %p3226_p8 = scmp.ne.s32.totalorder %s4904_s2, %s3225_s8  ;;  %p3232_p1 = scmp.lt.u32.totalorder %s3225_s8, %s4904_s2 }
  0x40   : > { %p3228_p10 = pnand %p3226_p8, %p3510_p9 }
  0x42   : > { %p3229_p4 = pneg %p3228_p10 }
  0x44   : > { %p3234_p5 = pnand %p3232_p1, %p3229_p4 }
  0x46   : > { %3237 = shalt.err (!%p3234_p5)
}
  0x47   : > { %s3238_s14 = scalar_lea.vmem %s233_s9, 16  ;;  %s3245_s7 = scalar_lea.vmem %s233_s9, 32 }
  0x48   : > { %p3239_p11 = scmp.ne.s32.totalorder %s233_s9, %s3238_s14  ;;  %p3246_p0 = scmp.lt.s32.totalorder %s233_s9, %s233_s9 }
  0x49   : > { %p3247_p2 = scmp.lt.s32.totalorder %s3245_s7, %s3238_s14 }
  0x4a   : > { %p3241_p12 = pnand %p3239_p11, %p3510_p9 }
  0x4b   : > { %p3248_p3 = por %p3247_p2, %p3246_p0 }
  0x4c   : > { %p3242_p13 = pneg %p3241_p12 }
  0x4e   : > { %p3249_p6 = pnand %p3248_p3, %p3242_p13 }
  0x50   : > { %3252 = shalt.err (!%p3249_p6)
}
  0x51   : > { %3092 = dma.hbm_to_vmem [thread:$0]  (!%p3494_p7), %s4904_s2, 16, %s233_s9, [#allocation9]  }
  0x52   : > { %s117_s15 = sadd.s32 1, %s3389_s20  ;;  %s32_s17 = sadd.s32 1, %s3397_s22 }
  0x53   : > { %p124_p9 = scmp.ne.s32.totalorder %s3389_s20, %s3385_s19  ;;  %p33_p8 = scmp.ge.s32.totalorder %s32_s17, 3 }
  0x54   : > { %p125_p10 = scmp.eq.s32.totalorder %s3401_s23, 0  ;;  %p3100_p4 = scmp.lt.s32.totalorder %s3401_s23, 3 }
  0x55   : > { %s243_s30 = sand.u32 1, %s3389_s20   ;;  %s4934_s17 = smov (%p33_p8, %s32_s17), 0 }
  0x56   : > { %p126_p1 = por %p125_p10, %p124_p9  ;;  %s112_s18 = ssub.s32 %s3397_s22, %s4934_s17 }
  0x57   : > { %s3042_s28 = sshll.u32 %s243_s30, 10  ;;  %p115_p5 = scmp.eq.s32.totalorder %s112_s18, 0 }
  0x58   : > { %s3060_s6 = sshll.u32 %s3397_s22, 14  ;;  %s247_s8 = scalar_lea.vmem [#allocation11], %s3042_s28 }
  0x59   : > { %s257_s10 = sshll.u32 %s247_s8, 4  ;;  %s3586_s13 = scalar_lea.hbm %s4905_s3, %s3060_s6  ;;  %s3588_s10 = int_to_ptr.vmem [resolvable:$true] %s257_s10 }
  0x5a   : > { %s3581_s9 = scalar_select %p115_p5, %s3389_s20, %s117_s15  }
  0x5b   : > { %p3592_p7 = pnand %p3100_p4, %p126_p1  ;;  %s3596_s7 = scalar_lea.sflag [#allocation12], %s243_s30 }
  0x5c   : > { %s3253_s16 = scalar_lea.hbm %s3586_s13, 16384  ;;  %s3258_s18 = scalar_lea.hbm %s4905_s3, 49152 }
  0x5d   : > { %p3254_p11 = scmp.ne.s32.totalorder %s3586_s13, %s3253_s16  ;;  %p3255_p12 = pneg %p3592_p7 }
  0x5e   : > { %p3259_p2 = scmp.lt.u32.totalorder %s3586_s13, %s4905_s3  ;;  %p3260_p3 = scmp.lt.u32.totalorder %s3258_s18, %s3253_s16 }
  0x5f   : > { %p3256_p13 = pnand %p3255_p12, %p3254_p11  ;;  %p3262_p9 = scmp.lt.u32.totalorder %s3253_s16, %s3586_s13 }
  0x60   : > { %p3261_p6 = por %p3260_p3, %p3259_p2 }
  0x61   : > { %p3257_p0 = pneg %p3256_p13 }
  0x62   : > { %p3263_p8 = por %p3262_p9, %p3261_p6 }
  0x64   : > { %p3264_p10 = pnand %p3263_p8, %p3257_p0 }
  0x66   : > { %3267 = shalt.err (!%p3264_p10)
}
  0x67   : > { %s3268_s30 = scalar_lea.vmem %s3588_s10, 16384  ;;  %s3406_s8 = smov [#allocation11]  }
  0x68   : > { %p3269_p4 = scmp.ne.s32.totalorder %s3588_s10, %s3268_s30  ;;  %s3273_s11 = sshll.u32 %s3406_s8, 4  ;;  %s3274_s11 = int_to_ptr.vmem [resolvable:$false] %s3273_s11 }
  0x69   : > { %s3275_s12 = scalar_lea.vmem %s3274_s11, 32768  ;;  %p3276_p11 = scmp.lt.s32.totalorder %s3588_s10, %s3274_s11 }
  0x6a   : > { %p3271_p1 = pnand %p3269_p4, %p3255_p12  ;;  %p3277_p13 = scmp.lt.s32.totalorder %s3275_s12, %s3268_s30 }
  0x6c   : > { %p3272_p5 = pneg %p3271_p1  ;;  %p3278_p2 = por %p3277_p13, %p3276_p11 }
  0x6e   : > { %p3279_p3 = pnand %p3278_p2, %p3272_p5 }
  0x70   : > { %3282 = shalt.err (!%p3279_p3)
}
  0x71   : > { %s3407_s16 = smov 128   ;;  %s3408_s29 = smov 8  }
  0x72   : > { %3096 = dma.hbm_to_vmem [thread:$0]  (!%p3592_p7), %s3586_s13, 16384, %s3588_s10, %s3596_s7, %s3407_s16, %s3407_s16, %s3408_s29  }
  0x73   : > { %p4920_p12 = scmp.ne.s32.totalorder %s4916_s27, 0 }
  0x74   : > { %p4921_p0 = scmp.ne.s32.totalorder (!%p4920_p12), %s4914_s25, 0 }
  0x75   : > { %269 = sbr.rel (%p4920_p12) target bundleno = 1326 (0x52e), region = 36 }
  0x7c   : > { %3360 = dma.done.wait (%p4921_p0), [#allocation6], 128  }
  0x7d   : > { %3362 = vsyncadd (%p4921_p0), [#allocation6], 4294967168 }
  0x7e   : > { %3364 = dma.done.wait (%p4921_p0), [#allocation9], 144  }
  0x7f   : > { %3366 = vsyncadd (%p4921_p0), [#allocation9], 4294967152  ;;  %s283_s15 = sand.u32 1, %s3385_s19   ;;  %p4922_p7 = scmp.ne.s32.totalorder %s4915_s26, 0 }
  0x80   : > { %s3049_s14 = sshll.u32 %s283_s15, 10  ;;  %s284_s10 = scalar_lea.sflag [#allocation12], %s283_s15 }
  0x81   : > { %s3635_s13 = scalar_lea.vmem [#allocation11], %s3049_s14 }
  0x82   : > { %3368 = dma.done.wait (%p4922_p7), %s284_s10, 16384  }
  0x83   : > { %3370 = vsyncadd (%p4922_p7), %s284_s10, 4294950912  ;;  %p3050_p6 = scmp.ne.s32.totalorder %s3393_s21, 0 }
  0x84   : > { %v314_v0 = vld [vmem:[#allocation5] sm:$0xff] (!%p3050_p6) }
  0x85   : > { %313 = sbr.rel (%p3050_p6) target bundleno = 140 (0x8c), region = 56  ;;  %315 = vst [vmem:[#allocation2] sm:$0xff] (!%p3050_p6), %v314_v0 }
  0x8c PF: > { %v3642_v1 = vld [vmem:[#allocation8] sm:$0xff]  ;;  %p3051_p9 = scmp.le.s32.totalorder %s3393_s21, 0 }
  0x8d   : > { %v321_v2 = vld [vmem:[#allocation3] sm:$0xff] (!%p3051_p9)  ;;  %v355_v3 = vlaneseq (!%p3051_p9)  ;;  %v352_v50 = vld [vmem:[%s3635_s13 + $0x388] sm:$0xff] (!%p3051_p9)  ;;  %v353_v57 = vld [vmem:[%s3635_s13 + $0x390] sm:$0xff] (!%p3051_p9)  ;;  %vm1444_vm0 = vcmask (!%p3051_p9), 1041409   ;;  %vm1446_vm1 = vcmask (!%p3051_p9), 1042434   ;;  %vm1448_vm2 = vcmask (!%p3051_p9), 1043459  }
  0x8e   : > { %320 = sbr.rel (%p3051_p9) target bundleno = 539 (0x21b), region = 60  ;;  %v322_v4 = vmul.f32 (!%p3051_p9), %v321_v2, %v3642_v1  ;;  %v351_v51 = vld [vmem:[%s3635_s13 + $0x380] sm:$0xff] (!%p3051_p9)  ;;  %v354_v56 = vld [vmem:[%s3635_s13 + $0x398] sm:$0xff] (!%p3051_p9)  ;;  %v620_v63 = vld [vmem:[%s3635_s13 + $0x28] sm:$0xff] (!%p3051_p9)  ;;  %vm1450_vm3 = vcmask (!%p3051_p9), 1044484   ;;  %vm1452_vm4 = vcmask (!%p3051_p9), 1045509  }
  0x8f   : > { %v356_v5 = vshrl.u32 (!%p3051_p9), %v355_v3, 7  ;;  %v619_v0 = vld [vmem:[%s3635_s13 + $0x20] sm:$0xff] (!%p3051_p9)  ;;  %vm1454_vm5 = vcmask (!%p3051_p9), 1046534   ;;  %vm1456_vm6 = vcmask (!%p3051_p9), 1047559  }
  0x91   : > { %v357_v6 = vsub.s32 (!%p3051_p9), 0, %v356_v5  ;;  %v376_v8 = vsub.s32 (!%p3051_p9), 1, %v356_v5  ;;  %v395_v10 = vsub.s32 (!%p3051_p9), 2, %v356_v5  ;;  %v414_v12 = vsub.s32 (!%p3051_p9), 3, %v356_v5 }
  0x92   : > { %v433_v14 = vsub.s32 (!%p3051_p9), 4, %v356_v5  ;;  %v452_v16 = vsub.s32 (!%p3051_p9), 5, %v356_v5  ;;  %v471_v18 = vsub.s32 (!%p3051_p9), 6, %v356_v5  ;;  %v490_v20 = vsub.s32 (!%p3051_p9), 7, %v356_v5 }
  0x93   : > { %v3646_v7 = vrot.slane (!%p3051_p9), %v322_v4, %v357_v6  ;;  %v3652_v9 = vrot.slane (!%p3051_p9), %v322_v4, %v376_v8  ;;  %v3658_v11 = vrot.slane (!%p3051_p9), %v322_v4, %v395_v10  ;;  %v3664_v13 = vrot.slane (!%p3051_p9), %v322_v4, %v414_v12  ;;  %v622_v10 = vld [vmem:[%s3635_s13 + $0x38] sm:$0xff] (!%p3051_p9)  ;;  %v621_v12 = vld [vmem:[%s3635_s13 + $0x30] sm:$0xff] (!%p3051_p9) }
  0x94   : > { %v3670_v15 = vrot.slane (!%p3051_p9), %v322_v4, %v433_v14  ;;  %v3676_v17 = vrot.slane (!%p3051_p9), %v322_v4, %v452_v16  ;;  %v3682_v19 = vrot.slane (!%p3051_p9), %v322_v4, %v471_v18  ;;  %v3688_v21 = vrot.slane (!%p3051_p9), %v322_v4, %v490_v20 }
  0x95   : > { %368 = vbcast.lane.b32.xlu1 %v3646_v7, 272  ;;  %360 = vbcast.lane.b32.xlu0 %v3646_v7, 256 }
  0x99   : > { %372 = vbcast.lane.b32.xlu1 %v3646_v7, 280  ;;  %364 = vbcast.lane.b32.xlu0 %v3646_v7, 264 }
  0x9d   : > { %383 = vbcast.lane.b32.xlu1 %v3652_v9, 264  ;;  %379 = vbcast.lane.b32.xlu0 %v3652_v9, 256 }
  0xa1   : > { %391 = vbcast.lane.b32.xlu1 %v3652_v9, 280  ;;  %387 = vbcast.lane.b32.xlu0 %v3652_v9, 272 }
  0xa5   : > { %402 = vbcast.lane.b32.xlu1 %v3658_v11, 264  ;;  %398 = vbcast.lane.b32.xlu0 %v3658_v11, 256 }
  0xa9   : > { %410 = vbcast.lane.b32.xlu1 %v3658_v11, 280  ;;  %406 = vbcast.lane.b32.xlu0 %v3658_v11, 272 }
  0xad   : > { %421 = vbcast.lane.b32.xlu1 %v3664_v13, 264  ;;  %417 = vbcast.lane.b32.xlu0 %v3664_v13, 256 }
  0xb1   : > { %429 = vbcast.lane.b32.xlu1 %v3664_v13, 280  ;;  %425 = vbcast.lane.b32.xlu0 %v3664_v13, 272 }
  0xb5   : > { %440 = vbcast.lane.b32.xlu1 %v3670_v15, 264  ;;  %436 = vbcast.lane.b32.xlu0 %v3670_v15, 256 }
  0xb9   : > { %448 = vbcast.lane.b32.xlu1 %v3670_v15, 280  ;;  %444 = vbcast.lane.b32.xlu0 %v3670_v15, 272 }
  0xbd   : > { %459 = vbcast.lane.b32.xlu1 %v3676_v17, 264  ;;  %455 = vbcast.lane.b32.xlu0 %v3676_v17, 256 }
  0xc1   : > { %467 = vbcast.lane.b32.xlu1 %v3676_v17, 280  ;;  %463 = vbcast.lane.b32.xlu0 %v3676_v17, 272 }
  0xc5   : > { %478 = vbcast.lane.b32.xlu1 %v3682_v19, 264  ;;  %474 = vbcast.lane.b32.xlu0 %v3682_v19, 256 }
  0xc9   : > { %486 = vbcast.lane.b32.xlu1 %v3682_v19, 280  ;;  %482 = vbcast.lane.b32.xlu0 %v3682_v19, 272 }
  0xcd   : > { %497 = vbcast.lane.b32.xlu1 %v3688_v21, 264  ;;  %493 = vbcast.lane.b32.xlu0 %v3688_v21, 256 }
  0xd1   : > { %505 = vbcast.lane.b32.xlu1 %v3688_v21, 280  ;;  %501 = vbcast.lane.b32.xlu0 %v3688_v21, 272 }
  0xd5   : > { %657 = vbcast.lane.b32.xlu1 %v3646_v7, 296  ;;  %653 = vbcast.lane.b32.xlu0 %v3646_v7, 288 }
  0xd9   : > { %665 = vbcast.lane.b32.xlu1 %v3646_v7, 312  ;;  %661 = vbcast.lane.b32.xlu0 %v3646_v7, 304 }
  0xdd   : > { %673 = vbcast.lane.b32.xlu1 %v3652_v9, 296  ;;  %669 = vbcast.lane.b32.xlu0 %v3652_v9, 288 }
  0xe1   : > { %681 = vbcast.lane.b32.xlu1 %v3652_v9, 312  ;;  %677 = vbcast.lane.b32.xlu0 %v3652_v9, 304 }
  0xe5   : > { %689 = vbcast.lane.b32.xlu1 %v3658_v11, 296  ;;  %685 = vbcast.lane.b32.xlu0 %v3658_v11, 288 }
  0xe9   : > { %697 = vbcast.lane.b32.xlu1 %v3658_v11, 312  ;;  %693 = vbcast.lane.b32.xlu0 %v3658_v11, 304 }
  0xed   : > { %705 = vbcast.lane.b32.xlu1 %v3664_v13, 296  ;;  %701 = vbcast.lane.b32.xlu0 %v3664_v13, 288 }
  0xf1   : > { %713 = vbcast.lane.b32.xlu1 %v3664_v13, 312  ;;  %709 = vbcast.lane.b32.xlu0 %v3664_v13, 304 }
  0xf5   : > { %721 = vbcast.lane.b32.xlu1 %v3670_v15, 296  ;;  %717 = vbcast.lane.b32.xlu0 %v3670_v15, 288 }
  0xf9   : > { %729 = vbcast.lane.b32.xlu1 %v3670_v15, 312  ;;  %725 = vbcast.lane.b32.xlu0 %v3670_v15, 304 }
  0xfd   : > { %737 = vbcast.lane.b32.xlu1 %v3676_v17, 296  ;;  %733 = vbcast.lane.b32.xlu0 %v3676_v17, 288 }
 0x101   : > { %745 = vbcast.lane.b32.xlu1 %v3676_v17, 312  ;;  %741 = vbcast.lane.b32.xlu0 %v3676_v17, 304 }
 0x105   : > { %753 = vbcast.lane.b32.xlu1 %v3682_v19, 296  ;;  %749 = vbcast.lane.b32.xlu0 %v3682_v19, 288 }
 0x107   : > { %v3720_v22 = vpop.permute.xlu1 %368  ;;  %v3722_v23 = vpop.permute.xlu0 %360 }
 0x109   : > { %761 = vbcast.lane.b32.xlu1 %v3682_v19, 312  ;;  %757 = vbcast.lane.b32.xlu0 %v3682_v19, 304 }
 0x10b   : > { %v3726_v24 = vpop.permute.xlu1 %372  ;;  %v3728_v25 = vpop.permute.xlu0 %364 }
 0x10d   : > { %769 = vbcast.lane.b32.xlu1 %v3688_v21, 296  ;;  %765 = vbcast.lane.b32.xlu0 %v3688_v21, 288 }
 0x10f   : > { %v3732_v26 = vpop.permute.xlu1 %383  ;;  %v3734_v27 = vpop.permute.xlu0 %379 }
 0x111   : > { %777 = vbcast.lane.b32.xlu1 %v3688_v21, 312  ;;  %773 = vbcast.lane.b32.xlu0 %v3688_v21, 304 }
 0x113   : > { %v3738_v28 = vpop.permute.xlu1 %391  ;;  %v3740_v29 = vpop.permute.xlu0 %387 }
 0x115   : > { %929 = vbcast.lane.b32.xlu1 %v3646_v7, 328  ;;  %925 = vbcast.lane.b32.xlu0 %v3646_v7, 320 }
 0x117   : > { %v3744_v30 = vpop.permute.xlu1 %402  ;;  %v3746_v31 = vpop.permute.xlu0 %398 }
 0x119   : > { %937 = vbcast.lane.b32.xlu1 %v3646_v7, 344  ;;  %933 = vbcast.lane.b32.xlu0 %v3646_v7, 336 }
 0x11b   : > { %v3750_v32 = vpop.permute.xlu1 %410  ;;  %v3752_v33 = vpop.permute.xlu0 %406 }
 0x11d   : > { %945 = vbcast.lane.b32.xlu1 %v3652_v9, 328  ;;  %941 = vbcast.lane.b32.xlu0 %v3652_v9, 320 }
 0x11f   : > { %v3756_v34 = vpop.permute.xlu1 %421  ;;  %v3758_v35 = vpop.permute.xlu0 %417 }
 0x121   : > { %953 = vbcast.lane.b32.xlu1 %v3652_v9, 344  ;;  %949 = vbcast.lane.b32.xlu0 %v3652_v9, 336 }
 0x123   : > { %v3762_v36 = vpop.permute.xlu1 %429  ;;  %v3764_v37 = vpop.permute.xlu0 %425 }
 0x125   : > { %961 = vbcast.lane.b32.xlu1 %v3658_v11, 328  ;;  %957 = vbcast.lane.b32.xlu0 %v3658_v11, 320 }
 0x127   : > { %v3768_v38 = vpop.permute.xlu1 %440  ;;  %v3770_v39 = vpop.permute.xlu0 %436 }
 0x129   : > { %969 = vbcast.lane.b32.xlu1 %v3658_v11, 344  ;;  %965 = vbcast.lane.b32.xlu0 %v3658_v11, 336 }
 0x12b   : > { %v3774_v40 = vpop.permute.xlu1 %448  ;;  %v3776_v41 = vpop.permute.xlu0 %444 }
 0x12d   : > { %977 = vbcast.lane.b32.xlu1 %v3664_v13, 328  ;;  %973 = vbcast.lane.b32.xlu0 %v3664_v13, 320 }
 0x12f   : > { %v3780_v42 = vpop.permute.xlu1 %459  ;;  %v3782_v43 = vpop.permute.xlu0 %455 }
 0x131   : > { %985 = vbcast.lane.b32.xlu1 %v3664_v13, 344  ;;  %981 = vbcast.lane.b32.xlu0 %v3664_v13, 336 }
 0x133   : > { %v3786_v44 = vpop.permute.xlu1 %467  ;;  %v3788_v45 = vpop.permute.xlu0 %463 }
 0x135   : > { %993 = vbcast.lane.b32.xlu1 %v3670_v15, 328  ;;  %989 = vbcast.lane.b32.xlu0 %v3670_v15, 320 }
 0x137   : > { %v3792_v46 = vpop.permute.xlu1 %478  ;;  %v3794_v47 = vpop.permute.xlu0 %474 }
 0x139   : > { %1001 = vbcast.lane.b32.xlu1 %v3670_v15, 344  ;;  %997 = vbcast.lane.b32.xlu0 %v3670_v15, 336 }
 0x13b   : > { %v3798_v48 = vpop.permute.xlu1 %486  ;;  %v3800_v49 = vpop.permute.xlu0 %482 }
 0x13d   : > { %1201 = vbcast.lane.b32.xlu1 %v3646_v7, 360  ;;  %1197 = vbcast.lane.b32.xlu0 %v3646_v7, 352 }
 0x13f   : > { %v498_v52 = vpop.permute.xlu1 %497  ;;  %v494_v53 = vpop.permute.xlu0 %493 }
 0x140   : > { %v536_v54 = vmul.f32 %v498_v52, %v352_v50  ;;  %v535_v55 = vmul.f32 %v494_v53, %v351_v51  ;;  %v624_v51 = vld [vmem:[%s3635_s13 + $0xa8] sm:$0xff]  ;;  %v623_v52 = vld [vmem:[%s3635_s13 + $0xa0] sm:$0xff] }
 0x141   : > { %1217 = vbcast.lane.b32.xlu1 %v3652_v9, 360  ;;  %1213 = vbcast.lane.b32.xlu0 %v3652_v9, 352 }
 0x142   : > { %v602_v60 = vadd.f32 %v536_v54, %v535_v55 }
 0x143   : > { %v506_v58 = vpop.permute.xlu1 %505  ;;  %v502_v59 = vpop.permute.xlu0 %501 }
 0x144   : > { %v538_v61 = vmul.f32 %v506_v58, %v354_v56  ;;  %v537_v62 = vmul.f32 %v502_v59, %v353_v57  ;;  %v626_v59 = vld [vmem:[%s3635_s13 + $0xb8] sm:$0xff] }
 0x145   : > { %1233 = vbcast.lane.b32.xlu1 %v3658_v11, 360  ;;  %1229 = vbcast.lane.b32.xlu0 %v3658_v11, 352 }
 0x146   : > { %v603_v2 = vadd.f32 %v602_v60, %v537_v62  ;;  %v625_v60 = vld [vmem:[%s3635_s13 + $0xb0] sm:$0xff] }
 0x147   : > { %v658_v3 = vpop.permute.xlu1 %657  ;;  %v654_v4 = vpop.permute.xlu0 %653 }
 0x148   : > { %v3814_v5 = vadd.f32 %v603_v2, %v538_v61  ;;  %v780_v6 = vmul.f32 %v658_v3, %v620_v63  ;;  %v779_v8 = vmul.f32 %v654_v4, %v619_v0  ;;  %v628_v3 = vld [vmem:[%s3635_s13 + $0x128] sm:$0xff]  ;;  %v627_v4 = vld [vmem:[%s3635_s13 + $0x120] sm:$0xff] }
 0x149   : > { %1009 = vbcast.lane.b32.xlu1 %v3676_v17, 328  ;;  %1005 = vbcast.lane.b32.xlu0 %v3676_v17, 320 }
 0x14a   : > { %v811_v14 = vadd.f32 %v780_v6, %v779_v8 }
 0x14b   : > { %v666_v16 = vpop.permute.xlu1 %665  ;;  %v662_v18 = vpop.permute.xlu0 %661 }
 0x14c   : > { %v782_v20 = vmul.f32 %v666_v16, %v622_v10  ;;  %v781_v50 = vmul.f32 %v662_v18, %v621_v12  ;;  %v630_v18 = vld [vmem:[%s3635_s13 + $0x138] sm:$0xff] }
 0x14d   : > { %1221 = vbcast.lane.b32.xlu1 %v3652_v9, 368  ;;  %1205 = vbcast.lane.b32.xlu0 %v3646_v7, 368 }
 0x14e   : > { %v812_v53 = vadd.f32 %v811_v14, %v781_v50 }
 0x14f   : > { %v674_v54 = vpop.permute.xlu1 %673  ;;  %v670_v55 = vpop.permute.xlu0 %669 }
 0x150   : > { %v3824_v56 = vadd.f32 %v812_v53, %v782_v20  ;;  %v784_v57 = vmul.f32 %v674_v54, %v624_v51  ;;  %v783_v58 = vmul.f32 %v670_v55, %v623_v52  ;;  %v629_v20 = vld [vmem:[%s3635_s13 + $0x130] sm:$0xff]  ;;  %v632_v55 = vld [vmem:[%s3635_s13 + $0x1a8] sm:$0xff] }
 0x151   : > { %1249 = vbcast.lane.b32.xlu1 %v3664_v13, 360  ;;  %1245 = vbcast.lane.b32.xlu0 %v3664_v13, 352 }
 0x152   : > { %v820_v61 = vadd.f32 %v784_v57, %v783_v58  ;;  %v631_v57 = vld [vmem:[%s3635_s13 + $0x1a0] sm:$0xff] }
 0x153   : > { %v682_v62 = vpop.permute.xlu1 %681  ;;  %v678_v63 = vpop.permute.xlu0 %677 }
 0x154   : > { %v786_v0 = vmul.f32 %v682_v62, %v626_v59  ;;  %v785_v2 = vmul.f32 %v678_v63, %v625_v60 }
 0x155   : > { %1025 = vbcast.lane.b32.xlu1 %v3682_v19, 328  ;;  %1021 = vbcast.lane.b32.xlu0 %v3682_v19, 320 }
 0x156   : > { %v821_v6 = vadd.f32 %v820_v61, %v785_v2  ;;  %v633_v2 = vld [vmem:[%s3635_s13 + $0x1b0] sm:$0xff] }
 0x157   : > { %v690_v8 = vpop.permute.xlu1 %689  ;;  %v686_v10 = vpop.permute.xlu0 %685 }
 0x158   : > { %v3834_v12 = vadd.f32 %v821_v6, %v786_v0  ;;  %v788_v14 = vmul.f32 %v690_v8, %v628_v3  ;;  %v787_v16 = vmul.f32 %v686_v10, %v627_v4  ;;  %v634_v0 = vld [vmem:[%s3635_s13 + $0x1b8] sm:$0xff] }
 0x159   : > { %1261 = vbcast.lane.b32.xlu1 %v3670_v15, 352  ;;  %1237 = vbcast.lane.b32.xlu0 %v3658_v11, 368 }
 0x15a   : > { %v829_v50 = vadd.f32 %v788_v14, %v787_v16  ;;  %v636_v14 = vld [vmem:[%s3635_s13 + $0x228] sm:$0xff]  ;;  %v635_v16 = vld [vmem:[%s3635_s13 + $0x220] sm:$0xff] }
 0x15b   : > { %v698_v51 = vpop.permute.xlu1 %697  ;;  %v694_v52 = vpop.permute.xlu0 %693 }
 0x15c   : > { %v790_v53 = vmul.f32 %v698_v51, %v630_v18  ;;  %v789_v54 = vmul.f32 %v694_v52, %v629_v20 }
 0x15d   : > { %1013 = vbcast.lane.b32.xlu1 %v3676_v17, 336  ;;  %1265 = vbcast.lane.b32.xlu0 %v3670_v15, 360 }
 0x15e   : > { %v830_v58 = vadd.f32 %v829_v50, %v789_v54  ;;  %v637_v54 = vld [vmem:[%s3635_s13 + $0x230] sm:$0xff] }
 0x15f   : > { %v706_v59 = vpop.permute.xlu1 %705  ;;  %v702_v60 = vpop.permute.xlu0 %701 }
 0x160   : > { %v3844_v61 = vadd.f32 %v830_v58, %v790_v53  ;;  %v792_v62 = vmul.f32 %v706_v59, %v632_v55  ;;  %v791_v63 = vmul.f32 %v702_v60, %v631_v57  ;;  %v640_v60 = vld [vmem:[%s3635_s13 + $0x2a8] sm:$0xff] }
 0x161   : > { %1041 = vbcast.lane.b32.xlu1 %v3688_v21, 328  ;;  %1037 = vbcast.lane.b32.xlu0 %v3688_v21, 320 }
 0x162   : > { %v838_v3 = vadd.f32 %v792_v62, %v791_v63  ;;  %v639_v62 = vld [vmem:[%s3635_s13 + $0x2a0] sm:$0xff]  ;;  %v324_v63 = vld [vmem:[%s3635_s13 + $0x8] sm:$0xff] }
 0x163   : > { %v714_v4 = vpop.permute.xlu1 %713  ;;  %v710_v6 = vpop.permute.xlu0 %709 }
 0x164   : > { %v794_v8 = vmul.f32 %v714_v4, %v634_v0  ;;  %v793_v10 = vmul.f32 %v710_v6, %v633_v2  ;;  %v323_v4 = vld [vmem:[%s3635_s13] sm:$0xff] }
 0x165   : > { %1225 = vbcast.lane.b32.xlu1 %v3652_v9, 376  ;;  %1209 = vbcast.lane.b32.xlu0 %v3646_v7, 376  ;;  %v638_v9 = vld [vmem:[%s3635_s13 + $0x238] sm:$0xff] }
 0x166   : > { %v839_v18 = vadd.f32 %v838_v3, %v793_v10 }
 0x167   : > { %v722_v20 = vpop.permute.xlu1 %721  ;;  %v718_v50 = vpop.permute.xlu0 %717 }
 0x168   : > { %v3854_v51 = vadd.f32 %v839_v18, %v794_v8  ;;  %v796_v52 = vmul.f32 %v722_v20, %v636_v14  ;;  %v795_v53 = vmul.f32 %v718_v50, %v635_v16  ;;  %v508_v14 = vmul.f32 %v3728_v25, %v324_v63  ;;  %v642_v16 = vld [vmem:[%s3635_s13 + $0x2b8] sm:$0xff]  ;;  %v641_v18 = vld [vmem:[%s3635_s13 + $0x2b0] sm:$0xff]  ;;  %v643_v25 = vld [vmem:[%s3635_s13 + $0x320] sm:$0xff] }
 0x169   : > { %1277 = vbcast.lane.b32.xlu1 %v3676_v17, 352  ;;  %1253 = vbcast.lane.b32.xlu0 %v3664_v13, 368  ;;  %v507_v50 = vmul.f32 %v3722_v23, %v323_v4  ;;  %v327_v63 = vld [vmem:[%s3635_s13 + $0x80] sm:$0xff] }
 0x16a   : > { %v847_v7 = vadd.f32 %v796_v52, %v795_v53 }
 0x16b   : > { %v730_v55 = vpop.permute.xlu1 %729  ;;  %v726_v57 = vpop.permute.xlu0 %725 }
 0x16c   : > { %v798_v58 = vmul.f32 %v730_v55, %v638_v9  ;;  %v797_v59 = vmul.f32 %v726_v57, %v637_v54  ;;  %v325_v9 = vld [vmem:[%s3635_s13 + $0x10] sm:$0xff]  ;;  %v539_v55 = vadd.f32 %v508_v14, %v507_v50 }
 0x16d   : > { %1029 = vbcast.lane.b32.xlu1 %v3682_v19, 336  ;;  %1281 = vbcast.lane.b32.xlu0 %v3676_v17, 360  ;;  %v509_v23 = vmul.f32 %v3720_v22, %v325_v9  ;;  %v329_v22 = vld [vmem:[%s3635_s13 + $0x90] sm:$0xff] }
 0x16e   : > { %v848_v0 = vadd.f32 %v847_v7, %v797_v59 }
 0x16f   : > { %v738_v2 = vpop.permute.xlu1 %737  ;;  %v734_v3 = vpop.permute.xlu0 %733  ;;  %v540_v4 = vadd.f32 %v539_v55, %v509_v23  ;;  %v648_v55 = vld [vmem:[%s3635_s13 + $0x3a8] sm:$0xff] }
 0x170   : > { %v3866_v6 = vadd.f32 %v848_v0, %v798_v58  ;;  %v800_v8 = vmul.f32 %v738_v2, %v640_v60  ;;  %v799_v10 = vmul.f32 %v734_v3, %v639_v62  ;;  %v326_v60 = vld [vmem:[%s3635_s13 + $0x18] sm:$0xff]  ;;  %v328_v62 = vld [vmem:[%s3635_s13 + $0x88] sm:$0xff] }
 0x171   : > { %1269 = vbcast.lane.b32.xlu1 %v3670_v15, 368  ;;  %1241 = vbcast.lane.b32.xlu0 %v3658_v11, 376  ;;  %v644_v11 = vld [vmem:[%s3635_s13 + $0x328] sm:$0xff] }
 0x172   : > { %v856_v20 = vadd.f32 %v800_v8, %v799_v10  ;;  %v646_v8 = vld [vmem:[%s3635_s13 + $0x338] sm:$0xff]  ;;  %v645_v10 = vld [vmem:[%s3635_s13 + $0x330] sm:$0xff] }
 0x173   : > { %v746_v52 = vpop.permute.xlu1 %745  ;;  %v742_v53 = vpop.permute.xlu0 %741 }
 0x174   : > { %v802_v54 = vmul.f32 %v746_v52, %v642_v16  ;;  %v801_v7 = vmul.f32 %v742_v53, %v641_v18  ;;  %v510_v16 = vmul.f32 %v3726_v24, %v326_v60  ;;  %v512_v18 = vmul.f32 %v3732_v26, %v328_v62  ;;  %v330_v24 = vld [vmem:[%s3635_s13 + $0x98] sm:$0xff] }
 0x175   : > { %1297 = vbcast.lane.b32.xlu1 %v3682_v19, 360  ;;  %1293 = vbcast.lane.b32.xlu0 %v3682_v19, 352 }
 0x176   : > { %v857_v57 = vadd.f32 %v856_v20, %v801_v7  ;;  %v511_v20 = vmul.f32 %v3734_v27, %v327_v63  ;;  %v513_v7 = vmul.f32 %v3740_v29, %v329_v22 }
 0x177   : > { %v754_v58 = vpop.permute.xlu1 %753  ;;  %v750_v59 = vpop.permute.xlu0 %749 }
 0x178   : > { %v3883_v0 = vadd.f32 %v857_v57, %v802_v54  ;;  %v804_v2 = vmul.f32 %v754_v58, %v644_v11  ;;  %v803_v3 = vmul.f32 %v750_v59, %v643_v25  ;;  %v541_v54 = vadd.f32 %v540_v4, %v510_v16  ;;  %v647_v11 = vld [vmem:[%s3635_s13 + $0x3a0] sm:$0xff]  ;;  %v332_v58 = vld [vmem:[%s3635_s13 + $0x108] sm:$0xff]  ;;  %v649_v4 = vld [vmem:[%s3635_s13 + $0x3b0] sm:$0xff] }
 0x179   : > { %1045 = vbcast.lane.b32.xlu1 %v3688_v21, 336  ;;  %1017 = vbcast.lane.b32.xlu0 %v3676_v17, 344  ;;  %v548_v27 = vadd.f32 %v512_v18, %v511_v20  ;;  %v605_v25 = vrot.slane %v3814_v5, 4  ;;  %v331_v59 = vld [vmem:[%s3635_s13 + $0x100] sm:$0xff]  ;;  %v516_v22 = vmul.f32 %v3744_v30, %v332_v58 }
 0x17a   : > { %v865_v14 = vadd.f32 %v804_v2, %v803_v3  ;;  %v542_v63 = vrot.slane %v541_v54, 4  ;;  %v650_v3 = vld [vmem:[%s3635_s13 + $0x3b8] sm:$0xff]  ;;  %v891_v30 = vld [vmem:[%s3635_s13 + $0x40] sm:$0xff] }
 0x17b   : > { %v762_v50 = vpop.permute.xlu1 %761  ;;  %v758_v52 = vpop.permute.xlu0 %757  ;;  %v549_v2 = vadd.f32 %v548_v27, %v513_v7  ;;  %v606_v16 = vadd.f32 %v605_v25, %v3814_v5 }
 0x17c   : > { %v806_v53 = vmul.f32 %v762_v50, %v646_v8  ;;  %v805_v9 = vmul.f32 %v758_v52, %v645_v10  ;;  %v333_v8 = vld [vmem:[%s3635_s13 + $0x110] sm:$0xff] }
 0x17d   : > { %1285 = vbcast.lane.b32.xlu1 %v3676_v17, 368  ;;  %1257 = vbcast.lane.b32.xlu0 %v3664_v13, 376  ;;  %v514_v13 = vmul.f32 %v3738_v28, %v330_v24  ;;  %v814_v28 = vrot.slane %v3824_v56, 4  ;;  %v517_v7 = vmul.f32 %v3752_v33, %v333_v8  ;;  %v607_v24 = vrot.slane %v606_v16, 2 }
 0x17e   : > { %v866_v26 = vadd.f32 %v865_v14, %v805_v9  ;;  %v515_v14 = vmul.f32 %v3746_v31, %v331_v59  ;;  %v823_v8 = vrot.slane %v3834_v12, 4 }
 0x17f   : > { %v770_v57 = vpop.permute.xlu1 %769  ;;  %v766_v23 = vpop.permute.xlu0 %765  ;;  %v550_v9 = vadd.f32 %v549_v2, %v514_v13  ;;  %v336_v13 = vld [vmem:[%s3635_s13 + $0x188] sm:$0xff]  ;;  %v335_v2 = vld [vmem:[%s3635_s13 + $0x180] sm:$0xff] }
 0x180   : > { %v3902_v60 = vadd.f32 %v866_v26, %v806_v53  ;;  %v808_v29 = vmul.f32 %v770_v57, %v648_v55  ;;  %v807_v62 = vmul.f32 %v766_v23, %v647_v11  ;;  %v543_v53 = vadd.f32 %v542_v63, %v541_v54  ;;  %v892_v55 = vld [vmem:[%s3635_s13 + $0x48] sm:$0xff]  ;;  %v334_v11 = vld [vmem:[%s3635_s13 + $0x118] sm:$0xff] }
 0x181   : > { %1313 = vbcast.lane.b32.xlu1 %v3688_v21, 360  ;;  %1309 = vbcast.lane.b32.xlu0 %v3688_v21, 352  ;;  %v557_v5 = vadd.f32 %v516_v22, %v515_v14  ;;  %v815_v26 = vadd.f32 %v814_v28, %v3824_v56  ;;  %v551_v23 = vrot.slane %v550_v9, 4  ;;  %v518_v58 = vmul.f32 %v3750_v32, %v334_v11 }
 0x182   : > { %v874_v10 = vadd.f32 %v808_v29, %v807_v62  ;;  %v894_v29 = vld [vmem:[%s3635_s13 + $0x58] sm:$0xff]  ;;  %v893_v62 = vld [vmem:[%s3635_s13 + $0x50] sm:$0xff] }
 0x183   : > { %v778_v18 = vpop.permute.xlu1 %777  ;;  %v774_v20 = vpop.permute.xlu0 %773  ;;  %v558_v59 = vadd.f32 %v557_v5, %v517_v7  ;;  %v520_v7 = vmul.f32 %v3756_v34, %v336_v13  ;;  %v897_v34 = vld [vmem:[%s3635_s13 + $0xd0] sm:$0xff] }
 0x184   : > { %v810_v50 = vmul.f32 %v778_v18, %v650_v3  ;;  %v809_v52 = vmul.f32 %v774_v20, %v649_v4  ;;  %v608_v3 = vadd.f32 %v607_v24, %v606_v16  ;;  %v816_v4 = vrot.slane %v815_v26, 2  ;;  %v895_v16 = vld [vmem:[%s3635_s13 + $0xc0] sm:$0xff] }
 0x185   : > { %1273 = vbcast.lane.b32.xlu1 %v3670_v15, 376  ;;  %1033 = vbcast.lane.b32.xlu0 %v3682_v19, 344  ;;  %v544_v15 = vrot.slane %v543_v53, 2  ;;  %v3929_v20 = vadd.f32 %v551_v23, %v550_v9  ;;  %v824_v9 = vadd.f32 %v823_v8, %v3834_v12  ;;  %v898_v12 = vld [vmem:[%s3635_s13 + $0xd8] sm:$0xff]  ;;  %v832_v8 = vrot.slane %v3844_v61, 4 }
 0x186   : > { %v875_v31 = vadd.f32 %v874_v10, %v809_v52  ;;  %v896_v52 = vld [vmem:[%s3635_s13 + $0xc8] sm:$0xff]  ;;  %v609_v5 = vrot.slane %v608_v3, 1 }
 0x187   : > { %v930_v27 = vpop.permute.xlu1 %929  ;;  %v926_v54 = vpop.permute.xlu0 %925  ;;  %v545_v18 = vadd.f32 %v544_v15, %v543_v53  ;;  %v817_v53 = vadd.f32 %v816_v4, %v815_v26  ;;  %v825_v4 = vrot.slane %v824_v9, 2 }
 0x188   : > { %v876_v25 = vadd.f32 %v875_v31, %v810_v50  ;;  %v1052_v33 = vmul.f32 %v930_v27, %v892_v55  ;;  %v1051_v57 = vmul.f32 %v926_v54, %v891_v30  ;;  %v3931_v50 = vadd.f32 %v558_v59, %v518_v58  ;;  %v337_v30 = vld [vmem:[%s3635_s13 + $0x190] sm:$0xff]  ;;  %v338_v58 = vld [vmem:[%s3635_s13 + $0x198] sm:$0xff]  ;;  %v340_v59 = vld [vmem:[%s3635_s13 + $0x208] sm:$0xff] }
 0x189   : > { %1049 = vbcast.lane.b32.xlu1 %v3688_v21, 344  ;;  %1301 = vbcast.lane.b32.xlu0 %v3682_v19, 368  ;;  %v519_v55 = vmul.f32 %v3758_v35, %v335_v2  ;;  %v553_v35 = vrot.slane %v3929_v20, 2  ;;  %v521_v23 = vmul.f32 %v3764_v37, %v337_v30  ;;  %v610_v13 = vadd.f32 %v609_v5, %v608_v3  ;;  %v899_v3 = vld [vmem:[%s3635_s13 + $0x140] sm:$0xff]  ;;  %v341_v5 = vld [vmem:[%s3635_s13 + $0x210] sm:$0xff] }
 0x18a   : > { %v877_v63 = vrot.slane %v876_v25, 4  ;;  %v1083_v56 = vadd.f32 %v1052_v33, %v1051_v57  ;;  %v546_v57 = vrot.slane %v545_v18, 1  ;;  %v560_v15 = vrot.slane %v3931_v50, 4 }
 0x18b   : > { %v938_v10 = vpop.permute.xlu1 %937  ;;  %v934_v32 = vpop.permute.xlu0 %933  ;;  %v566_v26 = vadd.f32 %v520_v7, %v519_v55  ;;  %v818_v2 = vrot.slane %v817_v53, 1  ;;  %v900_v7 = vld [vmem:[%s3635_s13 + $0x148] sm:$0xff] }
 0x18c   : > { %v878_v22 = vadd.f32 %v877_v63, %v876_v25  ;;  %v1054_v14 = vmul.f32 %v938_v10, %v894_v29  ;;  %v1053_v28 = vmul.f32 %v934_v32, %v893_v62  ;;  %v339_v29 = vld [vmem:[%s3635_s13 + $0x200] sm:$0xff] }
 0x18d   : > { %1317 = vbcast.lane.b32.xlu1 %v3688_v21, 368  ;;  %1289 = vbcast.lane.b32.xlu0 %v3676_v17, 376 }
 0x18e   : > { %v879_v11 = vrot.slane %v878_v22, 2  ;;  %v1084_v31 = vadd.f32 %v1083_v56, %v1053_v28  ;;  %v567_v28 = vadd.f32 %v566_v26, %v521_v23  ;;  %v561_v23 = vadd.f32 %v560_v15, %v3931_v50 }
 0x18f   : > { %v946_v24 = vpop.permute.xlu1 %945  ;;  %v942_v27 = vpop.permute.xlu0 %941 }
 0x190   : > { %v880_v17 = vadd.f32 %v879_v11, %v878_v22  ;;  %v1085_v54 = vadd.f32 %v1084_v31, %v1054_v14  ;;  %v1056_v25 = vmul.f32 %v946_v24, %v896_v52  ;;  %v1055_v33 = vmul.f32 %v942_v27, %v895_v16 }
 0x191   : > { %1321 = vbcast.lane.b32.xlu1 %v3688_v21, 376  ;;  %1305 = vbcast.lane.b32.xlu0 %v3682_v19, 376  ;;  %v522_v14 = vmul.f32 %v3762_v36, %v338_v58  ;;  %v524_v52 = vmul.f32 %v3768_v38, %v340_v59  ;;  %v523_v16 = vmul.f32 %v3770_v39, %v339_v29  ;;  %v342_v58 = vld [vmem:[%s3635_s13 + $0x218] sm:$0xff] }
 0x192   : > { %v881_v62 = vrot.slane %v880_v17, 1  ;;  %v1086_v63 = vrot.slane %v1085_v54, 4  ;;  %v1092_v56 = vadd.f32 %v1056_v25, %v1055_v33  ;;  %v547_v31 = vadd.f32 %v546_v57, %v545_v18  ;;  %v902_v18 = vld [vmem:[%s3635_s13 + $0x158] sm:$0xff]  ;;  %v901_v57 = vld [vmem:[%s3635_s13 + $0x150] sm:$0xff] }
 0x193   : > { %v954_v37 = vpop.permute.xlu1 %953  ;;  %v950_v21 = vpop.permute.xlu0 %949  ;;  %v819_v24 = vadd.f32 %v818_v2, %v817_v53  ;;  %v826_v27 = vadd.f32 %v825_v4, %v824_v9  ;;  %v833_v36 = vadd.f32 %v832_v8, %v3844_v61  ;;  %v575_v26 = vadd.f32 %v524_v52, %v523_v16 }
 0x194   : > { %v882_v10 = vadd.f32 %v881_v62, %v880_v17  ;;  %v1087_v19 = vadd.f32 %v1086_v63, %v1085_v54  ;;  %v1058_v32 = vmul.f32 %v954_v37, %v898_v12  ;;  %v1057_v22 = vmul.f32 %v950_v21, %v897_v34  ;;  %v904_v21 = vld [vmem:[%s3635_s13 + $0x1c8] sm:$0xff] }
 0x195   : > { %v554_v34 = vadd.f32 %v553_v35, %v3929_v20  ;;  %v568_v12 = vadd.f32 %v567_v28, %v522_v14  ;;  %v525_v53 = vmul.f32 %v3776_v41, %v341_v5  ;;  %v883_v29 = vadd.f32 %v819_v24, %v547_v31 }
 0x196   : > { %v1088_v55 = vrot.slane %v1087_v19, 2  ;;  %v1093_v30 = vadd.f32 %v1092_v56, %v1057_v22  ;;  %v3957_v11 = vadd.f32 %v882_v10, %v610_v13  ;;  %v827_v62 = vrot.slane %v826_v27, 1  ;;  %v903_v10 = vld [vmem:[%s3635_s13 + $0x1c0] sm:$0xff] }
 0x197   : > { %v962_v17 = vpop.permute.xlu1 %961  ;;  %v958_v54 = vpop.permute.xlu0 %957  ;;  %v834_v63 = vrot.slane %v833_v36, 2  ;;  %v841_v56 = vrot.slane %v3854_v51, 4  ;;  %v555_v4 = vrot.slane %v554_v34, 1  ;;  %v562_v8 = vrot.slane %v561_v23, 2 }
 0x198   : > { %v1089_v38 = vadd.f32 %v1088_v55, %v1087_v19  ;;  %v1094_v25 = vadd.f32 %v1093_v30, %v1058_v32  ;;  %v1060_v39 = vmul.f32 %v962_v17, %v900_v7  ;;  %v1059_v33 = vmul.f32 %v958_v54, %v899_v3  ;;  %v906_v54 = vld [vmem:[%s3635_s13 + $0x1d8] sm:$0xff] }
 0x199   : > { %v569_v37 = vrot.slane %v568_v12, 4  ;;  %v526_v41 = vmul.f32 %v3774_v40, %v342_v58  ;;  %v576_v19 = vadd.f32 %v575_v26, %v525_v53  ;;  %v828_v28 = vadd.f32 %v827_v62, %v826_v27 }
 0x19a   : > { %v1090_v9 = vrot.slane %v1089_v38, 1  ;;  %v1095_v59 = vrot.slane %v1094_v25, 4  ;;  %v1101_v61 = vadd.f32 %v1060_v39, %v1059_v33  ;;  %v835_v52 = vadd.f32 %v834_v63, %v833_v36 }
 0x19b   : > { %v970_v20 = vpop.permute.xlu1 %969  ;;  %v966_v35 = vpop.permute.xlu0 %965  ;;  %v842_v16 = vadd.f32 %v841_v56, %v3854_v51  ;;  %v556_v40 = vadd.f32 %v555_v4, %v554_v34  ;;  %v563_v24 = vadd.f32 %v562_v8, %v561_v23  ;;  %v570_v17 = vadd.f32 %v569_v37, %v568_v12 }
 0x19c   : > { %v1091_v50 = vadd.f32 %v1090_v9, %v1089_v38  ;;  %v1096_v15 = vadd.f32 %v1095_v59, %v1094_v25  ;;  %v1062_v13 = vmul.f32 %v970_v20, %v902_v18  ;;  %v1061_v2 = vmul.f32 %v966_v35, %v901_v57  ;;  %v905_v38 = vld [vmem:[%s3635_s13 + $0x1d0] sm:$0xff] }
 0x19d   : > { %v577_v25 = vadd.f32 %v576_v19, %v526_v41  ;;  %v884_v36 = vadd.f32 %v828_v28, %v556_v40  ;;  %v836_v26 = vrot.slane %v835_v52, 1  ;;  %v843_v51 = vrot.slane %v842_v16, 2  ;;  %v910_v19 = vld [vmem:[%s3635_s13 + $0x258] sm:$0xff] }
 0x19e   : > { %v1097_v32 = vrot.slane %v1096_v15, 2  ;;  %v1102_v22 = vadd.f32 %v1101_v61, %v1061_v2  ;;  %v3971_v14 = vadd.f32 %v1091_v50, %v883_v29  ;;  %v850_v18 = vrot.slane %v3866_v6, 4  ;;  %v908_v61 = vld [vmem:[%s3635_s13 + $0x248] sm:$0xff]  ;;  %v907_v29 = vld [vmem:[%s3635_s13 + $0x240] sm:$0xff] }
 0x19f   : > { %v978_v7 = vpop.permute.xlu1 %977  ;;  %v974_v3 = vpop.permute.xlu0 %973  ;;  %v564_v12 = vrot.slane %v563_v24, 1  ;;  %v571_v59 = vrot.slane %v570_v17, 2  ;;  %v578_v62 = vrot.slane %v577_v25, 4  ;;  %v837_v35 = vadd.f32 %v836_v26, %v835_v52 }
 0x1a0   : > { %v1098_v55 = vadd.f32 %v1097_v32, %v1096_v15  ;;  %v1103_v30 = vadd.f32 %v1102_v22, %v1062_v13  ;;  %v1064_v31 = vmul.f32 %v978_v7, %v904_v21  ;;  %v1063_v5 = vmul.f32 %v974_v3, %v903_v10  ;;  %v909_v32 = vld [vmem:[%s3635_s13 + $0x250] sm:$0xff] }
 0x1a1   : > { %v844_v50 = vadd.f32 %v843_v51, %v842_v16  ;;  %v851_v15 = vadd.f32 %v850_v18, %v3866_v6  ;;  %v565_v21 = vadd.f32 %v564_v12, %v563_v24  ;;  %v572_v10 = vadd.f32 %v571_v59, %v570_v17  ;;  %v1164_v24 = vld [vmem:[%s3635_s13 + $0x68] sm:$0xff]  ;;  %v1163_v17 = vld [vmem:[%s3635_s13 + $0x60] sm:$0xff] }
 0x1a2   : > { %v1099_v39 = vrot.slane %v1098_v55, 1  ;;  %v1104_v33 = vrot.slane %v1103_v30, 4  ;;  %v1110_v27 = vadd.f32 %v1064_v31, %v1063_v5  ;;  %v579_v22 = vadd.f32 %v578_v62, %v577_v25  ;;  %v1167_v12 = vld [vmem:[%s3635_s13 + $0xe0] sm:$0xff] }
 0x1a3   : > { %v986_v57 = vpop.permute.xlu1 %985  ;;  %v982_v58 = vpop.permute.xlu0 %981  ;;  %v885_v52 = vadd.f32 %v837_v35, %v565_v21  ;;  %v845_v16 = vrot.slane %v844_v50, 1 }
 0x1a4   : > { %v1100_v53 = vadd.f32 %v1099_v39, %v1098_v55  ;;  %v1105_v9 = vadd.f32 %v1104_v33, %v1103_v30  ;;  %v1066_v34 = vmul.f32 %v986_v57, %v906_v54  ;;  %v1065_v23 = vmul.f32 %v982_v58, %v905_v38 }
 0x1a5   : > { %v852_v55 = vrot.slane %v851_v15, 2  ;;  %v573_v38 = vrot.slane %v572_v10, 1  ;;  %v580_v39 = vrot.slane %v579_v22, 2 }
 0x1a6   : > { %v1106_v63 = vrot.slane %v1105_v9, 2  ;;  %v1111_v56 = vadd.f32 %v1110_v27, %v1065_v23  ;;  %v3979_v20 = vadd.f32 %v1100_v53, %v884_v36  ;;  %v846_v36 = vadd.f32 %v845_v16, %v844_v50  ;;  %v1168_v23 = vld [vmem:[%s3635_s13 + $0xe8] sm:$0xff] }
 0x1a7   : > { %v994_v13 = vpop.permute.xlu1 %993  ;;  %v990_v2 = vpop.permute.xlu0 %989  ;;  %v853_v26 = vadd.f32 %v852_v55, %v851_v15  ;;  %v581_v59 = vadd.f32 %v580_v39, %v579_v22  ;;  %v912_v16 = vld [vmem:[%s3635_s13 + $0x2c8] sm:$0xff]  ;;  %v911_v55 = vld [vmem:[%s3635_s13 + $0x2c0] sm:$0xff] }
 0x1a8   : > { %v1107_v4 = vadd.f32 %v1106_v63, %v1105_v9  ;;  %v1112_v8 = vadd.f32 %v1111_v56, %v1066_v34  ;;  %v1068_v37 = vmul.f32 %v994_v13, %v908_v61  ;;  %v1067_v41 = vmul.f32 %v990_v2, %v907_v29 }
 0x1a9   : > { %v574_v34 = vadd.f32 %v573_v38, %v572_v10  ;;  %v854_v56 = vrot.slane %v853_v26, 1 }
 0x1aa   : > { %v1108_v28 = vrot.slane %v1107_v4, 1  ;;  %v1113_v7 = vrot.slane %v1112_v8, 4  ;;  %v1119_v3 = vadd.f32 %v1068_v37, %v1067_v41  ;;  %v1171_v37 = vld [vmem:[%s3635_s13 + $0x160] sm:$0xff]  ;;  %v582_v41 = vrot.slane %v581_v59, 1 }
 0x1ab   : > { %v1002_v6 = vpop.permute.xlu1 %1001  ;;  %v998_v30 = vpop.permute.xlu0 %997  ;;  %v886_v63 = vadd.f32 %v846_v36, %v574_v34  ;;  %v343_v34 = vld [vmem:[%s3635_s13 + $0x280] sm:$0xff] }
 0x1ac   : > { %v1109_v31 = vadd.f32 %v1108_v28, %v1107_v4  ;;  %v1114_v5 = vadd.f32 %v1113_v7, %v1112_v8  ;;  %v1070_v40 = vmul.f32 %v1002_v6, %v910_v19  ;;  %v1069_v54 = vmul.f32 %v998_v30, %v909_v32  ;;  %v1172_v8 = vld [vmem:[%s3635_s13 + $0x168] sm:$0xff] }
 0x1ad   : > { %v855_v28 = vadd.f32 %v854_v56, %v853_v26  ;;  %v583_v6 = vadd.f32 %v582_v41, %v581_v59  ;;  %v345_v59 = vld [vmem:[%s3635_s13 + $0x290] sm:$0xff]  ;;  %v1166_v41 = vld [vmem:[%s3635_s13 + $0x78] sm:$0xff] }
 0x1ae   : > { %v1115_v33 = vrot.slane %v1114_v5, 2  ;;  %v1120_v25 = vadd.f32 %v1119_v3, %v1069_v54  ;;  %v3986_v27 = vadd.f32 %v1109_v31, %v885_v52  ;;  %v1165_v56 = vld [vmem:[%s3635_s13 + $0x70] sm:$0xff] }
 0x1af   : > { %v1202_v51 = vpop.permute.xlu1 %1201  ;;  %v1198_v18 = vpop.permute.xlu0 %1197  ;;  %v887_v54 = vadd.f32 %v855_v28, %v583_v6 }
 0x1b0   : > { %v1116_v57 = vadd.f32 %v1115_v33, %v1114_v5  ;;  %v1121_v58 = vadd.f32 %v1120_v25, %v1070_v40  ;;  %v1324_v53 = vmul.f32 %v1202_v51, %v1164_v24  ;;  %v1323_v9 = vmul.f32 %v1198_v18, %v1163_v17 }
 0x1b2   : > { %v1117_v61 = vrot.slane %v1116_v57, 1  ;;  %v1122_v29 = vrot.slane %v1121_v58, 4  ;;  %v3990_v62 = vadd.f32 %v1324_v53, %v1323_v9  ;;  %v344_v9 = vld [vmem:[%s3635_s13 + $0x288] sm:$0xff] }
 0x1b3   : > { %v1218_v35 = vpop.permute.xlu1 %1217  ;;  %v1214_v50 = vpop.permute.xlu0 %1213 }
 0x1b4   : > { %v1118_v15 = vadd.f32 %v1117_v61, %v1116_v57  ;;  %v1123_v13 = vadd.f32 %v1122_v29, %v1121_v58  ;;  %v1328_v2 = vmul.f32 %v1218_v35, %v1168_v23  ;;  %v1327_v4 = vmul.f32 %v1214_v50, %v1167_v12 }
 0x1b5   : > { %v528_v61 = vmul.f32 %v3780_v42, %v344_v9  ;;  %v527_v29 = vmul.f32 %v3782_v43, %v343_v34  ;;  %v529_v35 = vmul.f32 %v3788_v45, %v345_v59 }
 0x1b6   : > { %v1124_v21 = vrot.slane %v1123_v13, 2  ;;  %v1364_v10 = vadd.f32 %v1328_v2, %v1327_v4  ;;  %v3994_v19 = vadd.f32 %v1118_v15, %v886_v63  ;;  %v1169_v63 = vld [vmem:[%s3635_s13 + $0xf0] sm:$0xff] }
 0x1b7   : > { %v1234_v32 = vpop.permute.xlu1 %1233  ;;  %v1230_v22 = vpop.permute.xlu0 %1229 }
 0x1b8   : > { %v1125_v7 = vadd.f32 %v1124_v21, %v1123_v13  ;;  %v1332_v3 = vmul.f32 %v1234_v32, %v1172_v8  ;;  %v1331_v52 = vmul.f32 %v1230_v22, %v1171_v37  ;;  %v346_v13 = vld [vmem:[%s3635_s13 + $0x298] sm:$0xff]  ;;  %v584_v8 = vadd.f32 %v528_v61, %v527_v29 }
 0x1b9   : > { %v1170_v37 = vld [vmem:[%s3635_s13 + $0xf8] sm:$0xff]  ;;  %v530_v42 = vmul.f32 %v3786_v44, %v346_v13 }
 0x1ba   : > { %v1126_v30 = vrot.slane %v1125_v7, 1  ;;  %v3998_v31 = vadd.f32 %v1332_v3, %v1331_v52  ;;  %v585_v21 = vadd.f32 %v584_v8, %v529_v35  ;;  %v350_v35 = vld [vmem:[%s3635_s13 + $0x318] sm:$0xff] }
 0x1bb   : > { %v1010_v5 = vpop.permute.xlu1 %1009  ;;  %v1006_v40 = vpop.permute.xlu0 %1005 }
 0x1bc   : > { %v1127_v38 = vadd.f32 %v1126_v30, %v1125_v7  ;;  %v1072_v24 = vmul.f32 %v1010_v5, %v912_v16  ;;  %v1071_v17 = vmul.f32 %v1006_v40, %v911_v55  ;;  %v586_v16 = vadd.f32 %v585_v21, %v530_v42  ;;  %v348_v30 = vld [vmem:[%s3635_s13 + $0x308] sm:$0xff]  ;;  %v347_v5 = vld [vmem:[%s3635_s13 + $0x300] sm:$0xff] }
 0x1be   : > { %v4000_v39 = vadd.f32 %v1072_v24, %v1071_v17  ;;  %v4002_v33 = vadd.f32 %v1127_v38, %v887_v54  ;;  %v1173_v54 = vld [vmem:[%s3635_s13 + $0x170] sm:$0xff]  ;;  %v587_v17 = vrot.slane %v586_v16, 4 }
 0x1bf   : > { %v1222_v25 = vpop.permute.xlu1 %1221  ;;  %v1206_v36 = vpop.permute.xlu0 %1205  ;;  %v349_v38 = vld [vmem:[%s3635_s13 + $0x310] sm:$0xff] }
 0x1c0   : > { %v1329_v2 = vmul.f32 %v1222_v25, %v1169_v63  ;;  %v1325_v4 = vmul.f32 %v1206_v36, %v1165_v56  ;;  %v531_v25 = vmul.f32 %v3794_v47, %v347_v5  ;;  %v859_v36 = vrot.slane %v3883_v0, 4  ;;  %v1174_v56 = vld [vmem:[%s3635_s13 + $0x178] sm:$0xff] }
 0x1c1   : > { %v533_v63 = vmul.f32 %v3800_v49, %v349_v38  ;;  %v534_v49 = vmul.f32 %v3798_v48, %v350_v35  ;;  %v914_v38 = vld [vmem:[%s3635_s13 + $0x2d8] sm:$0xff]  ;;  %v915_v35 = vld [vmem:[%s3635_s13 + $0x340] sm:$0xff] }
 0x1c2   : > { %v1365_v45 = vadd.f32 %v1364_v10, %v1329_v2  ;;  %v1356_v22 = vadd.f32 %v3990_v62, %v1325_v4  ;;  %v532_v62 = vmul.f32 %v3792_v46, %v348_v30  ;;  %v588_v4 = vadd.f32 %v587_v17, %v586_v16 }
 0x1c3   : > { %v4004_v26 = vpop.permute.xlu1 %1249  ;;  %v4006_v51 = vpop.permute.xlu0 %1245  ;;  %v860_v47 = vadd.f32 %v859_v36, %v3883_v0 }
 0x1c4   : > { %v593_v46 = vadd.f32 %v532_v62, %v531_v25 }
 0x1c5   : > { %v861_v0 = vrot.slane %v860_v47, 2 }
 0x1c7   : > { %v4008_v18 = vpop.permute.xlu1 %1025  ;;  %v4010_v57 = vpop.permute.xlu0 %1021 }
 0x1cb   : > { %v4012_v58 = vpop.permute.xlu1 %1261  ;;  %v1238_v53 = vpop.permute.xlu0 %1237 }
 0x1cc   : > { %v1333_v59 = vmul.f32 %v1238_v53, %v1173_v54  ;;  %v1177_v54 = vld [vmem:[%s3635_s13 + $0x1f0] sm:$0xff] }
 0x1ce   : > { %v1374_v53 = vadd.f32 %v3998_v31, %v1333_v59 }
 0x1cf   : > { %v4016_v23 = vpop.permute.xlu1 %1013  ;;  %v4018_v12 = vpop.permute.xlu0 %1265 }
 0x1d3   : > { %v4026_v50 = vpop.permute.xlu1 %1041  ;;  %v4028_v15 = vpop.permute.xlu0 %1037 }
 0x1d7   : > { %v1226_v43 = vpop.permute.xlu1 %1225  ;;  %v1210_v32 = vpop.permute.xlu0 %1209 }
 0x1d8   : > { %v1330_v28 = vmul.f32 %v1226_v43, %v1170_v37  ;;  %v1326_v7 = vmul.f32 %v1210_v32, %v1166_v41  ;;  %v594_v43 = vadd.f32 %v593_v46, %v533_v63  ;;  %v913_v32 = vld [vmem:[%s3635_s13 + $0x2d0] sm:$0xff]  ;;  %v1178_v63 = vld [vmem:[%s3635_s13 + $0x1f8] sm:$0xff] }
 0x1d9   : > { %v1073_v30 = vmul.f32 %v4016_v23, %v913_v32  ;;  %v862_v23 = vadd.f32 %v861_v0, %v860_v47  ;;  %v919_v0 = vld [vmem:[%s3635_s13 + $0x3c0] sm:$0xff] }
 0x1da   : > { %v1366_v3 = vadd.f32 %v1365_v45, %v1330_v28  ;;  %v1357_v52 = vadd.f32 %v1356_v22, %v1326_v7  ;;  %v589_v7 = vrot.slane %v588_v4, 2 }
 0x1db   : > { %v4035_v55 = vpop.permute.xlu1 %1277  ;;  %v1254_v6 = vpop.permute.xlu0 %1253  ;;  %v863_v47 = vrot.slane %v862_v23, 1 }
 0x1dc   : > { %v1367_v40 = vrot.slane %v1366_v3, 4  ;;  %v1358_v44 = vrot.slane %v1357_v52, 4  ;;  %v590_v25 = vadd.f32 %v589_v7, %v588_v4  ;;  %v1337_v59 = vmul.f32 %v1254_v6, %v1177_v54  ;;  %v1179_v6 = vld [vmem:[%s3635_s13 + $0x260] sm:$0xff]  ;;  %v920_v7 = vld [vmem:[%s3635_s13 + $0x3c8] sm:$0xff] }
 0x1de   : > { %v1368_v24 = vadd.f32 %v1367_v40, %v1366_v3  ;;  %v1359_v10 = vadd.f32 %v1358_v44, %v1357_v52  ;;  %v1176_v3 = vld [vmem:[%s3635_s13 + $0x1e8] sm:$0xff]  ;;  %v1175_v52 = vld [vmem:[%s3635_s13 + $0x1e0] sm:$0xff]  ;;  %v595_v44 = vadd.f32 %v594_v43, %v534_v49  ;;  %v591_v46 = vrot.slane %v590_v25, 1 }
 0x1df   : > { %v4044_v9 = vpop.permute.xlu1 %1029  ;;  %v4046_v34 = vpop.permute.xlu0 %1281 }
 0x1e0   : > { %v1369_v61 = vrot.slane %v1368_v24, 2  ;;  %v1360_v29 = vrot.slane %v1359_v10, 2 }
 0x1e2   : > { %v1370_v13 = vadd.f32 %v1369_v61, %v1368_v24  ;;  %v1361_v2 = vadd.f32 %v1360_v29, %v1359_v10  ;;  %v1336_v24 = vmul.f32 %v4004_v26, %v1176_v3  ;;  %v1335_v10 = vmul.f32 %v4006_v51, %v1175_v52  ;;  %v916_v51 = vld [vmem:[%s3635_s13 + $0x348] sm:$0xff] }
 0x1e3   : > { %v4052_v8 = vpop.permute.xlu1 %1269  ;;  %v1242_v37 = vpop.permute.xlu0 %1241  ;;  %v596_v26 = vrot.slane %v595_v44, 4 }
 0x1e4   : > { %v1371_v41 = vrot.slane %v1370_v13, 1  ;;  %v1362_v42 = vrot.slane %v1361_v2, 1  ;;  %v1334_v21 = vmul.f32 %v1242_v37, %v1174_v56  ;;  %v1382_v56 = vadd.f32 %v1336_v24, %v1335_v10 }
 0x1e5   : > { %v4082_v32 = vadd.f32 %v596_v26, %v595_v44  ;;  %v1183_v26 = vld [vmem:[%s3635_s13 + $0x2e0] sm:$0xff] }
 0x1e6   : > { %v1372_v45 = vadd.f32 %v1371_v41, %v1370_v13  ;;  %v1363_v22 = vadd.f32 %v1362_v42, %v1361_v2  ;;  %v1375_v28 = vadd.f32 %v1374_v53, %v1334_v21  ;;  %v1180_v13 = vld [vmem:[%s3635_s13 + $0x268] sm:$0xff]  ;;  %v1383_v53 = vadd.f32 %v1382_v56, %v1337_v59  ;;  %v917_v41 = vld [vmem:[%s3635_s13 + $0x350] sm:$0xff] }
 0x1e7   : > { %v4059_v16 = vpop.permute.xlu1 %1297  ;;  %v4061_v31 = vpop.permute.xlu0 %1293  ;;  %v1181_v42 = vld [vmem:[%s3635_s13 + $0x270] sm:$0xff] }
 0x1e8   : > { %v1428_v48 = vadd.f32 %v1372_v45, %v3979_v20  ;;  %v1427_v5 = vadd.f32 %v1363_v22, %v3971_v14  ;;  %v1376_v40 = vrot.slane %v1375_v28, 4  ;;  %v1129_v14 = vadd.f32 %v4000_v39, %v1073_v30 }
 0x1e9   : > { %v1076_v45 = vmul.f32 %v4008_v18, %v916_v51  ;;  %v1075_v22 = vmul.f32 %v4010_v57, %v915_v35  ;;  %v1341_v18 = vmul.f32 %v4052_v8, %v1181_v42  ;;  %v592_v8 = vadd.f32 %v591_v46, %v590_v25  ;;  %v1184_v51 = vld [vmem:[%s3635_s13 + $0x2e8] sm:$0xff]  ;;  %v1187_v25 = vld [vmem:[%s3635_s13 + $0x360] sm:$0xff] }
 0x1ea   : > { %v1445_v17 = vsel %vm1444_vm0, %v1428_v48, %v1427_v5  ;;  %v1377_v62 = vadd.f32 %v1376_v40, %v1375_v28  ;;  %v1340_v28 = vmul.f32 %v4018_v12, %v1180_v13  ;;  %v868_v48 = vrot.slane %v3902_v60, 4  ;;  %v1188_v35 = vld [vmem:[%s3635_s13 + $0x368] sm:$0xff] }
 0x1eb   : > { %v4070_v36 = vpop.permute.xlu1 %1045  ;;  %v1018_v20 = vpop.permute.xlu0 %1017  ;;  %v1339_v5 = vmul.f32 %v4012_v58, %v1179_v6  ;;  %v1077_v40 = vmul.f32 %v4044_v9, %v917_v41  ;;  %v864_v12 = vadd.f32 %v863_v47, %v862_v23  ;;  %v1137_v10 = vadd.f32 %v1076_v45, %v1075_v22  ;;  %v1182_v9 = vld [vmem:[%s3635_s13 + $0x278] sm:$0xff]  ;;  %v921_v23 = vld [vmem:[%s3635_s13 + $0x3d0] sm:$0xff] }
 0x1ec   : > { %v1378_v61 = vrot.slane %v1377_v62, 2  ;;  %v1074_v29 = vmul.f32 %v1018_v20, %v914_v38  ;;  %v1080_v20 = vmul.f32 %v4026_v50, %v920_v7  ;;  %v1079_v58 = vmul.f32 %v4028_v15, %v919_v0  ;;  %v1185_v41 = vld [vmem:[%s3635_s13 + $0x2f0] sm:$0xff]  ;;  %v922_v45 = vld [vmem:[%s3635_s13 + $0x3d8] sm:$0xff]  ;;  %v1191_v0 = vld [vmem:[%s3635_s13 + $0x3e0] sm:$0xff] }
 0x1ed   : > { %v869_v46 = vadd.f32 %v868_v48, %v3902_v60  ;;  %v888_v6 = vadd.f32 %v864_v12, %v592_v8  ;;  %v1343_v22 = vmul.f32 %v4035_v55, %v1183_v26  ;;  %v1348_v7 = vmul.f32 %v4059_v16, %v1188_v35 }
 0x1ee   : > { %v1379_v2 = vadd.f32 %v1378_v61, %v1377_v62  ;;  %v1130_v4 = vadd.f32 %v1129_v14, %v1074_v29  ;;  %v1391_v62 = vadd.f32 %v1340_v28, %v1339_v5  ;;  %v918_v14 = vld [vmem:[%s3635_s13 + $0x358] sm:$0xff]  ;;  %v598_v29 = vrot.slane %v4082_v32, 2 }
 0x1ef   : > { %v4077_v37 = vpop.permute.xlu1 %1285  ;;  %v1258_v39 = vpop.permute.xlu0 %1257  ;;  %v1146_v47 = vadd.f32 %v1080_v20, %v1079_v58  ;;  %v1344_v28 = vmul.f32 %v4046_v34, %v1184_v51  ;;  %v1347_v60 = vmul.f32 %v4061_v31, %v1187_v25  ;;  %v1193_v34 = vld [vmem:[%s3635_s13 + $0x3f0] sm:$0xff] }
 0x1f0   : > { %v1380_v21 = vrot.slane %v1379_v2, 1  ;;  %v1131_v49 = vrot.slane %v1130_v4, 4  ;;  %v1338_v43 = vmul.f32 %v1258_v39, %v1178_v63  ;;  %v1138_v63 = vadd.f32 %v1137_v10, %v1077_v40  ;;  %v1189_v40 = vld [vmem:[%s3635_s13 + $0x370] sm:$0xff]  ;;  %v1186_v10 = vld [vmem:[%s3635_s13 + $0x2f8] sm:$0xff] }
 0x1f1   : > { %v1392_v56 = vadd.f32 %v1391_v62, %v1341_v18  ;;  %v1081_v39 = vmul.f32 %v4070_v36, %v921_v23  ;;  %v1345_v55 = vmul.f32 %v4077_v37, %v1185_v41  ;;  %v870_v62 = vrot.slane %v869_v46, 2 }
 0x1f2   : > { %v1381_v3 = vadd.f32 %v1380_v21, %v1379_v2  ;;  %v1132_v52 = vadd.f32 %v1131_v49, %v1130_v4  ;;  %v1384_v30 = vadd.f32 %v1383_v53, %v1338_v43  ;;  %v1192_v21 = vld [vmem:[%s3635_s13 + $0x3e8] sm:$0xff]  ;;  %v1400_v20 = vadd.f32 %v1344_v28, %v1343_v22 }
 0x1f3   : > { %v1314_v57 = vpop.permute.xlu1 %1313  ;;  %v1310_v44 = vpop.permute.xlu0 %1309  ;;  %v1147_v18 = vadd.f32 %v1146_v47, %v1081_v39  ;;  %v1409_v23 = vadd.f32 %v1348_v7, %v1347_v60  ;;  %v871_v25 = vadd.f32 %v870_v62, %v869_v46  ;;  %v599_v41 = vadd.f32 %v598_v29, %v4082_v32 }
 0x1f4   : > { %v1429_v54 = vadd.f32 %v1381_v3, %v3986_v27  ;;  %v1133_v38 = vrot.slane %v1132_v52, 2  ;;  %v1385_v24 = vrot.slane %v1384_v30, 4  ;;  %v1352_v12 = vmul.f32 %v1314_v57, %v1192_v21 }
 0x1f5   : > { %v1351_v16 = vmul.f32 %v1310_v44, %v1191_v0  ;;  %v872_v28 = vrot.slane %v871_v25, 1 }
 0x1f6   : > { %v4099_v59 = vsel %vm1446_vm1, %v1429_v54, %v1445_v17  ;;  %v1134_v61 = vadd.f32 %v1133_v38, %v1132_v52  ;;  %v1386_v27 = vadd.f32 %v1385_v24, %v1384_v30 }
 0x1f7   : > { %v1274_v50 = vpop.permute.xlu1 %1273  ;;  %v1034_v15 = vpop.permute.xlu0 %1033  ;;  %v1418_v51 = vadd.f32 %v1352_v12, %v1351_v16 }
 0x1f8   : > { %v1135_v13 = vrot.slane %v1134_v61, 1  ;;  %v1387_v17 = vrot.slane %v1386_v27, 2  ;;  %v1342_v2 = vmul.f32 %v1274_v50, %v1182_v9  ;;  %v1078_v4 = vmul.f32 %v1034_v15, %v918_v14  ;;  %v1190_v50 = vld [vmem:[%s3635_s13 + $0x378] sm:$0xff] }
 0x1fa   : > { %v1136_v53 = vadd.f32 %v1135_v13, %v1134_v61  ;;  %v1388_v42 = vadd.f32 %v1387_v17, %v1386_v27  ;;  %v1393_v49 = vadd.f32 %v1392_v56, %v1342_v2  ;;  %v1139_v43 = vadd.f32 %v1138_v63, %v1078_v4  ;;  %v1194_v56 = vld [vmem:[%s3635_s13 + $0x3f8] sm:$0xff] }
 0x1fb   : > { %v1050_v36 = vpop.permute.xlu1 %1049  ;;  %v1302_v3 = vpop.permute.xlu0 %1301  ;;  %v1401_v27 = vadd.f32 %v1400_v20, %v1345_v55 }
 0x1fc   : > { %v4117_v52 = vadd.f32 %v1136_v53, %v888_v6  ;;  %v1389_v30 = vrot.slane %v1388_v42, 1  ;;  %v1394_v48 = vrot.slane %v1393_v49, 4  ;;  %v1140_v5 = vrot.slane %v1139_v43, 4 }
 0x1fd   : > { %v1082_v54 = vmul.f32 %v1050_v36, %v922_v45  ;;  %v1349_v9 = vmul.f32 %v1302_v3, %v1189_v40  ;;  %v600_v36 = vrot.slane %v599_v41, 1 }
 0x1fe   : > { %v1390_v38 = vadd.f32 %v1389_v30, %v1388_v42  ;;  %v1395_v24 = vadd.f32 %v1394_v48, %v1393_v49  ;;  %v1141_v31 = vadd.f32 %v1140_v5, %v1139_v43 }
 0x1ff   : > { %v1148_v58 = vadd.f32 %v1147_v18, %v1082_v54  ;;  %v1318_v14 = vpop.permute.xlu1 %1317  ;;  %v1290_v8 = vpop.permute.xlu0 %1289  ;;  %v1410_v17 = vadd.f32 %v1409_v23, %v1349_v9  ;;  %v873_v18 = vadd.f32 %v872_v28, %v871_v25  ;;  %v601_v54 = vadd.f32 %v600_v36, %v599_v41 }
 0x200   : > { %v1430_v61 = vadd.f32 %v1390_v38, %v3994_v19  ;;  %v1396_v37 = vrot.slane %v1395_v24, 2  ;;  %v1353_v57 = vmul.f32 %v1318_v14, %v1193_v34  ;;  %v1142_v26 = vrot.slane %v1141_v31, 2 }
 0x201   : > { %v1149_v63 = vrot.slane %v1148_v58, 4  ;;  %v1346_v44 = vmul.f32 %v1290_v8, %v1186_v10  ;;  %v889_v10 = vadd.f32 %v873_v18, %v601_v54 }
 0x202   : > { %v1449_v15 = vsel %vm1448_vm2, %v1430_v61, %v4099_v59  ;;  %v1397_v35 = vadd.f32 %v1396_v37, %v1395_v24  ;;  %v1419_v39 = vadd.f32 %v1418_v51, %v1353_v57  ;;  %v1143_v42 = vadd.f32 %v1142_v26, %v1141_v31 }
 0x203   : > { %v1150_v13 = vadd.f32 %v1149_v63, %v1148_v58  ;;  %v1402_v2 = vadd.f32 %v1401_v27, %v1346_v44  ;;  %v1322_v4 = vpop.permute.xlu1 %1321  ;;  %v1306_v47 = vpop.permute.xlu0 %1305  ;;  %v1435_v27 = vld [vmem:[#allocation2] sm:$0xff] }
 0x204   : > { %v1398_v19 = vrot.slane %v1397_v35, 1  ;;  %v1354_v6 = vmul.f32 %v1322_v4, %v1194_v56  ;;  %v1350_v53 = vmul.f32 %v1306_v47, %v1190_v50  ;;  %v1144_v3 = vrot.slane %v1143_v42, 1 }
 0x205   : > { %v1151_v21 = vrot.slane %v1150_v13, 2  ;;  %v1403_v49 = vrot.slane %v1402_v2, 4 }
 0x206   : > { %v1399_v59 = vadd.f32 %v1398_v19, %v1397_v35  ;;  %v1420_v43 = vadd.f32 %v1419_v39, %v1354_v6  ;;  %v1411_v45 = vadd.f32 %v1410_v17, %v1350_v53  ;;  %v1145_v38 = vadd.f32 %v1144_v3, %v1143_v42 }
 0x207   : > { %v1152_v46 = vadd.f32 %v1151_v21, %v1150_v13  ;;  %v1404_v22 = vadd.f32 %v1403_v49, %v1402_v2 }
 0x208   : > { %v1431_v7 = vadd.f32 %v1399_v59, %v4002_v33  ;;  %v1421_v60 = vrot.slane %v1420_v43, 4  ;;  %v1412_v0 = vrot.slane %v1411_v45, 4  ;;  %v1161_v9 = vadd.f32 %v1145_v38, %v889_v10 }
 0x209   : > { %v1405_v30 = vrot.slane %v1404_v22, 2  ;;  %v1153_v5 = vrot.slane %v1152_v46, 1 }
 0x20a   : > { %v1451_v48 = vsel %vm1450_vm3, %v1431_v7, %v1449_v15  ;;  %v1422_v32 = vadd.f32 %v1421_v60, %v1420_v43  ;;  %v1413_v29 = vadd.f32 %v1412_v0, %v1411_v45 }
 0x20b   : > { %v1406_v40 = vadd.f32 %v1405_v30, %v1404_v22  ;;  %v1154_v16 = vadd.f32 %v1153_v5, %v1152_v46 }
 0x20c   : > { %v1423_v55 = vrot.slane %v1422_v32, 2  ;;  %v1414_v12 = vrot.slane %v1413_v29, 2 }
 0x20d   : > { %v1407_v34 = vrot.slane %v1406_v40, 1  ;;  %v1162_v14 = vadd.f32 %v1154_v16, %v3957_v11 }
 0x20e   : > { %v1424_v24 = vadd.f32 %v1423_v55, %v1422_v32  ;;  %v1415_v31 = vadd.f32 %v1414_v12, %v1413_v29 }
 0x20f   : > { %v1408_v33 = vadd.f32 %v1407_v34, %v1406_v40 }
 0x210   : > { %v1425_v62 = vrot.slane %v1424_v24, 1  ;;  %v1416_v20 = vrot.slane %v1415_v31, 1 }
 0x211   : > { %v1432_v58 = vadd.f32 %v1408_v33, %v4117_v52 }
 0x212   : > { %v1426_v8 = vadd.f32 %v1425_v62, %v1424_v24  ;;  %v1417_v23 = vadd.f32 %v1416_v20, %v1415_v31 }
 0x213   : > { %v1453_v61 = vsel %vm1452_vm4, %v1432_v58, %v1451_v48 }
 0x214   : > { %v1434_v37 = vadd.f32 %v1426_v8, %v1162_v14  ;;  %v1433_v57 = vadd.f32 %v1417_v23, %v1161_v9 }
 0x216   : > { %v1455_v26 = vsel %vm1454_vm5, %v1433_v57, %v1453_v61 }
 0x217   : > { %v1457_v63 = vsel %vm1456_vm6, %v1434_v37, %v1455_v26 }
 0x218   : > { %v1459_v44 = vadd.f32 %v1457_v63, %v1435_v27 }
 0x21a   : > { %1460 = vst [vmem:[#allocation2] sm:$0xff] %v1459_v44 }
 0x21b PF: > { %v1499_v56 = vlaneseq  ;;  %v3409_v52 = vmov 1966171168   ;;  %v1890_v4 = vld [vmem:[%s3635_s13 + $0x28] sm:$0xff]  ;;  %v1462_v47 = vld [vmem:[%s3635_s13] sm:$0xff]  ;;  %v1464_v46 = vld [vmem:[%s3635_s13 + $0x10] sm:$0xff]  ;;  %vm4912_vm7 = vcmask 130112  }
 0x21c   : > { %v1497_v11 = vunpack.c.l.s4 %v3409_v52  ;;  %v1463_v53 = vld [vmem:[%s3635_s13 + $0x8] sm:$0xff]  ;;  %v1466_v41 = vld [vmem:[%s3635_s13 + $0x80] sm:$0xff]  ;;  %v1468_v3 = vld [vmem:[%s3635_s13 + $0x90] sm:$0xff]  ;;  %vm1730_vm8 = vcmask 195712   ;;  %vm2059_vm9 = vcmask 392512   ;;  %vm1737_vm10 = vcmask 261312  }
 0x21d   : > { %v4135_v50 = vshrl.u32 %v1499_v56, 7  ;;  %v1467_v22 = vld [vmem:[%s3635_s13 + $0x88] sm:$0xff]  ;;  %v1889_v36 = vld [vmem:[%s3635_s13 + $0x20] sm:$0xff]  ;;  %v1465_v62 = vld [vmem:[%s3635_s13 + $0x18] sm:$0xff]  ;;  %vm1872_vm11 = vcmask 1041409   ;;  %vm2066_vm12 = vcmask 458112  }
 0x21e   : > { %v1498_v15 = vunpack.c.0.s8 %v1497_v11  ;;  %v1470_v29 = vld [vmem:[%s3635_s13 + $0x100] sm:$0xff]  ;;  %v1471_v40 = vld [vmem:[%s3635_s13 + $0x108] sm:$0xff]  ;;  %v1469_v20 = vld [vmem:[%s3635_s13 + $0x98] sm:$0xff]  ;;  %vm2388_vm13 = vcmask 654912   ;;  %vm1874_vm14 = vcmask 1042434   ;;  %vm2073_vm15 = vcmask 523712  }
 0x21f   : > { %v4139_v13 = vsub.s32 0, %v4135_v50  ;;  %v1893_v38 = vld [vmem:[%s3635_s13 + $0xa0] sm:$0xff]  ;;  %v1894_v16 = vld [vmem:[%s3635_s13 + $0xa8] sm:$0xff]  ;;  %v1472_v8 = vld [vmem:[%s3635_s13 + $0x110] sm:$0xff]  ;;  %vm2395_vm0 = vcmask 720512   ;;  %vm2717_vm1 = vcmask 917312  }
 0x220   : > { %v1501_v35 = vsub.s32 %v1498_v15, %v4135_v50  ;;  %v1474_v23 = vld [vmem:[%s3635_s13 + $0x180] sm:$0xff]  ;;  %v1475_v27 = vld [vmem:[%s3635_s13 + $0x188] sm:$0xff]  ;;  %v1891_v26 = vld [vmem:[%s3635_s13 + $0x30] sm:$0xff]  ;;  %vm1876_vm2 = vcmask 1043459   ;;  %vm2402_vm3 = vcmask 786112   ;;  %vm4913_vm4 = vcmask 982912  }
 0x221   : > { %v1461_v51 = vld [vmem:[#allocation2] sm:$0xff]  ;;  %v1897_v15 = vld [vmem:[%s3635_s13 + $0x120] sm:$0xff]  ;;  %vm1878_vm5 = vcmask 1044484   ;;  %vm2731_vm6 = vcmask 1048512   ;;  %p3053_p8 = scmp.ne.s32.totalorder %s3393_s21, 2 }
 0x222   : > { %v1502_v25 = vrot.slane %v1461_v51, %v1501_v35  ;;  %v1495_v39 = vcombine.high %v1461_v51, %v1461_v51  ;;  %v1895_v11 = vld [vmem:[%s3635_s13 + $0xb0] sm:$0xff] }
 0x224   : > { %v1518_v17 = vrot.slane %v1502_v25, %v1501_v35  ;;  %v1510_v2 = vcombine.high %v1502_v25, %v1502_v25  ;;  %v1509_v45 = vrot.slane %v1495_v39, %v1501_v35  ;;  %v1898_v25 = vld [vmem:[%s3635_s13 + $0x128] sm:$0xff]  ;;  %v2222_v39 = vld [vmem:[%s3635_s13 + $0xc0] sm:$0xff] }
 0x226   : > { %v4144_v19 = vrot.slane %v1518_v17, %v4139_v13  ;;  %v1532_v6 = vrot.slane %v1510_v2, %v1501_v35  ;;  %v1511_v28 = vcombine.high %v1509_v45, %v1509_v45  ;;  %v1540_v0 = vcombine.high %v1518_v17, %v1518_v17  ;;  %v2218_v17 = vld [vmem:[%s3635_s13 + $0x40] sm:$0xff] }
 0x227   : > { %v1525_v18 = vrot.slane %v1509_v45, %v1501_v35  ;;  %v1476_v45 = vld [vmem:[%s3635_s13 + $0x190] sm:$0xff] }
 0x228   : > { %v1922_v42 = vmul.f32 %v1890_v4, %v4144_v19  ;;  %v1584_v21 = vmul.f32 %v4144_v19, %v1462_v47  ;;  %v4151_v49 = vrot.slane %v1532_v6, %v4139_v13  ;;  %v1585_v59 = vmul.f32 %v4144_v19, %v1463_v53  ;;  %v2219_v47 = vld [vmem:[%s3635_s13 + $0x48] sm:$0xff] }
 0x229   : > { %v1586_v7 = vmul.f32 %v4144_v19, %v1464_v46  ;;  %v1539_v30 = vrot.slane %v1511_v28, %v1501_v35  ;;  %v1921_v48 = vmul.f32 %v1889_v36, %v4144_v19  ;;  %v4164_v32 = vrot.slane %v1540_v0, %v4139_v13  ;;  %v1478_v46 = vld [vmem:[%s3635_s13 + $0x200] sm:$0xff]  ;;  %v1896_v36 = vld [vmem:[%s3635_s13 + $0xb8] sm:$0xff] }
 0x22a   : > { %1955 = vadd.xlane.f32.xlu1 %v1922_v42  ;;  %1616 = vadd.xlane.f32.xlu0 %v1584_v21  ;;  %v1588_v43 = vmul.f32 %v4151_v49, %v1466_v41  ;;  %v1589_v60 = vmul.f32 %v4151_v49, %v1467_v22  ;;  %v1590_v5 = vmul.f32 %v4151_v49, %v1468_v3  ;;  %v2223_v41 = vld [vmem:[%s3635_s13 + $0xc8] sm:$0xff]  ;;  %v1473_v42 = vld [vmem:[%s3635_s13 + $0x118] sm:$0xff]  ;;  %v1899_v3 = vld [vmem:[%s3635_s13 + $0x130] sm:$0xff] }
 0x22b   : > { %v4169_v55 = vrot.slane %v1539_v30, %v4139_v13  ;;  %v1541_v12 = vcombine.high %v1525_v18, %v1525_v18  ;;  %v1592_v54 = vmul.f32 %v4164_v32, %v1470_v29  ;;  %v1593_v34 = vmul.f32 %v4164_v32, %v1471_v40  ;;  %v1902_v29 = vld [vmem:[%s3635_s13 + $0x1a8] sm:$0xff] }
 0x22c   : > { %v1925_v31 = vmul.f32 %v1893_v38, %v4151_v49  ;;  %v1926_v33 = vmul.f32 %v1894_v16, %v4151_v49  ;;  %v1542_v10 = vcombine.high %v1532_v6, %v1532_v6  ;;  %v1587_v58 = vmul.f32 %v4144_v19, %v1465_v62  ;;  %v2226_v16 = vld [vmem:[%s3635_s13 + $0x140] sm:$0xff] }
 0x22d   : > { %v4176_v24 = vrot.slane %v1541_v12, %v4139_v13  ;;  %v1591_v9 = vmul.f32 %v4151_v49, %v1469_v20  ;;  %v1543_v61 = vcombine.high %v1539_v30, %v1539_v30  ;;  %v1594_v37 = vmul.f32 %v4164_v32, %v1472_v8  ;;  %v2220_v12 = vld [vmem:[%s3635_s13 + $0x50] sm:$0xff]  ;;  %v2547_v62 = vld [vmem:[%s3635_s13 + $0x60] sm:$0xff]  ;;  %v2548_v20 = vld [vmem:[%s3635_s13 + $0x68] sm:$0xff] }
 0x22e   : > { %1618 = vadd.xlane.f32.xlu0 %v1585_v59  ;;  %1624 = vadd.xlane.f32.xlu1 %v1588_v43  ;;  %v4185_v14 = vrot.slane %v1542_v10, %v4139_v13  ;;  %v1923_v52 = vmul.f32 %v1891_v26, %v4144_v19  ;;  %v1927_v51 = vmul.f32 %v1895_v11, %v4151_v49  ;;  %v2551_v8 = vld [vmem:[%s3635_s13 + $0xe0] sm:$0xff] }
 0x22f   : > { %v4194_v63 = vrot.slane %v1543_v61, %v4139_v13  ;;  %v1929_v35 = vmul.f32 %v1897_v15, %v4164_v32  ;;  %v1930_v2 = vmul.f32 %v1898_v25, %v4164_v32  ;;  %v2250_v4 = vmul.f32 %v2218_v17, %v4144_v19  ;;  %v1482_v11 = vld [vmem:[%s3635_s13 + $0x280] sm:$0xff]  ;;  %v1900_v25 = vld [vmem:[%s3635_s13 + $0x138] sm:$0xff] }
 0x230   : > { %v1596_v57 = vmul.f32 %v4185_v14, %v1474_v23  ;;  %v1597_v44 = vmul.f32 %v4185_v14, %v1475_v27  ;;  %v2251_v6 = vmul.f32 %v2219_v47, %v4144_v19  ;;  %v2254_v53 = vmul.f32 %v2222_v39, %v4151_v49  ;;  %v2552_v23 = vld [vmem:[%s3635_s13 + $0xe8] sm:$0xff]  ;;  %v1480_v27 = vld [vmem:[%s3635_s13 + $0x210] sm:$0xff]  ;;  %v1905_v47 = vld [vmem:[%s3635_s13 + $0x220] sm:$0xff] }
 0x231   : > { %v2255_v21 = vmul.f32 %v2223_v41, %v4151_v49  ;;  %v1595_v59 = vmul.f32 %v4164_v32, %v1473_v42  ;;  %v4215_v43 = vrot.slane %v1525_v18, %v4139_v13  ;;  %v1598_v22 = vmul.f32 %v4185_v14, %v1476_v45  ;;  %v2221_v41 = vld [vmem:[%s3635_s13 + $0x58] sm:$0xff]  ;;  %v2228_v45 = vld [vmem:[%s3635_s13 + $0x150] sm:$0xff] }
 0x232   : > { %1620 = vadd.xlane.f32.xlu0 %v1586_v7  ;;  %1626 = vadd.xlane.f32.xlu1 %v1589_v60  ;;  %v1479_v7 = vld [vmem:[%s3635_s13 + $0x208] sm:$0xff]  ;;  %v1892_v60 = vld [vmem:[%s3635_s13 + $0x38] sm:$0xff]  ;;  %v1928_v30 = vmul.f32 %v1896_v36, %v4151_v49  ;;  %v1934_v18 = vmul.f32 %v1902_v29, %v4185_v14  ;;  %v2583_v61 = vmul.f32 %v2551_v8, %v4151_v49  ;;  %v2553_v36 = vld [vmem:[%s3635_s13 + $0xf0] sm:$0xff] }
 0x233   : > { %v1600_v28 = vmul.f32 %v4215_v43, %v1478_v46  ;;  %v1601_v0 = vmul.f32 %v4215_v43, %v1479_v7  ;;  %v1924_v13 = vmul.f32 %v1892_v60, %v4144_v19  ;;  %v2231_v7 = vld [vmem:[%s3635_s13 + $0x1c8] sm:$0xff] }
 0x234   : > { %v1910_v8 = vld [vmem:[%s3635_s13 + $0x2a8] sm:$0xff] }
 0x236   : > { %1953 = vadd.xlane.f32.xlu0 %v1921_v48  ;;  %1628 = vadd.xlane.f32.xlu1 %v1590_v5  ;;  %v1931_v48 = vmul.f32 %v1899_v3, %v4164_v32  ;;  %v1901_v5 = vld [vmem:[%s3635_s13 + $0x1a0] sm:$0xff] }
 0x237   : > { %v1933_v40 = vmul.f32 %v1901_v5, %v4185_v14  ;;  %v2556_v5 = vld [vmem:[%s3635_s13 + $0x168] sm:$0xff] }
 0x23a   : > { %1632 = vadd.xlane.f32.xlu0 %v1592_v54  ;;  %1634 = vadd.xlane.f32.xlu1 %v1593_v34  ;;  %v2224_v54 = vld [vmem:[%s3635_s13 + $0xd0] sm:$0xff]  ;;  %v2252_v34 = vmul.f32 %v2220_v12, %v4144_v19 }
 0x23b   : > { %v2256_v38 = vmul.f32 %v2224_v54, %v4151_v49  ;;  %v1484_v12 = vld [vmem:[%s3635_s13 + $0x290] sm:$0xff] }
 0x23e   : > { %1961 = vadd.xlane.f32.xlu0 %v1925_v31  ;;  %1963 = vadd.xlane.f32.xlu1 %v1926_v33  ;;  %v2227_v31 = vld [vmem:[%s3635_s13 + $0x148] sm:$0xff]  ;;  %v2258_v33 = vmul.f32 %v2226_v16, %v4164_v32 }
 0x23f   : > { %v2259_v10 = vmul.f32 %v2227_v31, %v4164_v32  ;;  %v1487_v16 = vld [vmem:[%s3635_s13 + $0x308] sm:$0xff] }
 0x242   : > { %1622 = vadd.xlane.f32.xlu0 %v1587_v58  ;;  %1630 = vadd.xlane.f32.xlu1 %v1591_v9  ;;  %v2579_v58 = vmul.f32 %v2547_v62, %v4144_v19  ;;  %v2580_v9 = vmul.f32 %v2548_v20, %v4144_v19  ;;  %v1907_v62 = vld [vmem:[%s3635_s13 + $0x230] sm:$0xff] }
 0x246   : > { %1636 = vadd.xlane.f32.xlu0 %v1594_v37  ;;  %1640 = vadd.xlane.f32.xlu1 %v1596_v57  ;;  %v2584_v37 = vmul.f32 %v2552_v23, %v4151_v49  ;;  %v1477_v57 = vld [vmem:[%s3635_s13 + $0x198] sm:$0xff] }
 0x247   : > { %v1599_v26 = vmul.f32 %v4185_v14, %v1477_v57  ;;  %v2232_v57 = vld [vmem:[%s3635_s13 + $0x1d0] sm:$0xff] }
 0x24a   : > { %1642 = vadd.xlane.f32.xlu0 %v1597_v44  ;;  %1957 = vadd.xlane.f32.xlu1 %v1923_v52  ;;  %v1602_v44 = vmul.f32 %v4215_v43, %v1480_v27  ;;  %v1483_v52 = vld [vmem:[%s3635_s13 + $0x288] sm:$0xff]  ;;  %v4304_v27 = vand.u32 127, %v1499_v56  ;;  %v2557_v56 = vld [vmem:[%s3635_s13 + $0x170] sm:$0xff] }
 0x24b   : > { %v1605_v15 = vmul.f32 %v4169_v55, %v1483_v52  ;;  %v2550_v52 = vld [vmem:[%s3635_s13 + $0x78] sm:$0xff] }
 0x24e   : > { %1965 = vadd.xlane.f32.xlu0 %v1927_v51  ;;  %1969 = vadd.xlane.f32.xlu1 %v1929_v35  ;;  %v1604_v51 = vmul.f32 %v4169_v55, %v1482_v11  ;;  %v1903_v35 = vld [vmem:[%s3635_s13 + $0x1b0] sm:$0xff]  ;;  %v2235_v11 = vld [vmem:[%s3635_s13 + $0x248] sm:$0xff] }
 0x24f   : > { %v1935_v17 = vmul.f32 %v1903_v35, %v4185_v14  ;;  %v2267_v35 = vmul.f32 %v2235_v11, %v4215_v43  ;;  %v1914_v11 = vld [vmem:[%s3635_s13 + $0x328] sm:$0xff] }
 0x252   : > { %1971 = vadd.xlane.f32.xlu0 %v1930_v2  ;;  %2282 = vadd.xlane.f32.xlu1 %v2250_v4  ;;  %v1932_v2 = vmul.f32 %v1900_v25, %v4164_v32  ;;  %v1906_v4 = vld [vmem:[%s3635_s13 + $0x228] sm:$0xff]  ;;  %v2554_v25 = vld [vmem:[%s3635_s13 + $0xf8] sm:$0xff] }
 0x253   : > { %v1938_v39 = vmul.f32 %v1906_v4, %v4215_v43  ;;  %v1718_v4 = vadd.s32 4294967288, %v4304_v27 }
 0x256   : > { %2284 = vadd.xlane.f32.xlu0 %v2251_v6  ;;  %2290 = vadd.xlane.f32.xlu1 %v2254_v53  ;;  %v1937_v6 = vmul.f32 %v1905_v47, %v4215_v43  ;;  %v2225_v53 = vld [vmem:[%s3635_s13 + $0xd8] sm:$0xff]  ;;  %v2589_v47 = vmul.f32 %v2557_v56, %v4164_v32  ;;  %v1732_v56 = vadd.s32 4294967272, %v4304_v27 }
 0x257   : > { %v2257_v42 = vmul.f32 %v2225_v53, %v4151_v49  ;;  %v2560_v53 = vld [vmem:[%s3635_s13 + $0x1e8] sm:$0xff] }
 0x25a   : > { %2292 = vadd.xlane.f32.xlu0 %v2255_v21  ;;  %1638 = vadd.xlane.f32.xlu1 %v1595_v59  ;;  %v2253_v21 = vmul.f32 %v2221_v41, %v4144_v19  ;;  %v2230_v59 = vld [vmem:[%s3635_s13 + $0x1c0] sm:$0xff] }
 0x25b   : > { %v2262_v46 = vmul.f32 %v2230_v59, %v4185_v14  ;;  %v2559_v41 = vld [vmem:[%s3635_s13 + $0x1e0] sm:$0xff]  ;;  %v4330_v59 = vsub.s32 %v1718_v4, %v4135_v50  ;;  %v1946_v4 = vmul.f32 %v1914_v11, %v4176_v24 }
 0x25e   : > { %1644 = vadd.xlane.f32.xlu0 %v1598_v22  ;;  %1648 = vadd.xlane.f32.xlu1 %v1600_v28  ;;  %v2260_v22 = vmul.f32 %v2228_v45, %v4164_v32  ;;  %v2549_v28 = vld [vmem:[%s3635_s13 + $0x70] sm:$0xff]  ;;  %v1725_v45 = vadd.s32 4294967280, %v4304_v27 }
 0x25f   : > { %v2581_v60 = vmul.f32 %v2549_v28, %v4144_v19 }
 0x262   : > { %1650 = vadd.xlane.f32.xlu0 %v1601_v0  ;;  %1959 = vadd.xlane.f32.xlu1 %v1924_v13  ;;  %v2263_v0 = vmul.f32 %v2231_v7, %v4185_v14  ;;  %v2555_v13 = vld [vmem:[%s3635_s13 + $0x160] sm:$0xff]  ;;  %v1488_v7 = vld [vmem:[%s3635_s13 + $0x310] sm:$0xff] }
 0x263   : > { %v2587_v3 = vmul.f32 %v2555_v13, %v4164_v32 }
 0x266   : > { %1967 = vadd.xlane.f32.xlu0 %v1928_v30  ;;  %1973 = vadd.xlane.f32.xlu1 %v1931_v48  ;;  %v2585_v30 = vmul.f32 %v2553_v36, %v4151_v49  ;;  %v1481_v48 = vld [vmem:[%s3635_s13 + $0x218] sm:$0xff]  ;;  %v4340_v36 = vsub.s32 %v1725_v45, %v4135_v50 }
 0x267   : > { %v1603_v29 = vmul.f32 %v4215_v43, %v1481_v48  ;;  %v1610_v48 = vmul.f32 %v4176_v24, %v1488_v7 }
 0x26a   : > { %1977 = vadd.xlane.f32.xlu0 %v1933_v40  ;;  %1979 = vadd.xlane.f32.xlu1 %v1934_v18  ;;  %v2588_v40 = vmul.f32 %v2556_v5, %v4164_v32  ;;  %v1486_v18 = vld [vmem:[%s3635_s13 + $0x300] sm:$0xff] }
 0x26b   : > { %v1608_v54 = vmul.f32 %v4176_v24, %v1486_v18 }
 0x26e   : > { %2286 = vadd.xlane.f32.xlu0 %v2252_v34  ;;  %2294 = vadd.xlane.f32.xlu1 %v2256_v38  ;;  %v1606_v34 = vmul.f32 %v4169_v55, %v1484_v12  ;;  %v1904_v38 = vld [vmem:[%s3635_s13 + $0x1b8] sm:$0xff]  ;;  %v1490_v12 = vld [vmem:[%s3635_s13 + $0x380] sm:$0xff] }
 0x26f   : > { %v1936_v31 = vmul.f32 %v1904_v38, %v4185_v14 }
 0x272   : > { %2298 = vadd.xlane.f32.xlu0 %v2258_v33  ;;  %2300 = vadd.xlane.f32.xlu1 %v2259_v10  ;;  %v1609_v33 = vmul.f32 %v4176_v24, %v1487_v16  ;;  %v1909_v10 = vld [vmem:[%s3635_s13 + $0x2a0] sm:$0xff] }
 0x273   : > { %v1941_v20 = vmul.f32 %v1909_v10, %v4169_v55  ;;  %v1612_v10 = vmul.f32 %v4194_v63, %v1490_v12 }
 0x276   : > { %2611 = vadd.xlane.f32.xlu0 %v2579_v58  ;;  %2613 = vadd.xlane.f32.xlu1 %v2580_v9  ;;  %v1939_v58 = vmul.f32 %v1907_v62, %v4215_v43  ;;  %v2229_v9 = vld [vmem:[%s3635_s13 + $0x158] sm:$0xff]  ;;  %v1911_v62 = vld [vmem:[%s3635_s13 + $0x2b0] sm:$0xff] }
 0x277   : > { %v2261_v23 = vmul.f32 %v2229_v9, %v4164_v32  ;;  %v1908_v9 = vld [vmem:[%s3635_s13 + $0x238] sm:$0xff] }
 0x27a   : > { %2619 = vadd.xlane.f32.xlu0 %v2583_v61  ;;  %2621 = vadd.xlane.f32.xlu1 %v2584_v37  ;;  %v1942_v61 = vmul.f32 %v1910_v8, %v4169_v55  ;;  %v2234_v37 = vld [vmem:[%s3635_s13 + $0x240] sm:$0xff] }
 0x27e   : > { %1646 = vadd.xlane.f32.xlu0 %v1599_v26  ;;  %1652 = vadd.xlane.f32.xlu1 %v1602_v44  ;;  %v2266_v26 = vmul.f32 %v2234_v37, %v4215_v43  ;;  %v2264_v44 = vmul.f32 %v2232_v57, %v4185_v14 }
 0x282   : > { %1658 = vadd.xlane.f32.xlu1 %v1605_v15  ;;  %1656 = vadd.xlane.f32.xlu0 %v1604_v51  ;;  %v2054_v15 = vadd.s32 4294967256, %v4304_v27  ;;  %v2582_v51 = vmul.f32 %v2550_v52, %v4144_v19 }
 0x286   : > { %1981 = vadd.xlane.f32.xlu1 %v1935_v17  ;;  %1975 = vadd.xlane.f32.xlu0 %v1932_v2  ;;  %v4316_v17 = vsub.s32 %v2054_v15, %v4135_v50  ;;  %v4320_v2 = vsub.s32 %v4304_v27, %v4135_v50  ;;  %v1913_v15 = vld [vmem:[%s3635_s13 + $0x320] sm:$0xff] }
 0x28a   : > { %1987 = vadd.xlane.f32.xlu1 %v1938_v39  ;;  %1985 = vadd.xlane.f32.xlu0 %v1937_v6  ;;  %v2586_v39 = vmul.f32 %v2554_v25, %v4151_v49  ;;  %v2591_v49 = vmul.f32 %v2559_v41, %v4185_v14 }
 0x28e   : > { %2296 = vadd.xlane.f32.xlu1 %v2257_v42  ;;  %2288 = vadd.xlane.f32.xlu0 %v2253_v21 }
 0x292   : > { %2306 = vadd.xlane.f32.xlu1 %v2262_v46  ;;  %2302 = vadd.xlane.f32.xlu0 %v2260_v22  ;;  %v2592_v46 = vmul.f32 %v2560_v53, %v4185_v14  ;;  %v2233_v53 = vld [vmem:[%s3635_s13 + $0x1d8] sm:$0xff] }
 0x296   : > { %2615 = vadd.xlane.f32.xlu1 %v2581_v60  ;;  %2308 = vadd.xlane.f32.xlu0 %v2263_v0  ;;  %v1485_v60 = vld [vmem:[%s3635_s13 + $0x298] sm:$0xff] }
 0x297   : > { %v1607_v5 = vmul.f32 %v4169_v55, %v1485_v60  ;;  %v2238_v60 = vld [vmem:[%s3635_s13 + $0x2c0] sm:$0xff] }
 0x29a   : > { %2627 = vadd.xlane.f32.xlu1 %v2587_v3  ;;  %2623 = vadd.xlane.f32.xlu0 %v2585_v30  ;;  %v2049_v3 = vadd.s32 4294967264, %v4304_v27 }
 0x29c   : > { %v4351_v38 = vsub.s32 %v2049_v3, %v4135_v50  ;;  %v2061_v3 = vadd.s32 4294967248, %v4304_v27 }
 0x29e   : > { %1654 = vadd.xlane.f32.xlu1 %v1603_v29  ;;  %2629 = vadd.xlane.f32.xlu0 %v2588_v40  ;;  %v1491_v29 = vld [vmem:[%s3635_s13 + $0x388] sm:$0xff] }
 0x29f   : > { %v1613_v16 = vmul.f32 %v4194_v63, %v1491_v29  ;;  %v2270_v29 = vmul.f32 %v2238_v60, %v4169_v55 }
 0x2a2   : > { %1664 = vadd.xlane.f32.xlu1 %v1608_v54  ;;  %1660 = vadd.xlane.f32.xlu0 %v1606_v34 }
 0x2a6   : > { %1983 = vadd.xlane.f32.xlu1 %v1936_v31  ;;  %1666 = vadd.xlane.f32.xlu0 %v1609_v33 }
 0x2aa   : > { %1993 = vadd.xlane.f32.xlu1 %v1941_v20  ;;  %1989 = vadd.xlane.f32.xlu0 %v1939_v58 }
 0x2ae   : > { %2304 = vadd.xlane.f32.xlu1 %v2261_v23  ;;  %1995 = vadd.xlane.f32.xlu0 %v1942_v61  ;;  %v1943_v61 = vmul.f32 %v1911_v62, %v4169_v55 }
 0x2b2   : > { %2314 = vadd.xlane.f32.xlu1 %v2266_v26  ;;  %2310 = vadd.xlane.f32.xlu0 %v2264_v44  ;;  %v1940_v26 = vmul.f32 %v1908_v9, %v4215_v43 }
 0x2b6   : > { %2617 = vadd.xlane.f32.xlu1 %v2582_v51  ;;  %2316 = vadd.xlane.f32.xlu0 %v2267_v35 }
 0x2b7   : > { %v1956_v19 = vpop.xlane.xlu1 %1955  ;;  %v1617_v6 = vpop.xlane.xlu0 %1616 }
 0x2b8   : > { %v2058_v42 = vrot.slane %v1956_v19, %v4316_v17  ;;  %v1717_v21 = vrot.slane %v1617_v6, %v4320_v2  ;;  %v2236_v6 = vld [vmem:[%s3635_s13 + $0x250] sm:$0xff] }
 0x2ba   : > { %2631 = vadd.xlane.f32.xlu1 %v2589_v47  ;;  %2625 = vadd.xlane.f32.xlu0 %v2586_v39  ;;  %v1945_v47 = vmul.f32 %v1913_v15, %v4176_v24 }
 0x2bb   : > { %v1619_v22 = vpop.xlane.xlu0 %1618  ;;  %v1625_v28 = vpop.xlane.xlu1 %1624 }
 0x2bc   : > { %v1722_v0 = vrot.slane %v1619_v22, %v4330_v59  ;;  %v1742_v13 = vrot.slane %v1625_v28, %v4320_v2  ;;  %v2239_v22 = vld [vmem:[%s3635_s13 + $0x2c8] sm:$0xff] }
 0x2be   : > { %v1724_v30 = vsel %vm4912_vm7, %v1722_v0, %v1717_v21  ;;  %2637 = vadd.xlane.f32.xlu1 %v2592_v46  ;;  %2635 = vadd.xlane.f32.xlu0 %v2591_v49  ;;  %v4380_v21 = vsub.s32 %v1732_v56, %v4135_v50  ;;  %v2268_v46 = vmul.f32 %v2236_v6, %v4215_v43  ;;  %v1489_v56 = vld [vmem:[%s3635_s13 + $0x318] sm:$0xff] }
 0x2bf   : > { %v1621_v40 = vpop.xlane.xlu0 %1620  ;;  %v1627_v18 = vpop.xlane.xlu1 %1626  ;;  %v2265_v49 = vmul.f32 %v2233_v53, %v4185_v14  ;;  %v1611_v6 = vmul.f32 %v4176_v24, %v1489_v56 }
 0x2c0   : > { %v1729_v54 = vrot.slane %v1621_v40, %v4340_v36  ;;  %v1746_v34 = vrot.slane %v1627_v18, %v4330_v59 }
 0x2c2   : > { %v1731_v31 = vsel %vm1730_vm8, %v1729_v54, %v1724_v30  ;;  %v1747_v33 = vsel %vm4912_vm7, %v1746_v34, %v1742_v13  ;;  %1668 = vadd.xlane.f32.xlu1 %v1610_v48  ;;  %1662 = vadd.xlane.f32.xlu0 %v1607_v5  ;;  %v2271_v30 = vmul.f32 %v2239_v22, %v4169_v55  ;;  %v2561_v54 = vld [vmem:[%s3635_s13 + $0x1f0] sm:$0xff]  ;;  %v2558_v34 = vld [vmem:[%s3635_s13 + $0x178] sm:$0xff] }
 0x2c3   : > { %v1954_v20 = vpop.xlane.xlu0 %1953  ;;  %v1629_v58 = vpop.xlane.xlu1 %1628  ;;  %v2593_v62 = vmul.f32 %v2561_v54, %v4185_v14  ;;  %v2240_v54 = vld [vmem:[%s3635_s13 + $0x2d0] sm:$0xff] }
 0x2c4   : > { %v2053_v8 = vrot.slane %v1954_v20, %v4351_v38  ;;  %v1751_v23 = vrot.slane %v1629_v58, %v4340_v36  ;;  %v2590_v20 = vmul.f32 %v2558_v34, %v4164_v32  ;;  %v2564_v58 = vld [vmem:[%s3635_s13 + $0x268] sm:$0xff] }
 0x2c6   : > { %v4363_v37 = vsel %vm2059_vm9, %v2058_v42, %v2053_v8  ;;  %v1752_v57 = vsel %vm1730_vm8, %v1751_v23, %v1747_v33  ;;  %1674 = vadd.xlane.f32.xlu1 %v1613_v16  ;;  %1672 = vadd.xlane.f32.xlu0 %v1612_v10  ;;  %v2563_v23 = vld [vmem:[%s3635_s13 + $0x260] sm:$0xff] }
 0x2c7   : > { %v1633_v44 = vpop.xlane.xlu0 %1632  ;;  %v1635_v52 = vpop.xlane.xlu1 %1634  ;;  %v2595_v11 = vmul.f32 %v2563_v23, %v4215_v43 }
 0x2c8   : > { %v1761_v51 = vrot.slane %v1633_v44, %v4320_v2  ;;  %v1765_v35 = vrot.slane %v1635_v52, %v4330_v59  ;;  %v2596_v44 = vmul.f32 %v2564_v58, %v4215_v43  ;;  %v2068_v58 = vadd.s32 4294967240, %v4304_v27 }
 0x2ca   : > { %v1766_v25 = vsel %vm4912_vm7, %v1765_v35, %v1761_v51  ;;  %1997 = vadd.xlane.f32.xlu1 %v1943_v61  ;;  %1991 = vadd.xlane.f32.xlu0 %v1940_v26  ;;  %v2378_v26 = vadd.s32 4294967232, %v4304_v27  ;;  %v1492_v35 = vld [vmem:[%s3635_s13 + $0x390] sm:$0xff] }
 0x2cb   : > { %v1962_v39 = vpop.xlane.xlu0 %1961  ;;  %v1964_v19 = vpop.xlane.xlu1 %1963 }
 0x2cc   : > { %v2078_v41 = vrot.slane %v1962_v39, %v4351_v38  ;;  %v2082_v42 = vrot.slane %v1964_v19, %v4316_v17  ;;  %v1614_v19 = vmul.f32 %v4194_v63, %v1492_v35 }
 0x2ce   : > { %v2083_v45 = vsel %vm2059_vm9, %v2082_v42, %v2078_v41  ;;  %2003 = vadd.xlane.f32.xlu1 %v1946_v4  ;;  %2001 = vadd.xlane.f32.xlu0 %v1945_v47  ;;  %v4428_v47 = vsub.s32 %v2378_v26, %v4135_v50  ;;  %v1915_v42 = vld [vmem:[%s3635_s13 + $0x330] sm:$0xff] }
 0x2cf   : > { %v1623_v28 = vpop.xlane.xlu0 %1622  ;;  %v1631_v7 = vpop.xlane.xlu1 %1630 }
 0x2d0   : > { %v1736_v0 = vrot.slane %v1623_v28, %v4380_v21  ;;  %v1756_v13 = vrot.slane %v1631_v7, %v4380_v21  ;;  %v1947_v7 = vmul.f32 %v1915_v42, %v4176_v24 }
 0x2d2   : > { %v1738_v48 = vsel %vm1737_vm10, %v1736_v0, %v1731_v31  ;;  %v1757_v5 = vsel %vm1737_vm10, %v1756_v13, %v1752_v57  ;;  %2318 = vadd.xlane.f32.xlu1 %v2268_v46  ;;  %2312 = vadd.xlane.f32.xlu0 %v2265_v49  ;;  %v4402_v31 = vsub.s32 %v2061_v3, %v4135_v50  ;;  %v1912_v46 = vld [vmem:[%s3635_s13 + $0x2b8] sm:$0xff]  ;;  %v1918_v3 = vld [vmem:[%s3635_s13 + $0x3a8] sm:$0xff] }
 0x2d3   : > { %v4395_v40 = vsel %vm1872_vm11, %v1757_v5, %v1738_v48  ;;  %v1637_v18 = vpop.xlane.xlu0 %1636  ;;  %v1641_v12 = vpop.xlane.xlu1 %1640  ;;  %v1944_v60 = vmul.f32 %v1912_v46, %v4169_v55 }
 0x2d4   : > { %v1770_v16 = vrot.slane %v1637_v18, %v4340_v36  ;;  %v1780_v33 = vrot.slane %v1641_v12, %v4320_v2  ;;  %v1950_v18 = vmul.f32 %v1918_v3, %v4194_v63 }
 0x2d6   : > { %v4405_v10 = vsel %vm1730_vm8, %v1770_v16, %v1766_v25  ;;  %2324 = vadd.xlane.f32.xlu1 %v2271_v30  ;;  %2322 = vadd.xlane.f32.xlu0 %v2270_v29  ;;  %v1917_v30 = vld [vmem:[%s3635_s13 + $0x3a0] sm:$0xff] }
 0x2d7   : > { %v1643_v9 = vpop.xlane.xlu0 %1642  ;;  %v1958_v8 = vpop.xlane.xlu1 %1957  ;;  %v1949_v12 = vmul.f32 %v1917_v30, %v4194_v63  ;;  %v2390_v30 = vadd.s32 4294967216, %v4304_v27 }
 0x2d8   : > { %v1784_v61 = vrot.slane %v1643_v9, %v4330_v59  ;;  %v2065_v57 = vrot.slane %v1958_v8, %v4402_v31  ;;  %v2272_v9 = vmul.f32 %v2240_v54, %v4169_v55 }
 0x2da   : > { %v4416_v52 = vsel %vm4912_vm7, %v1784_v61, %v1780_v33  ;;  %v4420_v32 = vsel %vm2066_vm12, %v2065_v57, %v4363_v37  ;;  %2639 = vadd.xlane.f32.xlu1 %v2593_v62  ;;  %2633 = vadd.xlane.f32.xlu0 %v2590_v20  ;;  %v2383_v37 = vadd.s32 4294967224, %v4304_v27  ;;  %v2237_v33 = vld [vmem:[%s3635_s13 + $0x258] sm:$0xff] }
 0x2db   : > { %v1966_v15 = vpop.xlane.xlu0 %1965  ;;  %v1970_v51 = vpop.xlane.xlu1 %1969  ;;  %v2269_v61 = vmul.f32 %v2237_v33, %v4215_v43 }
 0x2dc   : > { %v2087_v25 = vrot.slane %v1966_v15, %v4402_v31  ;;  %v2097_v4 = vrot.slane %v1970_v51, %v4351_v38  ;;  %v4441_v28 = vsub.s32 %v2383_v37, %v4135_v50  ;;  %v2242_v15 = vld [vmem:[%s3635_s13 + $0x340] sm:$0xff] }
 0x2de   : > { %v4432_v39 = vsel %vm2066_vm12, %v2087_v25, %v2083_v45  ;;  %2645 = vadd.xlane.f32.xlu1 %v2596_v44  ;;  %2643 = vadd.xlane.f32.xlu0 %v2595_v11  ;;  %v2243_v11 = vld [vmem:[%s3635_s13 + $0x348] sm:$0xff]  ;;  %v2274_v25 = vmul.f32 %v2242_v15, %v4176_v24  ;;  %v2707_v15 = vadd.s32 4294967200, %v4304_v27 }
 0x2df   : > { %v1972_v53 = vpop.xlane.xlu0 %1971  ;;  %v2283_v41 = vpop.xlane.xlu1 %2282 }
 0x2e0   : > { %v2101_v49 = vrot.slane %v1972_v53, %v4316_v17  ;;  %v2382_v22 = vrot.slane %v2283_v41, %v4428_v47 }
 0x2e2   : > { %v4444_v45 = vsel %vm2059_vm9, %v2101_v49, %v2097_v4  ;;  %1676 = vadd.xlane.f32.xlu1 %v1614_v19  ;;  %1670 = vadd.xlane.f32.xlu0 %v1611_v6  ;;  %v2565_v4 = vld [vmem:[%s3635_s13 + $0x270] sm:$0xff]  ;;  %v2562_v6 = vld [vmem:[%s3635_s13 + $0x1f8] sm:$0xff] }
 0x2e3   : > { %v2285_v0 = vpop.xlane.xlu0 %2284  ;;  %v2291_v13 = vpop.xlane.xlu1 %2290  ;;  %v2594_v49 = vmul.f32 %v2562_v6, %v4185_v14  ;;  %v2246_v6 = vld [vmem:[%s3635_s13 + $0x3c0] sm:$0xff] }
 0x2e4   : > { %v2387_v48 = vrot.slane %v2285_v0, %v4441_v28  ;;  %v2407_v5 = vrot.slane %v2291_v13, %v4428_v47  ;;  %v2567_v0 = vld [vmem:[%s3635_s13 + $0x2e0] sm:$0xff] }
 0x2e6   : > { %v4453_v29 = vsel %vm2388_vm13, %v2387_v48, %v2382_v22  ;;  %2005 = vadd.xlane.f32.xlu1 %v1947_v7  ;;  %1999 = vadd.xlane.f32.xlu0 %v1944_v60  ;;  %v2568_v22 = vld [vmem:[%s3635_s13 + $0x2e8] sm:$0xff] }
 0x2e7   : > { %v2293_v34 = vpop.xlane.xlu0 %2292  ;;  %v1639_v16 = vpop.xlane.xlu1 %1638  ;;  %v2600_v48 = vmul.f32 %v2568_v22, %v4169_v55 }
 0x2e8   : > { %v2411_v62 = vrot.slane %v2293_v34, %v4441_v28  ;;  %v1775_v20 = vrot.slane %v1639_v16, %v4380_v21  ;;  %v1916_v34 = vld [vmem:[%s3635_s13 + $0x338] sm:$0xff] }
 0x2e9   : > { %v1493_v16 = vld [vmem:[%s3635_s13 + $0x398] sm:$0xff] }
 0x2ea   : > { %v4464_v8 = vsel %vm2388_vm13, %v2411_v62, %v2407_v5  ;;  %v1776_v23 = vsel %vm1737_vm10, %v1775_v20, %v4405_v10  ;;  %2011 = vadd.xlane.f32.xlu1 %v1950_v18  ;;  %2009 = vadd.xlane.f32.xlu0 %v1949_v12  ;;  %v4478_v10 = vsub.s32 %v2068_v58, %v4135_v50 }
 0x2eb   : > { %v4471_v57 = vsel %vm1874_vm14, %v1776_v23, %v4395_v40  ;;  %v1645_v26 = vpop.xlane.xlu0 %1644  ;;  %v1649_v44 = vpop.xlane.xlu1 %1648  ;;  %v2275_v40 = vmul.f32 %v2243_v11, %v4176_v24  ;;  %v2599_v5 = vmul.f32 %v2567_v0, %v4169_v55  ;;  %v1948_v20 = vmul.f32 %v1916_v34, %v4176_v24  ;;  %v2566_v0 = vld [vmem:[%s3635_s13 + $0x278] sm:$0xff]  ;;  %v2571_v34 = vld [vmem:[%s3635_s13 + $0x360] sm:$0xff] }
 0x2ec   : > { %v1789_v51 = vrot.slane %v1645_v26, %v4340_v36  ;;  %v1799_v35 = vrot.slane %v1649_v44, %v4320_v2  ;;  %v1615_v58 = vmul.f32 %v4194_v63, %v1493_v16  ;;  %v1919_v26 = vld [vmem:[%s3635_s13 + $0x3b0] sm:$0xff] }
 0x2ed   : > { %v2569_v16 = vld [vmem:[%s3635_s13 + $0x2f0] sm:$0xff] }
 0x2ee   : > { %v4482_v56 = vsel %vm1730_vm8, %v1789_v51, %v4416_v52  ;;  %2326 = vadd.xlane.f32.xlu1 %v2272_v9  ;;  %2320 = vadd.xlane.f32.xlu0 %v2269_v61  ;;  %v2597_v52 = vmul.f32 %v2565_v4, %v4215_v43  ;;  %v2241_v9 = vld [vmem:[%s3635_s13 + $0x2d8] sm:$0xff]  ;;  %v2712_v51 = vadd.s32 4294967192, %v4304_v27  ;;  %v1951_v4 = vmul.f32 %v1919_v26, %v4194_v63  ;;  %v2572_v26 = vld [vmem:[%s3635_s13 + $0x368] sm:$0xff] }
 0x2ef   : > { %v1651_v37 = vpop.xlane.xlu0 %1650  ;;  %v1960_v19 = vpop.xlane.xlu1 %1959 }
 0x2f0   : > { %v1803_v53 = vrot.slane %v1651_v37, %v4330_v59  ;;  %v2072_v41 = vrot.slane %v1960_v19, %v4478_v10 }
 0x2f2   : > { %v4492_v42 = vsel %vm4912_vm7, %v1803_v53, %v1799_v35  ;;  %v2074_v46 = vsel %vm2073_vm15, %v2072_v41, %v4420_v32  ;;  %2332 = vadd.xlane.f32.xlu1 %v2275_v40  ;;  %2330 = vadd.xlane.f32.xlu0 %v2274_v25  ;;  %v2273_v35 = vmul.f32 %v2241_v9, %v4169_v55  ;;  %v2244_v53 = vld [vmem:[%s3635_s13 + $0x350] sm:$0xff]  ;;  %v1920_v9 = vld [vmem:[%s3635_s13 + $0x3b8] sm:$0xff] }
 0x2f3   : > { %v1968_v7 = vpop.xlane.xlu0 %1967  ;;  %v1974_v60 = vpop.xlane.xlu1 %1973  ;;  %v2276_v22 = vmul.f32 %v2244_v53, %v4176_v24  ;;  %v2248_v53 = vld [vmem:[%s3635_s13 + $0x3d0] sm:$0xff] }
 0x2f4   : > { %v2092_v13 = vrot.slane %v1968_v7, %v4478_v10  ;;  %v2106_v3 = vrot.slane %v1974_v60, %v4402_v31 }
 0x2f6   : > { %v2093_v32 = vsel %vm2073_vm15, %v2092_v13, %v4432_v39  ;;  %v4507_v14 = vsel %vm2066_vm12, %v2106_v3, %v4444_v45  ;;  %2647 = vadd.xlane.f32.xlu1 %v2597_v52  ;;  %2641 = vadd.xlane.f32.xlu0 %v2594_v49  ;;  %v4518_v45 = vsub.s32 %v2390_v30, %v4135_v50  ;;  %v2247_v13 = vld [vmem:[%s3635_s13 + $0x3c8] sm:$0xff] }
 0x2f7   : > { %v4511_v18 = vsel %vm1872_vm11, %v2093_v32, %v2074_v46  ;;  %v1978_v12 = vpop.xlane.xlu0 %1977  ;;  %v1980_v54 = vpop.xlane.xlu1 %1979  ;;  %v2278_v49 = vmul.f32 %v2246_v6, %v4194_v63  ;;  %v2598_v32 = vmul.f32 %v2566_v0, %v4215_v43  ;;  %v2601_v43 = vmul.f32 %v2569_v16, %v4169_v55  ;;  %v2570_v0 = vld [vmem:[%s3635_s13 + $0x2f8] sm:$0xff] }
 0x2f8   : > { %v2116_v33 = vrot.slane %v1978_v12, %v4351_v38  ;;  %v2120_v39 = vrot.slane %v1980_v54, %v4316_v17 }
 0x2fa   : > { %v4521_v62 = vsel %vm2059_vm9, %v2120_v39, %v2116_v33  ;;  %2653 = vadd.xlane.f32.xlu1 %v2600_v48  ;;  %2651 = vadd.xlane.f32.xlu0 %v2599_v5  ;;  %v2279_v5 = vmul.f32 %v2247_v13, %v4194_v63 }
 0x2fb   : > { %v2287_v23 = vpop.xlane.xlu0 %2286  ;;  %v2295_v61 = vpop.xlane.xlu1 %2294 }
 0x2fc   : > { %v2394_v44 = vrot.slane %v2287_v23, %v4518_v45  ;;  %v2416_v11 = vrot.slane %v2295_v61, %v4518_v45 }
 0x2fe   : > { %v4534_v40 = vsel %vm2395_vm0, %v2394_v44, %v4453_v29  ;;  %v4538_v25 = vsel %vm2395_vm0, %v2416_v11, %v4464_v8  ;;  %2007 = vadd.xlane.f32.xlu1 %v1948_v20  ;;  %1678 = vadd.xlane.f32.xlu0 %v1615_v58  ;;  %v4546_v29 = vsub.s32 %v2707_v15, %v4135_v50 }
 0x2ff   : > { %v2299_v37 = vpop.xlane.xlu0 %2298  ;;  %v2301_v19 = vpop.xlane.xlu1 %2300  ;;  %v4549_v8 = vsub.s32 %v2712_v51, %v4135_v50  ;;  %v2603_v58 = vmul.f32 %v2571_v34, %v4176_v24  ;;  %v1952_v15 = vmul.f32 %v1920_v9, %v4194_v63 }
 0x300   : > { %v2426_v41 = vrot.slane %v2299_v37, %v4428_v47  ;;  %v2430_v52 = vrot.slane %v2301_v19, %v4441_v28 }
 0x302   : > { %v4552_v46 = vsel %vm2388_vm13, %v2430_v52, %v2426_v41  ;;  %2328 = vadd.xlane.f32.xlu1 %v2273_v35  ;;  %2013 = vadd.xlane.f32.xlu0 %v1951_v4  ;;  %v2604_v4 = vmul.f32 %v2572_v26, %v4176_v24  ;;  %v2245_v41 = vld [vmem:[%s3635_s13 + $0x358] sm:$0xff] }
 0x303   : > { %v2612_v7 = vpop.xlane.xlu0 %2611  ;;  %v2614_v60 = vpop.xlane.xlu1 %2613 }
 0x304   : > { %v2711_v3 = vrot.slane %v2612_v7, %v4546_v29  ;;  %v2716_v30 = vrot.slane %v2614_v60, %v4549_v8  ;;  %v2573_v7 = vld [vmem:[%s3635_s13 + $0x370] sm:$0xff] }
 0x306   : > { %v4561_v48 = vsel %vm2717_vm1, %v2716_v30, %v2711_v3  ;;  %2338 = vadd.xlane.f32.xlu1 %v2278_v49  ;;  %2334 = vadd.xlane.f32.xlu0 %v2276_v22  ;;  %v2280_v49 = vmul.f32 %v2248_v53, %v4194_v63  ;;  %v2277_v22 = vmul.f32 %v2245_v41, %v4176_v24  ;;  %v2397_v30 = vadd.s32 4294967208, %v4304_v27 }
 0x307   : > { %v2620_v12 = vpop.xlane.xlu0 %2619  ;;  %v2622_v54 = vpop.xlane.xlu1 %2621 }
 0x308   : > { %v2736_v33 = vrot.slane %v2620_v12, %v4546_v29  ;;  %v2740_v39 = vrot.slane %v2622_v54, %v4549_v8  ;;  %v2602_v54 = vmul.f32 %v2570_v0, %v4169_v55 }
 0x30a   : > { %v4570_v20 = vsel %vm2717_vm1, %v2740_v39, %v2736_v33  ;;  %2649 = vadd.xlane.f32.xlu1 %v2598_v32  ;;  %2340 = vadd.xlane.f32.xlu0 %v2279_v5  ;;  %v2605_v32 = vmul.f32 %v2573_v7, %v4176_v24  ;;  %v2576_v39 = vld [vmem:[%s3635_s13 + $0x3e8] sm:$0xff] }
 0x30b   : > { %v1647_v23 = vpop.xlane.xlu0 %1646  ;;  %v1653_v61 = vpop.xlane.xlu1 %1652  ;;  %v2608_v55 = vmul.f32 %v2576_v39, %v4194_v63 }
 0x30c   : > { %v1794_v44 = vrot.slane %v1647_v23, %v4380_v21  ;;  %v1808_v11 = vrot.slane %v1653_v61, %v4340_v36  ;;  %v2574_v23 = vld [vmem:[%s3635_s13 + $0x378] sm:$0xff] }
 0x30e   : > { %v1795_v51 = vsel %vm1737_vm10, %v1794_v44, %v4482_v56  ;;  %v4583_v35 = vsel %vm1730_vm8, %v1808_v11, %v4492_v42  ;;  %2659 = vadd.xlane.f32.xlu1 %v2603_v58  ;;  %2655 = vadd.xlane.f32.xlu0 %v2601_v43  ;;  %v2575_v58 = vld [vmem:[%s3635_s13 + $0x3e0] sm:$0xff]  ;;  %v2249_v44 = vld [vmem:[%s3635_s13 + $0x3d8] sm:$0xff] }
 0x30f   : > { %v4588_v37 = vsel %vm1876_vm2, %v1795_v51, %v4471_v57  ;;  %v1659_v19 = vpop.xlane.xlu1 %1658  ;;  %v1657_v6 = vpop.xlane.xlu0 %1656  ;;  %v2719_v51 = vadd.s32 4294967184, %v4304_v27  ;;  %v2281_v53 = vmul.f32 %v2249_v44, %v4194_v63 }
 0x310   : > { %v1822_v56 = vrot.slane %v1659_v19, %v4330_v59  ;;  %v1818_v52 = vrot.slane %v1657_v6, %v4320_v2 }
 0x312   : > { %v4595_v42 = vsel %vm4912_vm7, %v1822_v56, %v1818_v52  ;;  %2015 = vadd.xlane.f32.xlu1 %v1952_v15  ;;  %2661 = vadd.xlane.f32.xlu0 %v2604_v4  ;;  %v2606_v4 = vmul.f32 %v2574_v23, %v4176_v24 }
 0x313   : > { %v1982_v57 = vpop.xlane.xlu1 %1981  ;;  %v1976_v60 = vpop.xlane.xlu0 %1975 }
 0x314   : > { %v2125_v13 = vrot.slane %v1982_v57, %v4402_v31  ;;  %v2111_v3 = vrot.slane %v1976_v60, %v4478_v10  ;;  %v4645_v57 = vsub.s32 %v2719_v51, %v4135_v50 }
 0x316   : > { %v4607_v5 = vsel %vm2066_vm12, %v2125_v13, %v4521_v62  ;;  %v2112_v12 = vsel %vm2073_vm15, %v2111_v3, %v4507_v14  ;;  %2342 = vadd.xlane.f32.xlu1 %v2280_v49  ;;  %2336 = vadd.xlane.f32.xlu0 %v2277_v22  ;;  %v4621_v14 = vsub.s32 %v2397_v30, %v4135_v50  ;;  %v2577_v49 = vld [vmem:[%s3635_s13 + $0x3f0] sm:$0xff]  ;;  %v2578_v22 = vld [vmem:[%s3635_s13 + $0x3f8] sm:$0xff] }
 0x317   : > { %v4614_v34 = vsel %vm1874_vm14, %v2112_v12, %v4511_v18  ;;  %v1988_v16 = vpop.xlane.xlu1 %1987  ;;  %v1986_v33 = vpop.xlane.xlu0 %1985  ;;  %v2607_v18 = vmul.f32 %v2575_v58, %v4194_v63  ;;  %v2610_v60 = vmul.f32 %v2578_v22, %v4194_v63 }
 0x318   : > { %v2139_v62 = vrot.slane %v1988_v16, %v4316_v17  ;;  %v2135_v43 = vrot.slane %v1986_v33, %v4351_v38 }
 0x31a   : > { %v4624_v9 = vsel %vm2059_vm9, %v2139_v62, %v2135_v43  ;;  %2663 = vadd.xlane.f32.xlu1 %v2605_v32  ;;  %2657 = vadd.xlane.f32.xlu0 %v2602_v54 }
 0x31b   : > { %v2297_v61 = vpop.xlane.xlu1 %2296  ;;  %v2289_v26 = vpop.xlane.xlu0 %2288 }
 0x31c   : > { %v2421_v11 = vrot.slane %v2297_v61, %v4621_v14  ;;  %v2401_v15 = vrot.slane %v2289_v26, %v4621_v14 }
 0x31e   : > { %v2422_v19 = vsel %vm2402_vm3, %v2421_v11, %v4538_v25  ;;  %v2403_v6 = vsel %vm2402_vm3, %v2401_v15, %v4534_v40  ;;  %2669 = vadd.xlane.f32.xlu1 %v2608_v55  ;;  %2667 = vadd.xlane.f32.xlu0 %v2607_v18  ;;  %v2609_v25 = vmul.f32 %v2577_v49, %v4194_v63 }
 0x31f   : > { %v2537_v41 = vsel %vm1872_vm11, %v2422_v19, %v2403_v6  ;;  %v2307_v56 = vpop.xlane.xlu1 %2306  ;;  %v2303_v52 = vpop.xlane.xlu0 %2302 }
 0x320   : > { %v2445_v7 = vrot.slane %v2307_v56, %v4428_v47  ;;  %v2435_v24 = vrot.slane %v2303_v52, %v4518_v45 }
 0x322   : > { %v2436_v40 = vsel %vm2395_vm0, %v2435_v24, %v4552_v46  ;;  %2665 = vadd.xlane.f32.xlu1 %v2606_v4  ;;  %2344 = vadd.xlane.f32.xlu0 %v2281_v53  ;;  %v2726_v24 = vadd.s32 4294967176, %v4304_v27 }
 0x323   : > { %v2616_v0 = vpop.xlane.xlu1 %2615  ;;  %v2309_v13 = vpop.xlane.xlu0 %2308 }
 0x324   : > { %v2723_v3 = vrot.slane %v2616_v0, %v4645_v57  ;;  %v2449_v30 = vrot.slane %v2309_v13, %v4441_v28 }
 0x326   : > { %v2725_v32 = vsel %vm4913_vm4, %v2723_v3, %v4561_v48  ;;  %v2450_v12 = vsel %vm2388_vm13, %v2449_v30, %v2445_v7  ;;  %2671 = vadd.xlane.f32.xlu0 %v2609_v25  ;;  %2673 = vadd.xlane.f32.xlu1 %v2610_v60  ;;  %v4691_v30 = vsub.s32 %v2726_v24, %v4135_v50 }
 0x327   : > { %v2628_v46 = vpop.xlane.xlu1 %2627  ;;  %v2624_v54 = vpop.xlane.xlu0 %2623 }
 0x328   : > { %v2755_v16 = vrot.slane %v2628_v46, %v4546_v29  ;;  %v2745_v63 = vrot.slane %v2624_v54, %v4645_v57 }
 0x32a   : > { %v2746_v33 = vsel %vm4913_vm4, %v2745_v63, %v4570_v20 }
 0x32b   : > { %v1655_v39 = vpop.xlane.xlu1 %1654  ;;  %v2630_v58 = vpop.xlane.xlu0 %2629 }
 0x32c   : > { %v1813_v62 = vrot.slane %v1655_v39, %v4380_v21  ;;  %v2759_v48 = vrot.slane %v2630_v58, %v4549_v8 }
 0x32e   : > { %v1814_v43 = vsel %vm1737_vm10, %v1813_v62, %v4583_v35  ;;  %v2760_v55 = vsel %vm2717_vm1, %v2759_v48, %v2755_v16 }
 0x32f   : > { %v1879_v18 = vsel %vm1878_vm5, %v1814_v43, %v4588_v37  ;;  %v1665_v23 = vpop.xlane.xlu1 %1664  ;;  %v1661_v61 = vpop.xlane.xlu0 %1660 }
 0x330   : > { %v1837_v26 = vrot.slane %v1665_v23, %v4320_v2  ;;  %v1827_v20 = vrot.slane %v1661_v61, %v4340_v36 }
 0x332   : > { %v1828_v44 = vsel %vm1730_vm8, %v1827_v20, %v4595_v42 }
 0x333   : > { %v1984_v11 = vpop.xlane.xlu1 %1983  ;;  %v1667_v15 = vpop.xlane.xlu0 %1666 }
 0x334   : > { %v2130_v51 = vrot.slane %v1984_v11, %v4478_v10  ;;  %v1841_v35 = vrot.slane %v1667_v15, %v4330_v59 }
 0x336   : > { %v2131_v4 = vsel %vm2073_vm15, %v2130_v51, %v4607_v5  ;;  %v1842_v37 = vsel %vm4912_vm7, %v1841_v35, %v1837_v26  ;;  %vm1880_vm7 = vcmask 1045509  }
 0x337   : > { %v2210_v19 = vsel %vm1876_vm2, %v2131_v4, %v4614_v34  ;;  %v1994_v6 = vpop.xlane.xlu1 %1993  ;;  %v1990_v53 = vpop.xlane.xlu0 %1989 }
 0x338   : > { %v2154_v56 = vrot.slane %v1994_v6, %v4351_v38  ;;  %v2144_v42 = vrot.slane %v1990_v53, %v4402_v31 }
 0x33a   : > { %v2145_v52 = vsel %vm2066_vm12, %v2144_v42, %v4624_v9 }
 0x33b   : > { %v2305_v49 = vpop.xlane.xlu1 %2304  ;;  %v1996_v22 = vpop.xlane.xlu0 %1995 }
 0x33c   : > { %v2440_v7 = vrot.slane %v2305_v49, %v4621_v14  ;;  %v2158_v5 = vrot.slane %v1996_v22, %v4316_v17 }
 0x33e   : > { %v2441_v25 = vsel %vm2402_vm3, %v2440_v7, %v2436_v40  ;;  %v2159_v34 = vsel %vm2059_vm9, %v2158_v5, %v2154_v56 }
 0x33f   : > { %v2538_v60 = vsel %vm1874_vm14, %v2441_v25, %v2537_v41  ;;  %v2315_v0 = vpop.xlane.xlu1 %2314  ;;  %v2311_v13 = vpop.xlane.xlu0 %2310 }
 0x340   : > { %v2464_v3 = vrot.slane %v2315_v0, %v4428_v47  ;;  %v2454_v9 = vrot.slane %v2311_v13, %v4518_v45 }
 0x342   : > { %v2455_v46 = vsel %vm2395_vm0, %v2454_v9, %v2450_v12 }
 0x343   : > { %v2618_v54 = vpop.xlane.xlu1 %2617  ;;  %v2317_v27 = vpop.xlane.xlu0 %2316 }
 0x344   : > { %v2730_v40 = vrot.slane %v2618_v54, %v4691_v30  ;;  %v2468_v16 = vrot.slane %v2317_v27, %v4441_v28 }
 0x346   : > { %v2732_v41 = vsel %vm2731_vm6, %v2730_v40, %v2725_v32  ;;  %v2469_v63 = vsel %vm2388_vm13, %v2468_v16, %v2464_v3 }
 0x347   : > { %v2632_v39 = vpop.xlane.xlu1 %2631  ;;  %v2626_v58 = vpop.xlane.xlu0 %2625 }
 0x348   : > { %v2764_v62 = vrot.slane %v2632_v39, %v4645_v57  ;;  %v2750_v50 = vrot.slane %v2626_v58, %v4691_v30 }
 0x34a   : > { %v2765_v48 = vsel %vm4913_vm4, %v2764_v62, %v2760_v55  ;;  %v2751_v12 = vsel %vm2731_vm6, %v2750_v50, %v2746_v33 }
 0x34b   : > { %v2866_v43 = vsel %vm1872_vm11, %v2751_v12, %v2732_v41  ;;  %v2638_v23 = vpop.xlane.xlu1 %2637  ;;  %v2636_v61 = vpop.xlane.xlu0 %2635  ;;  %vm1882_vm11 = vcmask 1046534  }
 0x34c   : > { %v2778_v26 = vrot.slane %v2638_v23, %v4549_v8  ;;  %v2774_v32 = vrot.slane %v2636_v61, %v4546_v29 }
 0x34e   : > { %v2779_v20 = vsel %vm2717_vm1, %v2778_v26, %v2774_v32 }
 0x34f   : > { %v1669_v11 = vpop.xlane.xlu1 %1668  ;;  %v1663_v15 = vpop.xlane.xlu0 %1662 }
 0x350   : > { %v1846_v51 = vrot.slane %v1669_v11, %v4340_v36  ;;  %v1832_v35 = vrot.slane %v1663_v15, %v4380_v21 }
 0x352   : > { %v1847_v55 = vsel %vm1730_vm8, %v1846_v51, %v1842_v37  ;;  %v1833_v33 = vsel %vm1737_vm10, %v1832_v35, %v1828_v44 }
 0x353   : > { %v1881_v4 = vsel %vm1880_vm7, %v1833_v33, %v1879_v18  ;;  %v4711_v6 = vpop.xlane.xlu1 %1674  ;;  %v4713_v53 = vpop.xlane.xlu0 %1672 }
 0x357   : > { %v1998_v56 = vpop.xlane.xlu1 %1997  ;;  %v1992_v42 = vpop.xlane.xlu0 %1991 }
 0x358   : > { %v2163_v49 = vrot.slane %v1998_v56, %v4402_v31  ;;  %v2149_v22 = vrot.slane %v1992_v42, %v4478_v10 }
 0x35a   : > { %v2164_v7 = vsel %vm2066_vm12, %v2163_v49, %v2159_v34  ;;  %v2150_v5 = vsel %vm2073_vm15, %v2149_v22, %v2145_v52 }
 0x35b   : > { %v2211_v37 = vsel %vm1878_vm5, %v2150_v5, %v2210_v19  ;;  %v2004_v24 = vpop.xlane.xlu1 %2003  ;;  %v2002_v44 = vpop.xlane.xlu0 %2001 }
 0x35c   : > { %v2177_v18 = vrot.slane %v2004_v24, %v4316_v17  ;;  %v2173_v25 = vrot.slane %v2002_v44, %v4351_v38 }
 0x35e   : > { %v2178_v0 = vsel %vm2059_vm9, %v2177_v18, %v2173_v25 }
 0x35f   : > { %v2319_v13 = vpop.xlane.xlu1 %2318  ;;  %v2313_v3 = vpop.xlane.xlu0 %2312 }
 0x360   : > { %v2473_v9 = vrot.slane %v2319_v13, %v4518_v45  ;;  %v2459_v54 = vrot.slane %v2313_v3, %v4621_v14 }
 0x362   : > { %v2474_v34 = vsel %vm2395_vm0, %v2473_v9, %v2469_v63  ;;  %v2460_v52 = vsel %vm2402_vm3, %v2459_v54, %v2455_v46 }
 0x363   : > { %v2539_v19 = vsel %vm1876_vm2, %v2460_v52, %v2538_v60  ;;  %v2325_v27 = vpop.xlane.xlu1 %2324  ;;  %v2323_v40 = vpop.xlane.xlu0 %2322 }
 0x364   : > { %v2487_v16 = vrot.slane %v2325_v27, %v4441_v28  ;;  %v2483_v41 = vrot.slane %v2323_v40, %v4428_v47 }
 0x366   : > { %v2488_v39 = vsel %vm2388_vm13, %v2487_v16, %v2483_v41 }
 0x367   : > { %v2640_v58 = vpop.xlane.xlu1 %2639  ;;  %v2634_v62 = vpop.xlane.xlu0 %2633 }
 0x368   : > { %v2783_v50 = vrot.slane %v2640_v58, %v4645_v57  ;;  %v2769_v12 = vrot.slane %v2634_v62, %v4691_v30 }
 0x36a   : > { %v2784_v63 = vsel %vm4913_vm4, %v2783_v50, %v2779_v20  ;;  %v2770_v46 = vsel %vm2731_vm6, %v2769_v12, %v2765_v48 }
 0x36b   : > { %v2867_v60 = vsel %vm1874_vm14, %v2770_v46, %v2866_v43  ;;  %v2646_v23 = vpop.xlane.xlu1 %2645  ;;  %v2644_v61 = vpop.xlane.xlu0 %2643  ;;  %vm4923_vm14 = vcmask 130112  }
 0x36c   : > { %v2797_v26 = vrot.slane %v2646_v23, %v4549_v8  ;;  %v2793_v32 = vrot.slane %v2644_v61, %v4546_v29 }
 0x36e   : > { %v2798_v11 = vsel %vm2717_vm1, %v2797_v26, %v2793_v32 }
 0x36f   : > { %v1677_v15 = vpop.xlane.xlu1 %1676  ;;  %v1671_v51 = vpop.xlane.xlu0 %1670 }
 0x370   : > { %v1851_v35 = vrot.slane %v1671_v51, %v4380_v21  ;;  %v1865_v62 = vrot.slane %v1677_v15, %v4340_v36 }
 0x372   : > { %v1852_v33 = vsel %vm1737_vm10, %v1851_v35, %v1847_v55 }
 0x373   : > { %v1883_v20 = vsel %vm1882_vm11, %v1852_v33, %v1881_v4  ;;  %v2006_v48 = vpop.xlane.xlu1 %2005  ;;  %v2000_v56 = vpop.xlane.xlu0 %1999 }
 0x374   : > { %v2182_v43 = vrot.slane %v2006_v48, %v4402_v31  ;;  %v2168_v42 = vrot.slane %v2000_v56, %v4478_v10 }
 0x376   : > { %v2183_v49 = vsel %vm2066_vm12, %v2182_v43, %v2178_v0  ;;  %v2169_v22 = vsel %vm2073_vm15, %v2168_v42, %v2164_v7 }
 0x377   : > { %v2212_v5 = vsel %vm1880_vm7, %v2169_v22, %v2211_v37  ;;  %v2012_v24 = vpop.xlane.xlu1 %2011  ;;  %v2010_v44 = vpop.xlane.xlu0 %2009 }
 0x378   : > { %v2196_v42 = vrot.slane %v2012_v24, %v4316_v17 }
 0x37b   : > { %v2327_v18 = vpop.xlane.xlu1 %2326  ;;  %v2321_v25 = vpop.xlane.xlu0 %2320 }
 0x37c   : > { %v2492_v55 = vrot.slane %v2327_v18, %v4518_v45  ;;  %v2478_v4 = vrot.slane %v2321_v25, %v4621_v14 }
 0x37e   : > { %v2493_v13 = vsel %vm2395_vm0, %v2492_v55, %v2488_v39  ;;  %v2479_v3 = vsel %vm2402_vm3, %v2478_v4, %v2474_v34  ;;  %v1860_v34 = vrot.slane %v4711_v6, %v4330_v59 }
 0x37f   : > { %v2540_v9 = vsel %vm1878_vm5, %v2479_v3, %v2539_v19  ;;  %v2333_v54 = vpop.xlane.xlu1 %2332  ;;  %v2331_v0 = vpop.xlane.xlu0 %2330  ;;  %v1856_v19 = vrot.slane %v4713_v53, %v4320_v2 }
 0x380   : > { %v2506_v55 = vrot.slane %v2333_v54, %v4441_v28  ;;  %v2502_v4 = vrot.slane %v2331_v0, %v4428_v47 }
 0x381   : > { %v1861_v46 = vsel %vm4923_vm14, %v1860_v34, %v1856_v19 }
 0x383   : > { %v2648_v52 = vpop.xlane.xlu1 %2647  ;;  %v2642_v7 = vpop.xlane.xlu0 %2641 }
 0x384   : > { %v2802_v37 = vrot.slane %v2648_v52, %v4645_v57  ;;  %v2788_v27 = vrot.slane %v2642_v7, %v4691_v30 }
 0x386   : > { %v2803_v40 = vsel %vm4913_vm4, %v2802_v37, %v2798_v11  ;;  %v2789_v16 = vsel %vm2731_vm6, %v2788_v27, %v2784_v63  ;;  %vm1884_vm4 = vcmask 1047559  }
 0x387   : > { %v2868_v41 = vsel %vm1876_vm2, %v2789_v16, %v2867_v60  ;;  %v2654_v58 = vpop.xlane.xlu1 %2653  ;;  %v2652_v39 = vpop.xlane.xlu0 %2651  ;;  %v1866_v60 = vsel %vm1730_vm8, %v1865_v62, %v1861_v46  ;;  %vm1887_vm2 = vcmask 261120   ;;  %vm2216_vm8 = vcmask 523520  }
 0x388   : > { %v2816_v52 = vrot.slane %v2654_v58, %v4549_v8  ;;  %v2812_v54 = vrot.slane %v2652_v39, %v4546_v29 }
 0x38b   : > { %v2008_v50 = vpop.xlane.xlu1 %2007  ;;  %v1679_v12 = vpop.xlane.xlu0 %1678 }
 0x38c   : > { %v2187_v23 = vrot.slane %v2008_v50, %v4478_v10  ;;  %v1870_v63 = vrot.slane %v1679_v12, %v4380_v21 }
 0x38e   : > { %v2188_v61 = vsel %vm2073_vm15, %v2187_v23, %v2183_v49  ;;  %v1871_v59 = vsel %vm1737_vm10, %v1870_v63, %v1866_v60  ;;  %v2192_v49 = vrot.slane %v2010_v44, %v4351_v38  ;;  %v2507_v44 = vsel %vm2388_vm13, %v2506_v55, %v2502_v4 }
 0x38f   : > { %v2213_v2 = vsel %vm1882_vm11, %v2188_v61, %v2212_v5  ;;  %v1885_v36 = vsel %vm1884_vm4, %v1871_v59, %v1883_v20  ;;  %v2329_v6 = vpop.xlane.xlu1 %2328  ;;  %v2014_v53 = vpop.xlane.xlu0 %2013  ;;  %vm2545_vm10 = vcmask 785920  }
 0x390   : > { %1888 = vst.msk [vmem:[#allocation4] sm:$0xff] %vm1887_vm2, %v1885_v36  ;;  %v2497_v26 = vrot.slane %v2329_v6, %v4621_v14  ;;  %v2201_v22 = vrot.slane %v2014_v53, %v4402_v31  ;;  %v2197_v25 = vsel %vm2059_vm9, %v2196_v42, %v2192_v49  ;;  %vm4924_vm9 = vcmask 982912   ;;  %v3052_v42 = vld [vmem:[#allocation10] ss:$0 sm:$0xff] }
 0x392   : > { %v2498_v32 = vsel %vm2402_vm3, %v2497_v26, %v2493_v13  ;;  %v2202_v3 = vsel %vm2066_vm12, %v2201_v22, %v2197_v25 }
 0x393   : > { %v2541_v21 = vsel %vm1880_vm7, %v2498_v32, %v2540_v9  ;;  %v2339_v11 = vpop.xlane.xlu1 %2338  ;;  %v2335_v15 = vpop.xlane.xlu0 %2334 }
 0x394   : > { %v2511_v9 = vrot.slane %v2335_v15, %v4518_v45  ;;  %v2521_v60 = vrot.slane %v2339_v11, %v4428_v47 }
 0x396   : > { %v2512_v0 = vsel %vm2395_vm0, %v2511_v9, %v2507_v44 }
 0x397   : > { %v2650_v51 = vpop.xlane.xlu1 %2649  ;;  %v2341_v35 = vpop.xlane.xlu0 %2340 }
 0x398   : > { %v2807_v33 = vrot.slane %v2650_v51, %v4691_v30  ;;  %v2525_v12 = vrot.slane %v2341_v35, %v4441_v28 }
 0x39a   : > { %v2808_v48 = vsel %vm2731_vm6, %v2807_v33, %v2803_v40  ;;  %v2526_v36 = vsel %vm2388_vm13, %v2525_v12, %v2521_v60  ;;  %vm2874_vm13 = vcmask 1048320  }
 0x39b   : > { %v2869_v56 = vsel %vm1878_vm5, %v2808_v48, %v2868_v41  ;;  %v2660_v20 = vpop.xlane.xlu1 %2659  ;;  %v2656_v43 = vpop.xlane.xlu0 %2655  ;;  %v2817_v41 = vsel %vm2717_vm1, %v2816_v52, %v2812_v54 }
 0x39c   : > { %v2821_v7 = vrot.slane %v2656_v43, %v4645_v57  ;;  %v2831_v61 = vrot.slane %v2660_v20, %v4546_v29 }
 0x39e   : > { %v2822_v58 = vsel %vm4924_vm9, %v2821_v7, %v2817_v41 }
 0x39f   : > { %v2016_v5 = vpop.xlane.xlu1 %2015  ;;  %v2662_v18 = vpop.xlane.xlu0 %2661 }
 0x3a0   : > { %v2206_v13 = vrot.slane %v2016_v5, %v4478_v10  ;;  %v2835_v46 = vrot.slane %v2662_v18, %v4549_v8 }
 0x3a2   : > { %v2207_v17 = vsel %vm2073_vm15, %v2206_v13, %v2202_v3  ;;  %v2836_v6 = vsel %vm2717_vm1, %v2835_v46, %v2831_v61 }
 0x3a3   : > { %v2214_v38 = vsel %vm1884_vm4, %v2207_v17, %v2213_v2  ;;  %v2343_v31 = vpop.xlane.xlu1 %2342  ;;  %v2337_v24 = vpop.xlane.xlu0 %2336 }
 0x3a4   : > { %2217 = vst.msk [vmem:[#allocation4] sm:$0xff] %vm2216_vm8, %v2214_v38  ;;  %v2516_v10 = vrot.slane %v2337_v24, %v4621_v14  ;;  %v2530_v23 = vrot.slane %v2343_v31, %v4518_v45 }
 0x3a6   : > { %v2517_v37 = vsel %vm2402_vm3, %v2516_v10, %v2512_v0  ;;  %v2531_v26 = vsel %vm2395_vm0, %v2530_v23, %v2526_v36 }
 0x3a7   : > { %v2542_v27 = vsel %vm1882_vm11, %v2517_v37, %v2541_v21  ;;  %v2664_v40 = vpop.xlane.xlu1 %2663  ;;  %v2658_v16 = vpop.xlane.xlu0 %2657 }
 0x3a8   : > { %v2826_v34 = vrot.slane %v2658_v16, %v4691_v30  ;;  %v2840_v63 = vrot.slane %v2664_v40, %v4645_v57 }
 0x3aa   : > { %v2827_v39 = vsel %vm2731_vm6, %v2826_v34, %v2822_v58 }
 0x3ab   : > { %v2870_v19 = vsel %vm1880_vm7, %v2827_v39, %v2869_v56  ;;  %v2670_v62 = vpop.xlane.xlu1 %2669  ;;  %v2668_v50 = vpop.xlane.xlu0 %2667  ;;  %vm4925_vm7 = vmmov %vm4924_vm9 }
 0x3ac   : > { %v2841_v45 = vsel %vm4925_vm7, %v2840_v63, %v2836_v6  ;;  %v2854_v32 = vrot.slane %v2670_v62, %v4549_v8  ;;  %v2850_v47 = vrot.slane %v2668_v50, %v4546_v29  ;;  %vm4926_vm12 = vmmov %vm4925_vm7 }
 0x3ae   : > { %v2855_v8 = vsel %vm2717_vm1, %v2854_v32, %v2850_v47 }
 0x3af   : > { %v2666_v59 = vpop.xlane.xlu1 %2665  ;;  %v2345_v2 = vpop.xlane.xlu0 %2344 }
 0x3b0   : > { %v2845_v53 = vrot.slane %v2666_v59, %v4691_v30  ;;  %v2535_v28 = vrot.slane %v2345_v2, %v4621_v14 }
 0x3b2   : > { %v2846_v21 = vsel %vm2731_vm6, %v2845_v53, %v2841_v45  ;;  %v2536_v11 = vsel %vm2402_vm3, %v2535_v28, %v2531_v26 }
 0x3b3   : > { %v2871_v15 = vsel %vm1882_vm11, %v2846_v21, %v2870_v19  ;;  %v2543_v51 = vsel %vm1884_vm4, %v2536_v11, %v2542_v27  ;;  %v2672_v35 = vpop.xlane.xlu0 %2671  ;;  %v2674_v33 = vpop.xlane.xlu1 %2673 }
 0x3b4   : > { %2546 = vst.msk [vmem:[#allocation4] sm:$0xff] %vm2545_vm10, %v2543_v51  ;;  %v2859_v14 = vrot.slane %v2672_v35, %v4645_v57  ;;  %v2864_v48 = vrot.slane %v2674_v33, %v4691_v30 }
 0x3b6   : > { %v2860_v29 = vsel %vm4926_vm12, %v2859_v14, %v2855_v8 }
 0x3b7   : > { %v2865_v56 = vsel %vm2731_vm6, %v2864_v48, %v2860_v29 }
 0x3b8   : > { %v2872_v20 = vsel %vm1884_vm4, %v2865_v56, %v2871_v15 }
 0x3b9   : > { %2875 = vst.msk [vmem:[#allocation4] sm:$0xff] %vm2874_vm13, %v2872_v20 }
 0x3c0   : > { %v2876_v43 = vld [vmem:[#allocation4] sm:$0xff] }
 0x3c1   : > { %v2877_v49 = vmul.f32 %v2876_v43, %v3642_v1 }
 0x3c3   : > { %v2885_v22 = vadd.f32 %v3052_v42, %v2877_v49  ;;  %2901 = vst [vmem:[#allocation14] sm:$0xff] (!%p3053_p8), %v2877_v49 }
 0x3c5   : > { %2886 = vmax.xlane.f32.xlu0 %v2885_v22 }
 0x452   : > { %v2887_v5 = vpop.xlane.xlu0 %2886 }
 0x453   : > { %v2888_v57 = vsub.f32 %v2885_v22, %v2887_v5 }
 0x455   : > { %v2889_v18 = vmul.f32 1.442695, %v2888_v57 }
 0x457   : > { %3165 = vpow2.f32 %v2889_v18 }
 0x461   : > { %v3166_v30 = vpop.eup %3165 }
 0x462   : > { %2891 = vadd.xlane.f32.xlu1 %v3166_v30 }
 0x4ef   : > { %v2892_v25 = vpop.xlane.xlu1 %2891 }
 0x4f0   : > { %3167 = vrcp.f32 %v2892_v25 }
 0x4f7   : > { %2899 = sbr.rel (%p3053_p8) target bundleno = 1278 (0x4fe), region = 64 }
 0x4fa   : > { %v3168_v55 = vpop.eup %3167 }
 0x4fb   : > { %v2894_v4 = vmul.f32 %v3168_v55, %v3166_v30 }
 0x4fd   : > { %2895 = vst [vmem:[#allocation3] sm:$0xff] %v2894_v4  ;;  %2900 = vst [vmem:[#allocation13] sm:$0xff] (!%p3053_p8), %v2894_v4 }
 0x4fe PF: > { %p4829_p10 = scmp.eq.s32.totalorder %s3036_s24, 2  ;;  %s3410_s26 = smov [#allocation13]  }
 0x4ff   : > { %s2911_s27 = sshll.u32 %s3410_s26, 4  ;;  %s3411_s7 = smov [#allocation14]   ;;  %s2912_s27 = int_to_ptr.vmem [resolvable:$true] %s2911_s27 }
 0x500   : > { %s2924_s18 = sshll.u32 %s3411_s7, 4  ;;  %s3283_s28 = scalar_lea.vmem %s2912_s27, 128  ;;  %s4833_s18 = int_to_ptr.vmem [resolvable:$true] %s2924_s18 }
 0x501   : > { %p3284_p4 = scmp.ne.s32.totalorder %s2912_s27, %s3283_s28  ;;  %p3290_p11 = scmp.lt.s32.totalorder %s2912_s27, %s2912_s27 }
 0x502   : > { %p3291_p13 = scmp.lt.s32.totalorder %s3283_s28, %s3283_s28 }
 0x503   : > { %p3285_p1 = pnand %p3284_p4, %p4829_p10 }
 0x504   : > { %p3292_p2 = por %p3291_p13, %p3290_p11 }
 0x505   : > { %p3286_p5 = pneg %p3285_p1 }
 0x507   : > { %p3293_p3 = pnand %p3292_p2, %p3286_p5 }
 0x509   : > { %3296 = shalt.err (!%p3293_p3)
}
 0x50a   : > { %s3297_s6 = scalar_lea.hbm %s4906_s4, 128 }
 0x50b   : > { %p3298_p12 = scmp.ne.s32.totalorder %s4906_s4, %s3297_s6  ;;  %p3303_p6 = scmp.lt.u32.totalorder %s3297_s6, %s4906_s4 }
 0x50d   : > { %p3299_p0 = pnand %p3298_p12, %p4829_p10 }
 0x50f   : > { %p3300_p7 = pneg %p3299_p0 }
 0x511   : > { %p3305_p9 = pnand %p3303_p6, %p3300_p7 }
 0x513   : > { %3308 = shalt.err (!%p3305_p9)
}
 0x514   : > { %3076 = dma.vmem_to_hbm [thread:$0]  (%p4829_p10), %s2912_s27, 128, %s4906_s4, [#allocation7]  }
 0x515   : > { %s3309_s15 = scalar_lea.vmem %s4833_s18, 128  ;;  %p3316_p5 = scmp.lt.s32.totalorder %s4833_s18, %s4833_s18 }
 0x516   : > { %p3310_p8 = scmp.ne.s32.totalorder %s4833_s18, %s3309_s15  ;;  %p3317_p11 = scmp.lt.s32.totalorder %s3309_s15, %s3309_s15 }
 0x518   : > { %p3311_p4 = pnand %p3310_p8, %p4829_p10  ;;  %p3318_p13 = por %p3317_p11, %p3316_p5 }
 0x51a   : > { %p3312_p1 = pneg %p3311_p4 }
 0x51c   : > { %p3319_p2 = pnand %p3318_p13, %p3312_p1 }
 0x51e   : > { %3322 = shalt.err (!%p3319_p2)
}
 0x51f   : > { %s3323_s13 = scalar_lea.hbm %s4907_s5, 128 }
 0x520   : > { %p3324_p3 = scmp.ne.s32.totalorder %s4907_s5, %s3323_s13  ;;  %p3329_p7 = scmp.lt.u32.totalorder %s3323_s13, %s4907_s5 }
 0x522   : > { %p3325_p12 = pnand %p3324_p3, %p4829_p10 }
 0x524   : > { %p3326_p0 = pneg %p3325_p12 }
 0x526   : > { %p3331_p6 = pnand %p3329_p7, %p3326_p0 }
 0x528   : > { %3334 = shalt.err (!%p3331_p6)
}
 0x529   : > { %3078 = dma.vmem_to_hbm [thread:$0]  (%p4829_p10), %s4833_s18, 128, %s4907_s5, [#allocation15]  }
 0x52a   : > { %3372 = dma.done.wait (%p4829_p10), [#allocation7], 128  }
 0x52b   : > { %3374 = vsyncadd (%p4829_p10), [#allocation7], 4294967168 }
 0x52c   : > { %3376 = dma.done.wait (%p4829_p10), [#allocation15], 128  }
 0x52d   : > { %3378 = vsyncadd (%p4829_p10), [#allocation15], 4294967168 }
 0x52e PF: > { %s23_s23 = sadd.s32 1, %s3401_s23   ;;  %s4928_s18 = smov %s3385_s19 }
 0x52f   : > { %p20_p9 = scmp.ge.s32.totalorder %s23_s23, 5   ;;  %s4929_s19 = smov %s3389_s20 }
 0x530   : > { %s4930_s20 = smov %s3581_s9  ;;  %s4931_s21 = smov %s3397_s22 }
 0x531   : > { %s4932_s22 = smov %s4934_s17  ;;  %22 = sbr.rel (!%p20_p9) target bundleno = 8 (0x8), region = 110 }
 0x538   :  { %2941 = vsyncpa [#allocation6], 1 }
 0x539   :  { %2943 = vsyncpa [#allocation6 + $0x1], 1 }
 0x53a   :  { %2944 = vsyncpa [#allocation9], 1 }
 0x53b   :  { %2945 = vsyncpa [#allocation12], 1 }
 0x53c   :  { %2947 = vsyncpa [#allocation12 + $0x1], 1 }
 0x53d   :  { %2948 = vsyncpa [#allocation7], 1 }
 0x53e   :  { %2950 = vsyncpa [#allocation7 + $0x1], 1 }
 0x53f   :  { %2951 = vsyncpa [#allocation15], 1 }

</bundles_post_ra>
